<compile_context>
chip_gen: v5e
topology: v5e:2x2
jax: 0.10.0
libtpu: 0.0.40
codegen_flags: <defaults>
</compile_context>

<pallas_src>
import functools

import jax
import jax.numpy as jnp
from jax import lax
from jax.experimental import pallas as pl
from jax.experimental.pallas import tpu as pltpu


# Below this channel count channel mixing uses SMEM-scalar VPU FMAs; at/above it the
# nine taps are stacked into a single (9C, HW) operand for one MXU matmul.
_MXU_MIN_CHANNELS = 32


def _const_spec(block_shape, index_map):
    """BlockSpec for a block whose index_map never changes: single-buffer it.

    Falls back to a plain (double-buffered) BlockSpec on JAX versions without
    pipeline_mode / pl.Buffered -- only costs VMEM, never correctness.
    """
    try:
        return pl.BlockSpec(block_shape, index_map, pipeline_mode=pl.Buffered(1))
    except (AttributeError, TypeError):
        return pl.BlockSpec(block_shape, index_map)


def _vmem_limit(est_bytes):
    # Raise above v5e's 16 MiB default, never above v7x's 64 MiB physical.
    return int(min(64 << 20, max(32 << 20, 2 * est_bytes + (4 << 20))))


def _choose_t_tile(T, C, HW, itemsize, budget=4 << 20):
    """Largest T tile whose (C, t_tile, HW) x-block fits `budget`.

    Tiles must be multiples of 8 (sublane rule) and divide T; otherwise use full T.
    """
    if C * T * HW * itemsize <= budget:
        return T
    divs = [d for d in range(8, T, 8) if T % d == 0]
    if not divs:
        return T
    fitting = [d for d in divs if C * d * HW * itemsize <= budget]
    return max(fitting) if fitting else min(divs)


def _mean_conv_kernel(x_ref, w_ref, b_ref, mask_ref, o_ref, sum_ref, *, W, T, use_mxu):
    # x_ref:    (C, t_tile, HW)  one T tile of one batch element, lane axis = H*W
    # w_ref:    use_mxu: (C, 9C) VMEM, column k*C+ci = weight[:, ci, ky, kx], k=ky*3+kx
    #           else:    (9*C*C,) SMEM, flat index k*C*C + co*C + ci = weight[co,ci,ky,kx]
    # b_ref:    (C, 1)  f32
    # mask_ref: (9, HW) f32, 1.0 where tap (ky, kx) reads in bounds, else 0.0
    # o_ref:    (C, HW) conv(mean_t(x)) + bias, written on the last T step
    # sum_ref:  (C, HW) f32 scratch: running temporal sum
    C, HW = o_ref.shape
    t_tile = x_ref.shape[1]
    tt = pl.program_id(1)

    @pl.when(tt == 0)
    def _():
        sum_ref[...] = jnp.zeros_like(sum_ref)

    # Temporal accumulation as plain VPU adds (keeps the XLU free for the conv rolls).
    s = sum_ref[...]
    for t in range(t_tile):
        s = s + x_ref[:, t, :].astype(jnp.float32)
    sum_ref[...] = s

    @pl.when(tt == pl.num_programs(1) - 1)
    def _():
        mean = sum_ref[...] * (1.0 / T)                          # (C, HW) f32

        # 9 shifted + zero-padded taps of the mean (lane rolls on the flat HW axis).
        taps = []
        for dy in (-1, 0, 1):
            for dx in (-1, 0, 1):
                if dy == 0 and dx == 0:
                    taps.append(mean)                            # center tap: all in-bounds
                else:
                    k = (dy + 1) * 3 + (dx + 1)
                    off = dy * W + dx
                    shifted = pltpu.roll(mean, shift=(-off) % HW, axis=1)
                    taps.append(shifted * mask_ref[k:k + 1, :])

        if use_mxu:
            # Single (C, 9C) @ (9C, HW) matmul instead of nine (C, C) @ (C, HW).
            stacked = jnp.concatenate(taps, axis=0)              # (9C, HW)
            acc = jnp.dot(w_ref[...], stacked,
                          preferred_element_type=jnp.float32)    # (C, HW)
        else:
            # Small C: SMEM scalar weights splat into VPU FMAs (no lane-column slices).
            rows = []
            for co in range(C):
                r = jnp.zeros((1, HW), dtype=jnp.float32)
                for k in range(9):
                    base = k * C * C + co * C
                    tap = taps[k]
                    for ci in range(C):
                        r = r + w_ref[base + ci] * tap[ci:ci + 1, :]
                rows.append(r)
            acc = jnp.concatenate(rows, axis=0)                  # (C, HW)

        o_ref[...] = (acc + b_ref[...]).astype(o_ref.dtype)      # bias stays f32


def _sub_kernel(x_ref, m_ref, o_ref, *, reps):
    # x_ref, o_ref: (reps*N*C, HW) consecutive flat (n, c, t) planes, block start is a
    #               multiple of N*C  ->  row j subtracts conv row j % (N*C).
    # m_ref:        (N*C, HW) conv result, resident in VMEM.
    if reps == 1:
        o_ref[...] = x_ref[...] - m_ref[...]
    else:
        P, HW = m_ref.shape
        xb = x_ref[...].reshape(reps, P, HW)
        o_ref[...] = (xb - m_ref[...][None, :, :]).reshape(reps * P, HW)


def spatial_reinforcement(x, weight, bias, n_segment):
    """x: (N, C, T, H, W); weight: (C, C, 3, 3) [OIHW]; bias: (C,)."""
    N, C, T, H, W = x.shape
    assert T == n_segment, "forward shapes only work when t == n_segment"
    HW = H * W
    itemsize = jnp.dtype(x.dtype).itemsize

    # Free, contiguous reshape: lane axis becomes H*W (lane-dense loads/stores).
    x4 = x.reshape(N, C, T, HW)

    # Tiny parameter re-packs, all kept f32 so the conv accumulates in f32 even for
    # bf16 inputs; only the final stores cast to x.dtype.
    use_mxu = C >= _MXU_MIN_CHANNELS
    if use_mxu:
        w_arg = jnp.transpose(weight, (0, 2, 3, 1)).reshape(C, 9 * C).astype(jnp.float32)
    else:
        # flat (ky, kx, co, ci) order for SMEM scalar reads
        w_arg = jnp.transpose(weight, (2, 3, 0, 1)).reshape(-1).astype(jnp.float32)
    b_r = bias.reshape(C, 1).astype(jnp.float32)

    yy = jnp.arange(HW, dtype=jnp.int32) // W
    xx = jnp.arange(HW, dtype=jnp.int32) % W
    masks = []
    for dy in (-1, 0, 1):
        for dx in (-1, 0, 1):
            masks.append((yy + dy >= 0) & (yy + dy < H)
                         & (xx + dx >= 0) & (xx + dx < W))
    tap_mask = jnp.stack(masks, axis=0).astype(jnp.float32)          # (9, HW)

    # ---- Kernel 1: temporal mean + 3x3 conv, T-tiled accumulator ------------
    t_tile = _choose_t_tile(T, C, HW, itemsize)
    num_tt = T // t_tile
    if use_mxu:
        w_spec = _const_spec((C, 9 * C), lambda n, tt: (0, 0))
    else:
        w_spec = pl.BlockSpec(memory_space=pltpu.MemorySpace.SMEM)
    k1_est = (2 * C * t_tile * HW * itemsize          # x block (double-buffered)
              + 2 * C * HW * itemsize                 # out block
              + C * HW * 4                            # f32 sum scratch
              + 2 * (9 * C * C * 4 + 9 * HW * 4 + 8 * 128 * 4))
    conv = pl.pallas_call(
        functools.partial(_mean_conv_kernel, W=W, T=T, use_mxu=use_mxu),
        out_shape=jax.ShapeDtypeStruct((N, C, HW), x.dtype),
        grid=(N, num_tt),
        in_specs=[
            pl.BlockSpec((None, C, t_tile, HW), lambda n, tt: (n, 0, tt, 0)),
            w_spec,
            _const_spec((C, 1), lambda n, tt: (0, 0)),
            _const_spec((9, HW), lambda n, tt: (0, 0)),
        ],
        out_specs=pl.BlockSpec((None, C, HW), lambda n, tt: (n, 0, 0)),
        scratch_shapes=[pltpu.VMEM((C, HW), jnp.float32)],
        compiler_params=pltpu.CompilerParams(
            dimension_semantics=("parallel", "arbitrary"),
            vmem_limit_bytes=_vmem_limit(k1_est)),
    )(x4, w_arg, b_r, tap_mask)

    m2 = conv.reshape(N * C, HW)                                     # free reshape

    # ---- Kernel 2: out = x - conv[flat_plane % (N*C)] -----------------------
    # Flat (n, c, t) plane ordering: each block of N*C consecutive planes (starting
    # at a multiple of N*C) maps exactly onto m2 rows 0..N*C-1, so the kernel body is
    # one large unmasked vector subtract per grid step.
    planes = N * C
    reps = 1
    while (planes * reps) % 8 != 0 and reps < 8:      # sublane-align the block
        reps *= 2
    if T % reps != 0:
        reps = T                                      # degenerate fallback: one block
    steps = T // reps

    xflat = x4.reshape(N * C * T, HW)                                # free reshape
    k2_est = (2 * 2 * planes * reps * HW * itemsize   # x + out blocks (double-buffered)
              + 2 * planes * HW * itemsize)           # resident conv result
    out_flat = pl.pallas_call(
        functools.partial(_sub_kernel, reps=reps),
        out_shape=jax.ShapeDtypeStruct((N * C * T, HW), x.dtype),
        grid=(steps,),
        in_specs=[
            pl.BlockSpec((planes * reps, HW), lambda k: (k, 0)),
            _const_spec((planes, HW), lambda k: (0, 0)),
        ],
        out_specs=pl.BlockSpec((planes * reps, HW), lambda k: (k, 0)),
        compiler_params=pltpu.CompilerParams(
            dimension_semantics=("parallel",),
            vmem_limit_bytes=_vmem_limit(k2_est)),
    )(xflat, m2)

    return out_flat.reshape(N, C, T, H, W)


def _reference(x, weight, bias, n_segment):
    # pure-JAX reference mirroring the PyTorch module (incl. repeat().view() semantics)
    N, C, T, H, W = x.shape
    x_mean = jnp.mean(x, axis=2)
    conv = lax.conv_general_dilated(
        x_mean, weight, window_strides=(1, 1), padding=((1, 1), (1, 1)),
        dimension_numbers=("NCHW", "OIHW", "NCHW")) + bias.reshape(1, C, 1, 1)
    mean_view = jnp.broadcast_to(conv[None], (T, N, C, H, W)).reshape(
        N, C, T, H, W)
    return x - mean_view


if __name__ == "__main__":
    N, C, T, H, W = 2, 4, 8, 16, 16   # planes=4, n_segment=8
    n_segment = T

    key = jax.random.PRNGKey(0)
    kx, kw, kb = jax.random.split(key, 3)
    x = jax.random.normal(kx, (N, C, T, H, W), dtype=jnp.float32)
    weight = jax.random.normal(kw, (C, C, 3, 3), dtype=jnp.float32) * 0.1
    bias = jax.random.normal(kb, (C,), dtype=jnp.float32) * 0.1

    out = spatial_reinforcement(x, weight, bias, n_segment)
    out = jax.block_until_ready(out)

    ref = _reference(x, weight, bias, n_segment)
    assert out.shape == (N, C, T, H, W)
    err = float(jnp.max(jnp.abs(out - ref)))
    assert err < 1e-3, f"mismatch vs reference, max abs err = {err}"

    print("KERNEL_OK")
</pallas_src>

<mosaic_0001>
module attributes {stable_mosaic.version = 11 : i64} {
  func.func @_mean_conv_kernel(%arg0: i32, %arg1: i32, %arg2: memref<1x4x8x256xf32, #tpu.memory_space<vmem>>, %arg3: memref<144xf32, #tpu.memory_space<smem>>, %arg4: memref<4x1xf32, #tpu.memory_space<vmem>>, %arg5: memref<9x256xf32, #tpu.memory_space<vmem>>, %arg6: memref<1x4x256xf32, #tpu.memory_space<vmem>>, %arg7: memref<4x256xf32, #tpu.memory_space<vmem>>) attributes {dimension_semantics = [#tpu.dimension_semantics<parallel>, #tpu.dimension_semantics<arbitrary>], iteration_bounds = array<i64: 2, 1>, scalar_prefetch = 0 : i64, scratch_operands = 1 : i64, tpu.core_type = #tpu.core_type<tc>, window_params = [{transform_indices = @transform_0, window_bounds = array<i64: 1, 4, 8, 256>}, {transform_indices = @transform_1, window_bounds = array<i64: 144>}, {pipeline_mode = #tpu.pipeline_mode<synchronous>, transform_indices = @transform_2, window_bounds = array<i64: 4, 1>}, {pipeline_mode = #tpu.pipeline_mode<synchronous>, transform_indices = @transform_3, window_bounds = array<i64: 9, 256>}, {transform_indices = @transform_4, window_bounds = array<i64: 1, 4, 256>}]} {
    %c0_i32 = arith.constant 0 : i32
    %0 = arith.cmpi eq, %arg1, %c0_i32 : i32
    %1 = arith.extui %0 : i1 to i32
    %c0_i32_0 = arith.constant 0 : i32
    %2 = arith.cmpi ne, %1, %c0_i32_0 : i32
    scf.if %2 {
      %cst = arith.constant 0.000000e+00 : f32
      %32 = vector.broadcast %cst : f32 to vector<4x256xf32>
      %c0_31 = arith.constant 0 : index
      %c0_32 = arith.constant 0 : index
      %33 = vector.load %arg7[%c0_31, %c0_32] : memref<4x256xf32, #tpu.memory_space<vmem>>, vector<4x256xf32>
      tpu.vector_store %arg7[%c0_31, %c0_32], %32 {strides = array<i32>} : memref<4x256xf32, #tpu.memory_space<vmem>>, vector<4x256xf32>,
    } else {
    }
    %c0 = arith.constant 0 : index
    %c0_1 = arith.constant 0 : index
    %3 = vector.load %arg7[%c0, %c0_1] : memref<4x256xf32, #tpu.memory_space<vmem>>, vector<4x256xf32>
    %c0_2 = arith.constant 0 : index
    %c0_3 = arith.constant 0 : index
    %c0_4 = arith.constant 0 : index
    %c0_5 = arith.constant 0 : index
    %4 = vector.load %arg2[%c0_2, %c0_3, %c0_4, %c0_5] : memref<1x4x8x256xf32, #tpu.memory_space<vmem>>, vector<1x4x1x256xf32>
    %5 = vector.shape_cast %4 : vector<1x4x1x256xf32> to vector<4x256xf32>
    %6 = arith.addf %3, %5 : vector<4x256xf32>
    %c0_6 = arith.constant 0 : index
    %c0_7 = arith.constant 0 : index
    %c1 = arith.constant 1 : index
    %c0_8 = arith.constant 0 : index
    %7 = vector.load %arg2[%c0_6, %c0_7, %c1, %c0_8] : memref<1x4x8x256xf32, #tpu.memory_space<vmem>>, vector<1x4x1x256xf32>
    %8 = vector.shape_cast %7 : vector<1x4x1x256xf32> to vector<4x256xf32>
    %9 = arith.addf %6, %8 : vector<4x256xf32>
    %c0_9 = arith.constant 0 : index
    %c0_10 = arith.constant 0 : index
    %c2 = arith.constant 2 : index
    %c0_11 = arith.constant 0 : index
    %10 = vector.load %arg2[%c0_9, %c0_10, %c2, %c0_11] : memref<1x4x8x256xf32, #tpu.memory_space<vmem>>, vector<1x4x1x256xf32>
    %11 = vector.shape_cast %10 : vector<1x4x1x256xf32> to vector<4x256xf32>
    %12 = arith.addf %9, %11 : vector<4x256xf32>
    %c0_12 = arith.constant 0 : index
    %c0_13 = arith.constant 0 : index
    %c3 = arith.constant 3 : index
    %c0_14 = arith.constant 0 : index
    %13 = vector.load %arg2[%c0_12, %c0_13, %c3, %c0_14] : memref<1x4x8x256xf32, #tpu.memory_space<vmem>>, vector<1x4x1x256xf32>
    %14 = vector.shape_cast %13 : vector<1x4x1x256xf32> to vector<4x256xf32>
    %15 = arith.addf %12, %14 : vector<4x256xf32>
    %c0_15 = arith.constant 0 : index
    %c0_16 = arith.constant 0 : index
    %c4 = arith.constant 4 : index
    %c0_17 = arith.constant 0 : index
    %16 = vector.load %arg2[%c0_15, %c0_16, %c4, %c0_17] : memref<1x4x8x256xf32, #tpu.memory_space<vmem>>, vector<1x4x1x256xf32>
    %17 = vector.shape_cast %16 : vector<1x4x1x256xf32> to vector<4x256xf32>
    %18 = arith.addf %15, %17 : vector<4x256xf32>
    %c0_18 = arith.constant 0 : index
    %c0_19 = arith.constant 0 : index
    %c5 = arith.constant 5 : index
    %c0_20 = arith.constant 0 : index
    %19 = vector.load %arg2[%c0_18, %c0_19, %c5, %c0_20] : memref<1x4x8x256xf32, #tpu.memory_space<vmem>>, vector<1x4x1x256xf32>
    %20 = vector.shape_cast %19 : vector<1x4x1x256xf32> to vector<4x256xf32>
    %21 = arith.addf %18, %20 : vector<4x256xf32>
    %c0_21 = arith.constant 0 : index
    %c0_22 = arith.constant 0 : index
    %c6 = arith.constant 6 : index
    %c0_23 = arith.constant 0 : index
    %22 = vector.load %arg2[%c0_21, %c0_22, %c6, %c0_23] : memref<1x4x8x256xf32, #tpu.memory_space<vmem>>, vector<1x4x1x256xf32>
    %23 = vector.shape_cast %22 : vector<1x4x1x256xf32> to vector<4x256xf32>
    %24 = arith.addf %21, %23 : vector<4x256xf32>
    %c0_24 = arith.constant 0 : index
    %c0_25 = arith.constant 0 : index
    %c7 = arith.constant 7 : index
    %c0_26 = arith.constant 0 : index
    %25 = vector.load %arg2[%c0_24, %c0_25, %c7, %c0_26] : memref<1x4x8x256xf32, #tpu.memory_space<vmem>>, vector<1x4x1x256xf32>
    %26 = vector.shape_cast %25 : vector<1x4x1x256xf32> to vector<4x256xf32>
    %27 = arith.addf %24, %26 : vector<4x256xf32>
    %c0_27 = arith.constant 0 : index
    %c0_28 = arith.constant 0 : index
    %28 = vector.load %arg7[%c0_27, %c0_28] : memref<4x256xf32, #tpu.memory_space<vmem>>, vector<4x256xf32>
    tpu.vector_store %arg7[%c0_27, %c0_28], %27 {strides = array<i32>} : memref<4x256xf32, #tpu.memory_space<vmem>>, vector<4x256xf32>,
    %c0_i32_29 = arith.constant 0 : i32
    %29 = arith.cmpi eq, %arg1, %c0_i32_29 : i32
    %30 = arith.extui %29 : i1 to i32
    %c0_i32_30 = arith.constant 0 : i32
    %31 = arith.cmpi ne, %30, %c0_i32_30 : i32
    scf.if %31 {
      %c0_31 = arith.constant 0 : index
      %c0_32 = arith.constant 0 : index
      %32 = vector.load %arg7[%c0_31, %c0_32] : memref<4x256xf32, #tpu.memory_space<vmem>>, vector<4x256xf32>
      %cst = arith.constant 1.250000e-01 : f32
      %33 = vector.broadcast %cst : f32 to vector<4x256xf32>
      %34 = arith.mulf %32, %33 : vector<4x256xf32>
      %c17_i32 = arith.constant 17 : i32
      %35 = tpu.dynamic_rotate %34 by %c17_i32 dim 1 : vector<4x256xf32>, i32 -> vector<4x256xf32>
      %c0_33 = arith.constant 0 : index
      %c0_34 = arith.constant 0 : index
      %36 = vector.load %arg5[%c0_33, %c0_34] : memref<9x256xf32, #tpu.memory_space<vmem>>, vector<1x256xf32>
      %37 = vector.broadcast %36 : vector<1x256xf32> to vector<4x256xf32>
      %38 = arith.mulf %35, %37 : vector<4x256xf32>
      %c16_i32 = arith.constant 16 : i32
      %39 = tpu.dynamic_rotate %34 by %c16_i32 dim 1 : vector<4x256xf32>, i32 -> vector<4x256xf32>
      %c1_35 = arith.constant 1 : index
      %c0_36 = arith.constant 0 : index
      %40 = vector.load %arg5[%c1_35, %c0_36] : memref<9x256xf32, #tpu.memory_space<vmem>>, vector<1x256xf32>
      %41 = vector.broadcast %40 : vector<1x256xf32> to vector<4x256xf32>
      %42 = arith.mulf %39, %41 : vector<4x256xf32>
      %c15_i32 = arith.constant 15 : i32
      %43 = tpu.dynamic_rotate %34 by %c15_i32 dim 1 : vector<4x256xf32>, i32 -> vector<4x256xf32>
      %c2_37 = arith.constant 2 : index
      %c0_38 = arith.constant 0 : index
      %44 = vector.load %arg5[%c2_37, %c0_38] : memref<9x256xf32, #tpu.memory_space<vmem>>, vector<1x256xf32>
      %45 = vector.broadcast %44 : vector<1x256xf32> to vector<4x256xf32>
      %46 = arith.mulf %43, %45 : vector<4x256xf32>
      %c1_i32 = arith.constant 1 : i32
      %47 = tpu.dynamic_rotate %34 by %c1_i32 dim 1 : vector<4x256xf32>, i32 -> vector<4x256xf32>
      %c3_39 = arith.constant 3 : index
      %c0_40 = arith.constant 0 : index
      %48 = vector.load %arg5[%c3_39, %c0_40] : memref<9x256xf32, #tpu.memory_space<vmem>>, vector<1x256xf32>
      %49 = vector.broadcast %48 : vector<1x256xf32> to vector<4x256xf32>
      %50 = arith.mulf %47, %49 : vector<4x256xf32>
      %c255_i32 = arith.constant 255 : i32
      %51 = tpu.dynamic_rotate %34 by %c255_i32 dim 1 : vector<4x256xf32>, i32 -> vector<4x256xf32>
      %c5_41 = arith.constant 5 : index
      %c0_42 = arith.constant 0 : index
      %52 = vector.load %arg5[%c5_41, %c0_42] : memref<9x256xf32, #tpu.memory_space<vmem>>, vector<1x256xf32>
      %53 = vector.broadcast %52 : vector<1x256xf32> to vector<4x256xf32>
      %54 = arith.mulf %51, %53 : vector<4x256xf32>
      %c241_i32 = arith.constant 241 : i32
      %55 = tpu.dynamic_rotate %34 by %c241_i32 dim 1 : vector<4x256xf32>, i32 -> vector<4x256xf32>
      %c6_43 = arith.constant 6 : index
      %c0_44 = arith.constant 0 : index
      %56 = vector.load %arg5[%c6_43, %c0_44] : memref<9x256xf32, #tpu.memory_space<vmem>>, vector<1x256xf32>
      %57 = vector.broadcast %56 : vector<1x256xf32> to vector<4x256xf32>
      %58 = arith.mulf %55, %57 : vector<4x256xf32>
      %c240_i32 = arith.constant 240 : i32
      %59 = tpu.dynamic_rotate %34 by %c240_i32 dim 1 : vector<4x256xf32>, i32 -> vector<4x256xf32>
      %c7_45 = arith.constant 7 : index
      %c0_46 = arith.constant 0 : index
      %60 = vector.load %arg5[%c7_45, %c0_46] : memref<9x256xf32, #tpu.memory_space<vmem>>, vector<1x256xf32>
      %61 = vector.broadcast %60 : vector<1x256xf32> to vector<4x256xf32>
      %62 = arith.mulf %59, %61 : vector<4x256xf32>
      %c239_i32 = arith.constant 239 : i32
      %63 = tpu.dynamic_rotate %34 by %c239_i32 dim 1 : vector<4x256xf32>, i32 -> vector<4x256xf32>
      %c8 = arith.constant 8 : index
      %c0_47 = arith.constant 0 : index
      %64 = vector.load %arg5[%c8, %c0_47] : memref<9x256xf32, #tpu.memory_space<vmem>>, vector<1x256xf32>
      %65 = vector.broadcast %64 : vector<1x256xf32> to vector<4x256xf32>
      %66 = arith.mulf %63, %65 : vector<4x256xf32>
      %cst_48 = arith.constant 0.000000e+00 : f32
      %67 = vector.broadcast %cst_48 : f32 to vector<1x256xf32>
      %c0_49 = arith.constant 0 : index
      %68 = memref.load %arg3[%c0_49] : memref<144xf32, #tpu.memory_space<smem>>
      %69 = vector.extract_strided_slice %38 {offsets = [0, 0], sizes = [1, 256], strides = [1, 1]} : vector<4x256xf32> to vector<1x256xf32>
      %70 = vector.broadcast %68 : f32 to vector<1x256xf32>
      %71 = arith.mulf %70, %69 : vector<1x256xf32>
      %72 = arith.addf %67, %71 : vector<1x256xf32>
      %c1_50 = arith.constant 1 : index
      %73 = memref.load %arg3[%c1_50] : memref<144xf32, #tpu.memory_space<smem>>
      %74 = vector.extract_strided_slice %38 {offsets = [1, 0], sizes = [1, 256], strides = [1, 1]} : vector<4x256xf32> to vector<1x256xf32>
      %75 = vector.broadcast %73 : f32 to vector<1x256xf32>
      %76 = arith.mulf %75, %74 : vector<1x256xf32>
      %77 = arith.addf %72, %76 : vector<1x256xf32>
      %c2_51 = arith.constant 2 : index
      %78 = memref.load %arg3[%c2_51] : memref<144xf32, #tpu.memory_space<smem>>
      %79 = vector.extract_strided_slice %38 {offsets = [2, 0], sizes = [1, 256], strides = [1, 1]} : vector<4x256xf32> to vector<1x256xf32>
      %80 = vector.broadcast %78 : f32 to vector<1x256xf32>
      %81 = arith.mulf %80, %79 : vector<1x256xf32>
      %82 = arith.addf %77, %81 : vector<1x256xf32>
      %c3_52 = arith.constant 3 : index
      %83 = memref.load %arg3[%c3_52] : memref<144xf32, #tpu.memory_space<smem>>
      %84 = vector.extract_strided_slice %38 {offsets = [3, 0], sizes = [1, 256], strides = [1, 1]} : vector<4x256xf32> to vector<1x256xf32>
      %85 = vector.broadcast %83 : f32 to vector<1x256xf32>
      %86 = arith.mulf %85, %84 : vector<1x256xf32>
      %87 = arith.addf %82, %86 : vector<1x256xf32>
      %c16 = arith.constant 16 : index
      %88 = memref.load %arg3[%c16] : memref<144xf32, #tpu.memory_space<smem>>
      %89 = vector.extract_strided_slice %42 {offsets = [0, 0], sizes = [1, 256], strides = [1, 1]} : vector<4x256xf32> to vector<1x256xf32>
      %90 = vector.broadcast %88 : f32 to vector<1x256xf32>
      %91 = arith.mulf %90, %89 : vector<1x256xf32>
      %92 = arith.addf %87, %91 : vector<1x256xf32>
      %c17 = arith.constant 17 : index
      %93 = memref.load %arg3[%c17] : memref<144xf32, #tpu.memory_space<smem>>
      %94 = vector.extract_strided_slice %42 {offsets = [1, 0], sizes = [1, 256], strides = [1, 1]} : vector<4x256xf32> to vector<1x256xf32>
      %95 = vector.broadcast %93 : f32 to vector<1x256xf32>
      %96 = arith.mulf %95, %94 : vector<1x256xf32>
      %97 = arith.addf %92, %96 : vector<1x256xf32>
      %c18 = arith.constant 18 : index
      %98 = memref.load %arg3[%c18] : memref<144xf32, #tpu.memory_space<smem>>
      %99 = vector.extract_strided_slice %42 {offsets = [2, 0], sizes = [1, 256], strides = [1, 1]} : vector<4x256xf32> to vector<1x256xf32>
      %100 = vector.broadcast %98 : f32 to vector<1x256xf32>
      %101 = arith.mulf %100, %99 : vector<1x256xf32>
      %102 = arith.addf %97, %101 : vector<1x256xf32>
      %c19 = arith.constant 19 : index
      %103 = memref.load %arg3[%c19] : memref<144xf32, #tpu.memory_space<smem>>
      %104 = vector.extract_strided_slice %42 {offsets = [3, 0], sizes = [1, 256], strides = [1, 1]} : vector<4x256xf32> to vector<1x256xf32>
      %105 = vector.broadcast %103 : f32 to vector<1x256xf32>
      %106 = arith.mulf %105, %104 : vector<1x256xf32>
      %107 = arith.addf %102, %106 : vector<1x256xf32>
      %c32 = arith.constant 32 : index
      %108 = memref.load %arg3[%c32] : memref<144xf32, #tpu.memory_space<smem>>
      %109 = vector.extract_strided_slice %46 {offsets = [0, 0], sizes = [1, 256], strides = [1, 1]} : vector<4x256xf32> to vector<1x256xf32>
      %110 = vector.broadcast %108 : f32 to vector<1x256xf32>
      %111 = arith.mulf %110, %109 : vector<1x256xf32>
      %112 = arith.addf %107, %111 : vector<1x256xf32>
      %c33 = arith.constant 33 : index
      %113 = memref.load %arg3[%c33] : memref<144xf32, #tpu.memory_space<smem>>
      %114 = vector.extract_strided_slice %46 {offsets = [1, 0], sizes = [1, 256], strides = [1, 1]} : vector<4x256xf32> to vector<1x256xf32>
      %115 = vector.broadcast %113 : f32 to vector<1x256xf32>
      %116 = arith.mulf %115, %114 : vector<1x256xf32>
      %117 = arith.addf %112, %116 : vector<1x256xf32>
      %c34 = arith.constant 34 : index
      %118 = memref.load %arg3[%c34] : memref<144xf32, #tpu.memory_space<smem>>
      %119 = vector.extract_strided_slice %46 {offsets = [2, 0], sizes = [1, 256], strides = [1, 1]} : vector<4x256xf32> to vector<1x256xf32>
      %120 = vector.broadcast %118 : f32 to vector<1x256xf32>
      %121 = arith.mulf %120, %119 : vector<1x256xf32>
      %122 = arith.addf %117, %121 : vector<1x256xf32>
      %c35 = arith.constant 35 : index
      %123 = memref.load %arg3[%c35] : memref<144xf32, #tpu.memory_space<smem>>
      %124 = vector.extract_strided_slice %46 {offsets = [3, 0], sizes = [1, 256], strides = [1, 1]} : vector<4x256xf32> to vector<1x256xf32>
      %125 = vector.broadcast %123 : f32 to vector<1x256xf32>
      %126 = arith.mulf %125, %124 : vector<1x256xf32>
      %127 = arith.addf %122, %126 : vector<1x256xf32>
      %c48 = arith.constant 48 : index
      %128 = memref.load %arg3[%c48] : memref<144xf32, #tpu.memory_space<smem>>
      %129 = vector.extract_strided_slice %50 {offsets = [0, 0], sizes = [1, 256], strides = [1, 1]} : vector<4x256xf32> to vector<1x256xf32>
      %130 = vector.broadcast %128 : f32 to vector<1x256xf32>
      %131 = arith.mulf %130, %129 : vector<1x256xf32>
      %132 = arith.addf %127, %131 : vector<1x256xf32>
      %c49 = arith.constant 49 : index
      %133 = memref.load %arg3[%c49] : memref<144xf32, #tpu.memory_space<smem>>
      %134 = vector.extract_strided_slice %50 {offsets = [1, 0], sizes = [1, 256], strides = [1, 1]} : vector<4x256xf32> to vector<1x256xf32>
      %135 = vector.broadcast %133 : f32 to vector<1x256xf32>
      %136 = arith.mulf %135, %134 : vector<1x256xf32>
      %137 = arith.addf %132, %136 : vector<1x256xf32>
      %c50 = arith.constant 50 : index
      %138 = memref.load %arg3[%c50] : memref<144xf32, #tpu.memory_space<smem>>
      %139 = vector.extract_strided_slice %50 {offsets = [2, 0], sizes = [1, 256], strides = [1, 1]} : vector<4x256xf32> to vector<1x256xf32>
      %140 = vector.broadcast %138 : f32 to vector<1x256xf32>
      %141 = arith.mulf %140, %139 : vector<1x256xf32>
      %142 = arith.addf %137, %141 : vector<1x256xf32>
      %c51 = arith.constant 51 : index
      %143 = memref.load %arg3[%c51] : memref<144xf32, #tpu.memory_space<smem>>
      %144 = vector.extract_strided_slice %50 {offsets = [3, 0], sizes = [1, 256], strides = [1, 1]} : vector<4x256xf32> to vector<1x256xf32>
      %145 = vector.broadcast %143 : f32 to vector<1x256xf32>
      %146 = arith.mulf %145, %144 : vector<1x256xf32>
      %147 = arith.addf %142, %146 : vector<1x256xf32>
      %c64 = arith.constant 64 : index
      %148 = memref.load %arg3[%c64] : memref<144xf32, #tpu.memory_space<smem>>
      %149 = vector.extract_strided_slice %34 {offsets = [0, 0], sizes = [1, 256], strides = [1, 1]} : vector<4x256xf32> to vector<1x256xf32>
      %150 = vector.broadcast %148 : f32 to vector<1x256xf32>
      %151 = arith.mulf %150, %149 : vector<1x256xf32>
      %152 = arith.addf %147, %151 : vector<1x256xf32>
      %c65 = arith.constant 65 : index
      %153 = memref.load %arg3[%c65] : memref<144xf32, #tpu.memory_space<smem>>
      %154 = vector.extract_strided_slice %34 {offsets = [1, 0], sizes = [1, 256], strides = [1, 1]} : vector<4x256xf32> to vector<1x256xf32>
      %155 = vector.broadcast %153 : f32 to vector<1x256xf32>
      %156 = arith.mulf %155, %154 : vector<1x256xf32>
      %157 = arith.addf %152, %156 : vector<1x256xf32>
      %c66 = arith.constant 66 : index
      %158 = memref.load %arg3[%c66] : memref<144xf32, #tpu.memory_space<smem>>
      %159 = vector.extract_strided_slice %34 {offsets = [2, 0], sizes = [1, 256], strides = [1, 1]} : vector<4x256xf32> to vector<1x256xf32>
      %160 = vector.broadcast %158 : f32 to vector<1x256xf32>
      %161 = arith.mulf %160, %159 : vector<1x256xf32>
      %162 = arith.addf %157, %161 : vector<1x256xf32>
      %c67 = arith.constant 67 : index
      %163 = memref.load %arg3[%c67] : memref<144xf32, #tpu.memory_space<smem>>
      %164 = vector.extract_strided_slice %34 {offsets = [3, 0], sizes = [1, 256], strides = [1, 1]} : vector<4x256xf32> to vector<1x256xf32>
      %165 = vector.broadcast %163 : f32 to vector<1x256xf32>
      %166 = arith.mulf %165, %164 : vector<1x256xf32>
      %167 = arith.addf %162, %166 : vector<1x256xf32>
      %c80 = arith.constant 80 : index
      %168 = memref.load %arg3[%c80] : memref<144xf32, #tpu.memory_space<smem>>
      %169 = vector.extract_strided_slice %54 {offsets = [0, 0], sizes = [1, 256], strides = [1, 1]} : vector<4x256xf32> to vector<1x256xf32>
      %170 = vector.broadcast %168 : f32 to vector<1x256xf32>
      %171 = arith.mulf %170, %169 : vector<1x256xf32>
      %172 = arith.addf %167, %171 : vector<1x256xf32>
      %c81 = arith.constant 81 : index
      %173 = memref.load %arg3[%c81] : memref<144xf32, #tpu.memory_space<smem>>
      %174 = vector.extract_strided_slice %54 {offsets = [1, 0], sizes = [1, 256], strides = [1, 1]} : vector<4x256xf32> to vector<1x256xf32>
      %175 = vector.broadcast %173 : f32 to vector<1x256xf32>
      %176 = arith.mulf %175, %174 : vector<1x256xf32>
      %177 = arith.addf %172, %176 : vector<1x256xf32>
      %c82 = arith.constant 82 : index
      %178 = memref.load %arg3[%c82] : memref<144xf32, #tpu.memory_space<smem>>
      %179 = vector.extract_strided_slice %54 {offsets = [2, 0], sizes = [1, 256], strides = [1, 1]} : vector<4x256xf32> to vector<1x256xf32>
      %180 = vector.broadcast %178 : f32 to vector<1x256xf32>
      %181 = arith.mulf %180, %179 : vector<1x256xf32>
      %182 = arith.addf %177, %181 : vector<1x256xf32>
      %c83 = arith.constant 83 : index
      %183 = memref.load %arg3[%c83] : memref<144xf32, #tpu.memory_space<smem>>
      %184 = vector.extract_strided_slice %54 {offsets = [3, 0], sizes = [1, 256], strides = [1, 1]} : vector<4x256xf32> to vector<1x256xf32>
      %185 = vector.broadcast %183 : f32 to vector<1x256xf32>
      %186 = arith.mulf %185, %184 : vector<1x256xf32>
      %187 = arith.addf %182, %186 : vector<1x256xf32>
      %c96 = arith.constant 96 : index
      %188 = memref.load %arg3[%c96] : memref<144xf32, #tpu.memory_space<smem>>
      %189 = vector.extract_strided_slice %58 {offsets = [0, 0], sizes = [1, 256], strides = [1, 1]} : vector<4x256xf32> to vector<1x256xf32>
      %190 = vector.broadcast %188 : f32 to vector<1x256xf32>
      %191 = arith.mulf %190, %189 : vector<1x256xf32>
      %192 = arith.addf %187, %191 : vector<1x256xf32>
      %c97 = arith.constant 97 : index
      %193 = memref.load %arg3[%c97] : memref<144xf32, #tpu.memory_space<smem>>
      %194 = vector.extract_strided_slice %58 {offsets = [1, 0], sizes = [1, 256], strides = [1, 1]} : vector<4x256xf32> to vector<1x256xf32>
      %195 = vector.broadcast %193 : f32 to vector<1x256xf32>
      %196 = arith.mulf %195, %194 : vector<1x256xf32>
      %197 = arith.addf %192, %196 : vector<1x256xf32>
      %c98 = arith.constant 98 : index
      %198 = memref.load %arg3[%c98] : memref<144xf32, #tpu.memory_space<smem>>
      %199 = vector.extract_strided_slice %58 {offsets = [2, 0], sizes = [1, 256], strides = [1, 1]} : vector<4x256xf32> to vector<1x256xf32>
      %200 = vector.broadcast %198 : f32 to vector<1x256xf32>
      %201 = arith.mulf %200, %199 : vector<1x256xf32>
      %202 = arith.addf %197, %201 : vector<1x256xf32>
      %c99 = arith.constant 99 : index
      %203 = memref.load %arg3[%c99] : memref<144xf32, #tpu.memory_space<smem>>
      %204 = vector.extract_strided_slice %58 {offsets = [3, 0], sizes = [1, 256], strides = [1, 1]} : vector<4x256xf32> to vector<1x256xf32>
      %205 = vector.broadcast %203 : f32 to vector<1x256xf32>
      %206 = arith.mulf %205, %204 : vector<1x256xf32>
      %207 = arith.addf %202, %206 : vector<1x256xf32>
      %c112 = arith.constant 112 : index
      %208 = memref.load %arg3[%c112] : memref<144xf32, #tpu.memory_space<smem>>
      %209 = vector.extract_strided_slice %62 {offsets = [0, 0], sizes = [1, 256], strides = [1, 1]} : vector<4x256xf32> to vector<1x256xf32>
      %210 = vector.broadcast %208 : f32 to vector<1x256xf32>
      %211 = arith.mulf %210, %209 : vector<1x256xf32>
      %212 = arith.addf %207, %211 : vector<1x256xf32>
      %c113 = arith.constant 113 : index
      %213 = memref.load %arg3[%c113] : memref<144xf32, #tpu.memory_space<smem>>
      %214 = vector.extract_strided_slice %62 {offsets = [1, 0], sizes = [1, 256], strides = [1, 1]} : vector<4x256xf32> to vector<1x256xf32>
      %215 = vector.broadcast %213 : f32 to vector<1x256xf32>
      %216 = arith.mulf %215, %214 : vector<1x256xf32>
      %217 = arith.addf %212, %216 : vector<1x256xf32>
      %c114 = arith.constant 114 : index
      %218 = memref.load %arg3[%c114] : memref<144xf32, #tpu.memory_space<smem>>
      %219 = vector.extract_strided_slice %62 {offsets = [2, 0], sizes = [1, 256], strides = [1, 1]} : vector<4x256xf32> to vector<1x256xf32>
      %220 = vector.broadcast %218 : f32 to vector<1x256xf32>
      %221 = arith.mulf %220, %219 : vector<1x256xf32>
      %222 = arith.addf %217, %221 : vector<1x256xf32>
      %c115 = arith.constant 115 : index
      %223 = memref.load %arg3[%c115] : memref<144xf32, #tpu.memory_space<smem>>
      %224 = vector.extract_strided_slice %62 {offsets = [3, 0], sizes = [1, 256], strides = [1, 1]} : vector<4x256xf32> to vector<1x256xf32>
      %225 = vector.broadcast %223 : f32 to vector<1x256xf32>
      %226 = arith.mulf %225, %224 : vector<1x256xf32>
      %227 = arith.addf %222, %226 : vector<1x256xf32>
      %c128 = arith.constant 128 : index
      %228 = memref.load %arg3[%c128] : memref<144xf32, #tpu.memory_space<smem>>
      %229 = vector.extract_strided_slice %66 {offsets = [0, 0], sizes = [1, 256], strides = [1, 1]} : vector<4x256xf32> to vector<1x256xf32>
      %230 = vector.broadcast %228 : f32 to vector<1x256xf32>
      %231 = arith.mulf %230, %229 : vector<1x256xf32>
      %232 = arith.addf %227, %231 : vector<1x256xf32>
      %c129 = arith.constant 129 : index
      %233 = memref.load %arg3[%c129] : memref<144xf32, #tpu.memory_space<smem>>
      %234 = vector.extract_strided_slice %66 {offsets = [1, 0], sizes = [1, 256], strides = [1, 1]} : vector<4x256xf32> to vector<1x256xf32>
      %235 = vector.broadcast %233 : f32 to vector<1x256xf32>
      %236 = arith.mulf %235, %234 : vector<1x256xf32>
      %237 = arith.addf %232, %236 : vector<1x256xf32>
      %c130 = arith.constant 130 : index
      %238 = memref.load %arg3[%c130] : memref<144xf32, #tpu.memory_space<smem>>
      %239 = vector.extract_strided_slice %66 {offsets = [2, 0], sizes = [1, 256], strides = [1, 1]} : vector<4x256xf32> to vector<1x256xf32>
      %240 = vector.broadcast %238 : f32 to vector<1x256xf32>
      %241 = arith.mulf %240, %239 : vector<1x256xf32>
      %242 = arith.addf %237, %241 : vector<1x256xf32>
      %c131 = arith.constant 131 : index
      %243 = memref.load %arg3[%c131] : memref<144xf32, #tpu.memory_space<smem>>
      %244 = vector.extract_strided_slice %66 {offsets = [3, 0], sizes = [1, 256], strides = [1, 1]} : vector<4x256xf32> to vector<1x256xf32>
      %245 = vector.broadcast %243 : f32 to vector<1x256xf32>
      %246 = arith.mulf %245, %244 : vector<1x256xf32>
      %247 = arith.addf %242, %246 : vector<1x256xf32>
      %cst_53 = arith.constant 0.000000e+00 : f32
      %248 = vector.broadcast %cst_53 : f32 to vector<1x256xf32>
      %c4_54 = arith.constant 4 : index
      %249 = memref.load %arg3[%c4_54] : memref<144xf32, #tpu.memory_space<smem>>
      %250 = vector.extract_strided_slice %38 {offsets = [0, 0], sizes = [1, 256], strides = [1, 1]} : vector<4x256xf32> to vector<1x256xf32>
      %251 = vector.broadcast %249 : f32 to vector<1x256xf32>
      %252 = arith.mulf %251, %250 : vector<1x256xf32>
      %253 = arith.addf %248, %252 : vector<1x256xf32>
      %c5_55 = arith.constant 5 : index
      %254 = memref.load %arg3[%c5_55] : memref<144xf32, #tpu.memory_space<smem>>
      %255 = vector.extract_strided_slice %38 {offsets = [1, 0], sizes = [1, 256], strides = [1, 1]} : vector<4x256xf32> to vector<1x256xf32>
      %256 = vector.broadcast %254 : f32 to vector<1x256xf32>
      %257 = arith.mulf %256, %255 : vector<1x256xf32>
      %258 = arith.addf %253, %257 : vector<1x256xf32>
      %c6_56 = arith.constant 6 : index
      %259 = memref.load %arg3[%c6_56] : memref<144xf32, #tpu.memory_space<smem>>
      %260 = vector.extract_strided_slice %38 {offsets = [2, 0], sizes = [1, 256], strides = [1, 1]} : vector<4x256xf32> to vector<1x256xf32>
      %261 = vector.broadcast %259 : f32 to vector<1x256xf32>
      %262 = arith.mulf %261, %260 : vector<1x256xf32>
      %263 = arith.addf %258, %262 : vector<1x256xf32>
      %c7_57 = arith.constant 7 : index
      %264 = memref.load %arg3[%c7_57] : memref<144xf32, #tpu.memory_space<smem>>
      %265 = vector.extract_strided_slice %38 {offsets = [3, 0], sizes = [1, 256], strides = [1, 1]} : vector<4x256xf32> to vector<1x256xf32>
      %266 = vector.broadcast %264 : f32 to vector<1x256xf32>
      %267 = arith.mulf %266, %265 : vector<1x256xf32>
      %268 = arith.addf %263, %267 : vector<1x256xf32>
      %c20 = arith.constant 20 : index
      %269 = memref.load %arg3[%c20] : memref<144xf32, #tpu.memory_space<smem>>
      %270 = vector.extract_strided_slice %42 {offsets = [0, 0], sizes = [1, 256], strides = [1, 1]} : vector<4x256xf32> to vector<1x256xf32>
      %271 = vector.broadcast %269 : f32 to vector<1x256xf32>
      %272 = arith.mulf %271, %270 : vector<1x256xf32>
      %273 = arith.addf %268, %272 : vector<1x256xf32>
      %c21 = arith.constant 21 : index
      %274 = memref.load %arg3[%c21] : memref<144xf32, #tpu.memory_space<smem>>
      %275 = vector.extract_strided_slice %42 {offsets = [1, 0], sizes = [1, 256], strides = [1, 1]} : vector<4x256xf32> to vector<1x256xf32>
      %276 = vector.broadcast %274 : f32 to vector<1x256xf32>
      %277 = arith.mulf %276, %275 : vector<1x256xf32>
      %278 = arith.addf %273, %277 : vector<1x256xf32>
      %c22 = arith.constant 22 : index
      %279 = memref.load %arg3[%c22] : memref<144xf32, #tpu.memory_space<smem>>
      %280 = vector.extract_strided_slice %42 {offsets = [2, 0], sizes = [1, 256], strides = [1, 1]} : vector<4x256xf32> to vector<1x256xf32>
      %281 = vector.broadcast %279 : f32 to vector<1x256xf32>
      %282 = arith.mulf %281, %280 : vector<1x256xf32>
      %283 = arith.addf %278, %282 : vector<1x256xf32>
      %c23 = arith.constant 23 : index
      %284 = memref.load %arg3[%c23] : memref<144xf32, #tpu.memory_space<smem>>
      %285 = vector.extract_strided_slice %42 {offsets = [3, 0], sizes = [1, 256], strides = [1, 1]} : vector<4x256xf32> to vector<1x256xf32>
      %286 = vector.broadcast %284 : f32 to vector<1x256xf32>
      %287 = arith.mulf %286, %285 : vector<1x256xf32>
      %288 = arith.addf %283, %287 : vector<1x256xf32>
      %c36 = arith.constant 36 : index
      %289 = memref.load %arg3[%c36] : memref<144xf32, #tpu.memory_space<smem>>
      %290 = vector.extract_strided_slice %46 {offsets = [0, 0], sizes = [1, 256], strides = [1, 1]} : vector<4x256xf32> to vector<1x256xf32>
      %291 = vector.broadcast %289 : f32 to vector<1x256xf32>
      %292 = arith.mulf %291, %290 : vector<1x256xf32>
      %293 = arith.addf %288, %292 : vector<1x256xf32>
      %c37 = arith.constant 37 : index
      %294 = memref.load %arg3[%c37] : memref<144xf32, #tpu.memory_space<smem>>
      %295 = vector.extract_strided_slice %46 {offsets = [1, 0], sizes = [1, 256], strides = [1, 1]} : vector<4x256xf32> to vector<1x256xf32>
      %296 = vector.broadcast %294 : f32 to vector<1x256xf32>
      %297 = arith.mulf %296, %295 : vector<1x256xf32>
      %298 = arith.addf %293, %297 : vector<1x256xf32>
      %c38 = arith.constant 38 : index
      %299 = memref.load %arg3[%c38] : memref<144xf32, #tpu.memory_space<smem>>
      %300 = vector.extract_strided_slice %46 {offsets = [2, 0], sizes = [1, 256], strides = [1, 1]} : vector<4x256xf32> to vector<1x256xf32>
      %301 = vector.broadcast %299 : f32 to vector<1x256xf32>
      %302 = arith.mulf %301, %300 : vector<1x256xf32>
      %303 = arith.addf %298, %302 : vector<1x256xf32>
      %c39 = arith.constant 39 : index
      %304 = memref.load %arg3[%c39] : memref<144xf32, #tpu.memory_space<smem>>
      %305 = vector.extract_strided_slice %46 {offsets = [3, 0], sizes = [1, 256], strides = [1, 1]} : vector<4x256xf32> to vector<1x256xf32>
      %306 = vector.broadcast %304 : f32 to vector<1x256xf32>
      %307 = arith.mulf %306, %305 : vector<1x256xf32>
      %308 = arith.addf %303, %307 : vector<1x256xf32>
      %c52 = arith.constant 52 : index
      %309 = memref.load %arg3[%c52] : memref<144xf32, #tpu.memory_space<smem>>
      %310 = vector.extract_strided_slice %50 {offsets = [0, 0], sizes = [1, 256], strides = [1, 1]} : vector<4x256xf32> to vector<1x256xf32>
      %311 = vector.broadcast %309 : f32 to vector<1x256xf32>
      %312 = arith.mulf %311, %310 : vector<1x256xf32>
      %313 = arith.addf %308, %312 : vector<1x256xf32>
      %c53 = arith.constant 53 : index
      %314 = memref.load %arg3[%c53] : memref<144xf32, #tpu.memory_space<smem>>
      %315 = vector.extract_strided_slice %50 {offsets = [1, 0], sizes = [1, 256], strides = [1, 1]} : vector<4x256xf32> to vector<1x256xf32>
      %316 = vector.broadcast %314 : f32 to vector<1x256xf32>
      %317 = arith.mulf %316, %315 : vector<1x256xf32>
      %318 = arith.addf %313, %317 : vector<1x256xf32>
      %c54 = arith.constant 54 : index
      %319 = memref.load %arg3[%c54] : memref<144xf32, #tpu.memory_space<smem>>
      %320 = vector.extract_strided_slice %50 {offsets = [2, 0], sizes = [1, 256], strides = [1, 1]} : vector<4x256xf32> to vector<1x256xf32>
      %321 = vector.broadcast %319 : f32 to vector<1x256xf32>
      %322 = arith.mulf %321, %320 : vector<1x256xf32>
      %323 = arith.addf %318, %322 : vector<1x256xf32>
      %c55 = arith.constant 55 : index
      %324 = memref.load %arg3[%c55] : memref<144xf32, #tpu.memory_space<smem>>
      %325 = vector.extract_strided_slice %50 {offsets = [3, 0], sizes = [1, 256], strides = [1, 1]} : vector<4x256xf32> to vector<1x256xf32>
      %326 = vector.broadcast %324 : f32 to vector<1x256xf32>
      %327 = arith.mulf %326, %325 : vector<1x256xf32>
      %328 = arith.addf %323, %327 : vector<1x256xf32>
      %c68 = arith.constant 68 : index
      %329 = memref.load %arg3[%c68] : memref<144xf32, #tpu.memory_space<smem>>
      %330 = vector.extract_strided_slice %34 {offsets = [0, 0], sizes = [1, 256], strides = [1, 1]} : vector<4x256xf32> to vector<1x256xf32>
      %331 = vector.broadcast %329 : f32 to vector<1x256xf32>
      %332 = arith.mulf %331, %330 : vector<1x256xf32>
      %333 = arith.addf %328, %332 : vector<1x256xf32>
      %c69 = arith.constant 69 : index
      %334 = memref.load %arg3[%c69] : memref<144xf32, #tpu.memory_space<smem>>
      %335 = vector.extract_strided_slice %34 {offsets = [1, 0], sizes = [1, 256], strides = [1, 1]} : vector<4x256xf32> to vector<1x256xf32>
      %336 = vector.broadcast %334 : f32 to vector<1x256xf32>
      %337 = arith.mulf %336, %335 : vector<1x256xf32>
      %338 = arith.addf %333, %337 : vector<1x256xf32>
      %c70 = arith.constant 70 : index
      %339 = memref.load %arg3[%c70] : memref<144xf32, #tpu.memory_space<smem>>
      %340 = vector.extract_strided_slice %34 {offsets = [2, 0], sizes = [1, 256], strides = [1, 1]} : vector<4x256xf32> to vector<1x256xf32>
      %341 = vector.broadcast %339 : f32 to vector<1x256xf32>
      %342 = arith.mulf %341, %340 : vector<1x256xf32>
      %343 = arith.addf %338, %342 : vector<1x256xf32>
      %c71 = arith.constant 71 : index
      %344 = memref.load %arg3[%c71] : memref<144xf32, #tpu.memory_space<smem>>
      %345 = vector.extract_strided_slice %34 {offsets = [3, 0], sizes = [1, 256], strides = [1, 1]} : vector<4x256xf32> to vector<1x256xf32>
      %346 = vector.broadcast %344 : f32 to vector<1x256xf32>
      %347 = arith.mulf %346, %345 : vector<1x256xf32>
      %348 = arith.addf %343, %347 : vector<1x256xf32>
      %c84 = arith.constant 84 : index
      %349 = memref.load %arg3[%c84] : memref<144xf32, #tpu.memory_space<smem>>
      %350 = vector.extract_strided_slice %54 {offsets = [0, 0], sizes = [1, 256], strides = [1, 1]} : vector<4x256xf32> to vector<1x256xf32>
      %351 = vector.broadcast %349 : f32 to vector<1x256xf32>
      %352 = arith.mulf %351, %350 : vector<1x256xf32>
      %353 = arith.addf %348, %352 : vector<1x256xf32>
      %c85 = arith.constant 85 : index
      %354 = memref.load %arg3[%c85] : memref<144xf32, #tpu.memory_space<smem>>
      %355 = vector.extract_strided_slice %54 {offsets = [1, 0], sizes = [1, 256], strides = [1, 1]} : vector<4x256xf32> to vector<1x256xf32>
      %356 = vector.broadcast %354 : f32 to vector<1x256xf32>
      %357 = arith.mulf %356, %355 : vector<1x256xf32>
      %358 = arith.addf %353, %357 : vector<1x256xf32>
      %c86 = arith.constant 86 : index
      %359 = memref.load %arg3[%c86] : memref<144xf32, #tpu.memory_space<smem>>
      %360 = vector.extract_strided_slice %54 {offsets = [2, 0], sizes = [1, 256], strides = [1, 1]} : vector<4x256xf32> to vector<1x256xf32>
      %361 = vector.broadcast %359 : f32 to vector<1x256xf32>
      %362 = arith.mulf %361, %360 : vector<1x256xf32>
      %363 = arith.addf %358, %362 : vector<1x256xf32>
      %c87 = arith.constant 87 : index
      %364 = memref.load %arg3[%c87] : memref<144xf32, #tpu.memory_space<smem>>
      %365 = vector.extract_strided_slice %54 {offsets = [3, 0], sizes = [1, 256], strides = [1, 1]} : vector<4x256xf32> to vector<1x256xf32>
      %366 = vector.broadcast %364 : f32 to vector<1x256xf32>
      %367 = arith.mulf %366, %365 : vector<1x256xf32>
      %368 = arith.addf %363, %367 : vector<1x256xf32>
      %c100 = arith.constant 100 : index
      %369 = memref.load %arg3[%c100] : memref<144xf32, #tpu.memory_space<smem>>
      %370 = vector.extract_strided_slice %58 {offsets = [0, 0], sizes = [1, 256], strides = [1, 1]} : vector<4x256xf32> to vector<1x256xf32>
      %371 = vector.broadcast %369 : f32 to vector<1x256xf32>
      %372 = arith.mulf %371, %370 : vector<1x256xf32>
      %373 = arith.addf %368, %372 : vector<1x256xf32>
      %c101 = arith.constant 101 : index
      %374 = memref.load %arg3[%c101] : memref<144xf32, #tpu.memory_space<smem>>
      %375 = vector.extract_strided_slice %58 {offsets = [1, 0], sizes = [1, 256], strides = [1, 1]} : vector<4x256xf32> to vector<1x256xf32>
      %376 = vector.broadcast %374 : f32 to vector<1x256xf32>
      %377 = arith.mulf %376, %375 : vector<1x256xf32>
      %378 = arith.addf %373, %377 : vector<1x256xf32>
      %c102 = arith.constant 102 : index
      %379 = memref.load %arg3[%c102] : memref<144xf32, #tpu.memory_space<smem>>
      %380 = vector.extract_strided_slice %58 {offsets = [2, 0], sizes = [1, 256], strides = [1, 1]} : vector<4x256xf32> to vector<1x256xf32>
      %381 = vector.broadcast %379 : f32 to vector<1x256xf32>
      %382 = arith.mulf %381, %380 : vector<1x256xf32>
      %383 = arith.addf %378, %382 : vector<1x256xf32>
      %c103 = arith.constant 103 : index
      %384 = memref.load %arg3[%c103] : memref<144xf32, #tpu.memory_space<smem>>
      %385 = vector.extract_strided_slice %58 {offsets = [3, 0], sizes = [1, 256], strides = [1, 1]} : vector<4x256xf32> to vector<1x256xf32>
      %386 = vector.broadcast %384 : f32 to vector<1x256xf32>
      %387 = arith.mulf %386, %385 : vector<1x256xf32>
      %388 = arith.addf %383, %387 : vector<1x256xf32>
      %c116 = arith.constant 116 : index
      %389 = memref.load %arg3[%c116] : memref<144xf32, #tpu.memory_space<smem>>
      %390 = vector.extract_strided_slice %62 {offsets = [0, 0], sizes = [1, 256], strides = [1, 1]} : vector<4x256xf32> to vector<1x256xf32>
      %391 = vector.broadcast %389 : f32 to vector<1x256xf32>
      %392 = arith.mulf %391, %390 : vector<1x256xf32>
      %393 = arith.addf %388, %392 : vector<1x256xf32>
      %c117 = arith.constant 117 : index
      %394 = memref.load %arg3[%c117] : memref<144xf32, #tpu.memory_space<smem>>
      %395 = vector.extract_strided_slice %62 {offsets = [1, 0], sizes = [1, 256], strides = [1, 1]} : vector<4x256xf32> to vector<1x256xf32>
      %396 = vector.broadcast %394 : f32 to vector<1x256xf32>
      %397 = arith.mulf %396, %395 : vector<1x256xf32>
      %398 = arith.addf %393, %397 : vector<1x256xf32>
      %c118 = arith.constant 118 : index
      %399 = memref.load %arg3[%c118] : memref<144xf32, #tpu.memory_space<smem>>
      %400 = vector.extract_strided_slice %62 {offsets = [2, 0], sizes = [1, 256], strides = [1, 1]} : vector<4x256xf32> to vector<1x256xf32>
      %401 = vector.broadcast %399 : f32 to vector<1x256xf32>
      %402 = arith.mulf %401, %400 : vector<1x256xf32>
      %403 = arith.addf %398, %402 : vector<1x256xf32>
      %c119 = arith.constant 119 : index
      %404 = memref.load %arg3[%c119] : memref<144xf32, #tpu.memory_space<smem>>
      %405 = vector.extract_strided_slice %62 {offsets = [3, 0], sizes = [1, 256], strides = [1, 1]} : vector<4x256xf32> to vector<1x256xf32>
      %406 = vector.broadcast %404 : f32 to vector<1x256xf32>
      %407 = arith.mulf %406, %405 : vector<1x256xf32>
      %408 = arith.addf %403, %407 : vector<1x256xf32>
      %c132 = arith.constant 132 : index
      %409 = memref.load %arg3[%c132] : memref<144xf32, #tpu.memory_space<smem>>
      %410 = vector.extract_strided_slice %66 {offsets = [0, 0], sizes = [1, 256], strides = [1, 1]} : vector<4x256xf32> to vector<1x256xf32>
      %411 = vector.broadcast %409 : f32 to vector<1x256xf32>
      %412 = arith.mulf %411, %410 : vector<1x256xf32>
      %413 = arith.addf %408, %412 : vector<1x256xf32>
      %c133 = arith.constant 133 : index
      %414 = memref.load %arg3[%c133] : memref<144xf32, #tpu.memory_space<smem>>
      %415 = vector.extract_strided_slice %66 {offsets = [1, 0], sizes = [1, 256], strides = [1, 1]} : vector<4x256xf32> to vector<1x256xf32>
      %416 = vector.broadcast %414 : f32 to vector<1x256xf32>
      %417 = arith.mulf %416, %415 : vector<1x256xf32>
      %418 = arith.addf %413, %417 : vector<1x256xf32>
      %c134 = arith.constant 134 : index
      %419 = memref.load %arg3[%c134] : memref<144xf32, #tpu.memory_space<smem>>
      %420 = vector.extract_strided_slice %66 {offsets = [2, 0], sizes = [1, 256], strides = [1, 1]} : vector<4x256xf32> to vector<1x256xf32>
      %421 = vector.broadcast %419 : f32 to vector<1x256xf32>
      %422 = arith.mulf %421, %420 : vector<1x256xf32>
      %423 = arith.addf %418, %422 : vector<1x256xf32>
      %c135 = arith.constant 135 : index
      %424 = memref.load %arg3[%c135] : memref<144xf32, #tpu.memory_space<smem>>
      %425 = vector.extract_strided_slice %66 {offsets = [3, 0], sizes = [1, 256], strides = [1, 1]} : vector<4x256xf32> to vector<1x256xf32>
      %426 = vector.broadcast %424 : f32 to vector<1x256xf32>
      %427 = arith.mulf %426, %425 : vector<1x256xf32>
      %428 = arith.addf %423, %427 : vector<1x256xf32>
      %cst_58 = arith.constant 0.000000e+00 : f32
      %429 = vector.broadcast %cst_58 : f32 to vector<1x256xf32>
      %c8_59 = arith.constant 8 : index
      %430 = memref.load %arg3[%c8_59] : memref<144xf32, #tpu.memory_space<smem>>
      %431 = vector.extract_strided_slice %38 {offsets = [0, 0], sizes = [1, 256], strides = [1, 1]} : vector<4x256xf32> to vector<1x256xf32>
      %432 = vector.broadcast %430 : f32 to vector<1x256xf32>
      %433 = arith.mulf %432, %431 : vector<1x256xf32>
      %434 = arith.addf %429, %433 : vector<1x256xf32>
      %c9 = arith.constant 9 : index
      %435 = memref.load %arg3[%c9] : memref<144xf32, #tpu.memory_space<smem>>
      %436 = vector.extract_strided_slice %38 {offsets = [1, 0], sizes = [1, 256], strides = [1, 1]} : vector<4x256xf32> to vector<1x256xf32>
      %437 = vector.broadcast %435 : f32 to vector<1x256xf32>
      %438 = arith.mulf %437, %436 : vector<1x256xf32>
      %439 = arith.addf %434, %438 : vector<1x256xf32>
      %c10 = arith.constant 10 : index
      %440 = memref.load %arg3[%c10] : memref<144xf32, #tpu.memory_space<smem>>
      %441 = vector.extract_strided_slice %38 {offsets = [2, 0], sizes = [1, 256], strides = [1, 1]} : vector<4x256xf32> to vector<1x256xf32>
      %442 = vector.broadcast %440 : f32 to vector<1x256xf32>
      %443 = arith.mulf %442, %441 : vector<1x256xf32>
      %444 = arith.addf %439, %443 : vector<1x256xf32>
      %c11 = arith.constant 11 : index
      %445 = memref.load %arg3[%c11] : memref<144xf32, #tpu.memory_space<smem>>
      %446 = vector.extract_strided_slice %38 {offsets = [3, 0], sizes = [1, 256], strides = [1, 1]} : vector<4x256xf32> to vector<1x256xf32>
      %447 = vector.broadcast %445 : f32 to vector<1x256xf32>
      %448 = arith.mulf %447, %446 : vector<1x256xf32>
      %449 = arith.addf %444, %448 : vector<1x256xf32>
      %c24 = arith.constant 24 : index
      %450 = memref.load %arg3[%c24] : memref<144xf32, #tpu.memory_space<smem>>
      %451 = vector.extract_strided_slice %42 {offsets = [0, 0], sizes = [1, 256], strides = [1, 1]} : vector<4x256xf32> to vector<1x256xf32>
      %452 = vector.broadcast %450 : f32 to vector<1x256xf32>
      %453 = arith.mulf %452, %451 : vector<1x256xf32>
      %454 = arith.addf %449, %453 : vector<1x256xf32>
      %c25 = arith.constant 25 : index
      %455 = memref.load %arg3[%c25] : memref<144xf32, #tpu.memory_space<smem>>
      %456 = vector.extract_strided_slice %42 {offsets = [1, 0], sizes = [1, 256], strides = [1, 1]} : vector<4x256xf32> to vector<1x256xf32>
      %457 = vector.broadcast %455 : f32 to vector<1x256xf32>
      %458 = arith.mulf %457, %456 : vector<1x256xf32>
      %459 = arith.addf %454, %458 : vector<1x256xf32>
      %c26 = arith.constant 26 : index
      %460 = memref.load %arg3[%c26] : memref<144xf32, #tpu.memory_space<smem>>
      %461 = vector.extract_strided_slice %42 {offsets = [2, 0], sizes = [1, 256], strides = [1, 1]} : vector<4x256xf32> to vector<1x256xf32>
      %462 = vector.broadcast %460 : f32 to vector<1x256xf32>
      %463 = arith.mulf %462, %461 : vector<1x256xf32>
      %464 = arith.addf %459, %463 : vector<1x256xf32>
      %c27 = arith.constant 27 : index
      %465 = memref.load %arg3[%c27] : memref<144xf32, #tpu.memory_space<smem>>
      %466 = vector.extract_strided_slice %42 {offsets = [3, 0], sizes = [1, 256], strides = [1, 1]} : vector<4x256xf32> to vector<1x256xf32>
      %467 = vector.broadcast %465 : f32 to vector<1x256xf32>
      %468 = arith.mulf %467, %466 : vector<1x256xf32>
      %469 = arith.addf %464, %468 : vector<1x256xf32>
      %c40 = arith.constant 40 : index
      %470 = memref.load %arg3[%c40] : memref<144xf32, #tpu.memory_space<smem>>
      %471 = vector.extract_strided_slice %46 {offsets = [0, 0], sizes = [1, 256], strides = [1, 1]} : vector<4x256xf32> to vector<1x256xf32>
      %472 = vector.broadcast %470 : f32 to vector<1x256xf32>
      %473 = arith.mulf %472, %471 : vector<1x256xf32>
      %474 = arith.addf %469, %473 : vector<1x256xf32>
      %c41 = arith.constant 41 : index
      %475 = memref.load %arg3[%c41] : memref<144xf32, #tpu.memory_space<smem>>
      %476 = vector.extract_strided_slice %46 {offsets = [1, 0], sizes = [1, 256], strides = [1, 1]} : vector<4x256xf32> to vector<1x256xf32>
      %477 = vector.broadcast %475 : f32 to vector<1x256xf32>
      %478 = arith.mulf %477, %476 : vector<1x256xf32>
      %479 = arith.addf %474, %478 : vector<1x256xf32>
      %c42 = arith.constant 42 : index
      %480 = memref.load %arg3[%c42] : memref<144xf32, #tpu.memory_space<smem>>
      %481 = vector.extract_strided_slice %46 {offsets = [2, 0], sizes = [1, 256], strides = [1, 1]} : vector<4x256xf32> to vector<1x256xf32>
      %482 = vector.broadcast %480 : f32 to vector<1x256xf32>
      %483 = arith.mulf %482, %481 : vector<1x256xf32>
      %484 = arith.addf %479, %483 : vector<1x256xf32>
      %c43 = arith.constant 43 : index
      %485 = memref.load %arg3[%c43] : memref<144xf32, #tpu.memory_space<smem>>
      %486 = vector.extract_strided_slice %46 {offsets = [3, 0], sizes = [1, 256], strides = [1, 1]} : vector<4x256xf32> to vector<1x256xf32>
      %487 = vector.broadcast %485 : f32 to vector<1x256xf32>
      %488 = arith.mulf %487, %486 : vector<1x256xf32>
      %489 = arith.addf %484, %488 : vector<1x256xf32>
      %c56 = arith.constant 56 : index
      %490 = memref.load %arg3[%c56] : memref<144xf32, #tpu.memory_space<smem>>
      %491 = vector.extract_strided_slice %50 {offsets = [0, 0], sizes = [1, 256], strides = [1, 1]} : vector<4x256xf32> to vector<1x256xf32>
      %492 = vector.broadcast %490 : f32 to vector<1x256xf32>
      %493 = arith.mulf %492, %491 : vector<1x256xf32>
      %494 = arith.addf %489, %493 : vector<1x256xf32>
      %c57 = arith.constant 57 : index
      %495 = memref.load %arg3[%c57] : memref<144xf32, #tpu.memory_space<smem>>
      %496 = vector.extract_strided_slice %50 {offsets = [1, 0], sizes = [1, 256], strides = [1, 1]} : vector<4x256xf32> to vector<1x256xf32>
      %497 = vector.broadcast %495 : f32 to vector<1x256xf32>
      %498 = arith.mulf %497, %496 : vector<1x256xf32>
      %499 = arith.addf %494, %498 : vector<1x256xf32>
      %c58 = arith.constant 58 : index
      %500 = memref.load %arg3[%c58] : memref<144xf32, #tpu.memory_space<smem>>
      %501 = vector.extract_strided_slice %50 {offsets = [2, 0], sizes = [1, 256], strides = [1, 1]} : vector<4x256xf32> to vector<1x256xf32>
      %502 = vector.broadcast %500 : f32 to vector<1x256xf32>
      %503 = arith.mulf %502, %501 : vector<1x256xf32>
      %504 = arith.addf %499, %503 : vector<1x256xf32>
      %c59 = arith.constant 59 : index
      %505 = memref.load %arg3[%c59] : memref<144xf32, #tpu.memory_space<smem>>
      %506 = vector.extract_strided_slice %50 {offsets = [3, 0], sizes = [1, 256], strides = [1, 1]} : vector<4x256xf32> to vector<1x256xf32>
      %507 = vector.broadcast %505 : f32 to vector<1x256xf32>
      %508 = arith.mulf %507, %506 : vector<1x256xf32>
      %509 = arith.addf %504, %508 : vector<1x256xf32>
      %c72 = arith.constant 72 : index
      %510 = memref.load %arg3[%c72] : memref<144xf32, #tpu.memory_space<smem>>
      %511 = vector.extract_strided_slice %34 {offsets = [0, 0], sizes = [1, 256], strides = [1, 1]} : vector<4x256xf32> to vector<1x256xf32>
      %512 = vector.broadcast %510 : f32 to vector<1x256xf32>
      %513 = arith.mulf %512, %511 : vector<1x256xf32>
      %514 = arith.addf %509, %513 : vector<1x256xf32>
      %c73 = arith.constant 73 : index
      %515 = memref.load %arg3[%c73] : memref<144xf32, #tpu.memory_space<smem>>
      %516 = vector.extract_strided_slice %34 {offsets = [1, 0], sizes = [1, 256], strides = [1, 1]} : vector<4x256xf32> to vector<1x256xf32>
      %517 = vector.broadcast %515 : f32 to vector<1x256xf32>
      %518 = arith.mulf %517, %516 : vector<1x256xf32>
      %519 = arith.addf %514, %518 : vector<1x256xf32>
      %c74 = arith.constant 74 : index
      %520 = memref.load %arg3[%c74] : memref<144xf32, #tpu.memory_space<smem>>
      %521 = vector.extract_strided_slice %34 {offsets = [2, 0], sizes = [1, 256], strides = [1, 1]} : vector<4x256xf32> to vector<1x256xf32>
      %522 = vector.broadcast %520 : f32 to vector<1x256xf32>
      %523 = arith.mulf %522, %521 : vector<1x256xf32>
      %524 = arith.addf %519, %523 : vector<1x256xf32>
      %c75 = arith.constant 75 : index
      %525 = memref.load %arg3[%c75] : memref<144xf32, #tpu.memory_space<smem>>
      %526 = vector.extract_strided_slice %34 {offsets = [3, 0], sizes = [1, 256], strides = [1, 1]} : vector<4x256xf32> to vector<1x256xf32>
      %527 = vector.broadcast %525 : f32 to vector<1x256xf32>
      %528 = arith.mulf %527, %526 : vector<1x256xf32>
      %529 = arith.addf %524, %528 : vector<1x256xf32>
      %c88 = arith.constant 88 : index
      %530 = memref.load %arg3[%c88] : memref<144xf32, #tpu.memory_space<smem>>
      %531 = vector.extract_strided_slice %54 {offsets = [0, 0], sizes = [1, 256], strides = [1, 1]} : vector<4x256xf32> to vector<1x256xf32>
      %532 = vector.broadcast %530 : f32 to vector<1x256xf32>
      %533 = arith.mulf %532, %531 : vector<1x256xf32>
      %534 = arith.addf %529, %533 : vector<1x256xf32>
      %c89 = arith.constant 89 : index
      %535 = memref.load %arg3[%c89] : memref<144xf32, #tpu.memory_space<smem>>
      %536 = vector.extract_strided_slice %54 {offsets = [1, 0], sizes = [1, 256], strides = [1, 1]} : vector<4x256xf32> to vector<1x256xf32>
      %537 = vector.broadcast %535 : f32 to vector<1x256xf32>
      %538 = arith.mulf %537, %536 : vector<1x256xf32>
      %539 = arith.addf %534, %538 : vector<1x256xf32>
      %c90 = arith.constant 90 : index
      %540 = memref.load %arg3[%c90] : memref<144xf32, #tpu.memory_space<smem>>
      %541 = vector.extract_strided_slice %54 {offsets = [2, 0], sizes = [1, 256], strides = [1, 1]} : vector<4x256xf32> to vector<1x256xf32>
      %542 = vector.broadcast %540 : f32 to vector<1x256xf32>
      %543 = arith.mulf %542, %541 : vector<1x256xf32>
      %544 = arith.addf %539, %543 : vector<1x256xf32>
      %c91 = arith.constant 91 : index
      %545 = memref.load %arg3[%c91] : memref<144xf32, #tpu.memory_space<smem>>
      %546 = vector.extract_strided_slice %54 {offsets = [3, 0], sizes = [1, 256], strides = [1, 1]} : vector<4x256xf32> to vector<1x256xf32>
      %547 = vector.broadcast %545 : f32 to vector<1x256xf32>
      %548 = arith.mulf %547, %546 : vector<1x256xf32>
      %549 = arith.addf %544, %548 : vector<1x256xf32>
      %c104 = arith.constant 104 : index
      %550 = memref.load %arg3[%c104] : memref<144xf32, #tpu.memory_space<smem>>
      %551 = vector.extract_strided_slice %58 {offsets = [0, 0], sizes = [1, 256], strides = [1, 1]} : vector<4x256xf32> to vector<1x256xf32>
      %552 = vector.broadcast %550 : f32 to vector<1x256xf32>
      %553 = arith.mulf %552, %551 : vector<1x256xf32>
      %554 = arith.addf %549, %553 : vector<1x256xf32>
      %c105 = arith.constant 105 : index
      %555 = memref.load %arg3[%c105] : memref<144xf32, #tpu.memory_space<smem>>
      %556 = vector.extract_strided_slice %58 {offsets = [1, 0], sizes = [1, 256], strides = [1, 1]} : vector<4x256xf32> to vector<1x256xf32>
      %557 = vector.broadcast %555 : f32 to vector<1x256xf32>
      %558 = arith.mulf %557, %556 : vector<1x256xf32>
      %559 = arith.addf %554, %558 : vector<1x256xf32>
      %c106 = arith.constant 106 : index
      %560 = memref.load %arg3[%c106] : memref<144xf32, #tpu.memory_space<smem>>
      %561 = vector.extract_strided_slice %58 {offsets = [2, 0], sizes = [1, 256], strides = [1, 1]} : vector<4x256xf32> to vector<1x256xf32>
      %562 = vector.broadcast %560 : f32 to vector<1x256xf32>
      %563 = arith.mulf %562, %561 : vector<1x256xf32>
      %564 = arith.addf %559, %563 : vector<1x256xf32>
      %c107 = arith.constant 107 : index
      %565 = memref.load %arg3[%c107] : memref<144xf32, #tpu.memory_space<smem>>
      %566 = vector.extract_strided_slice %58 {offsets = [3, 0], sizes = [1, 256], strides = [1, 1]} : vector<4x256xf32> to vector<1x256xf32>
      %567 = vector.broadcast %565 : f32 to vector<1x256xf32>
      %568 = arith.mulf %567, %566 : vector<1x256xf32>
      %569 = arith.addf %564, %568 : vector<1x256xf32>
      %c120 = arith.constant 120 : index
      %570 = memref.load %arg3[%c120] : memref<144xf32, #tpu.memory_space<smem>>
      %571 = vector.extract_strided_slice %62 {offsets = [0, 0], sizes = [1, 256], strides = [1, 1]} : vector<4x256xf32> to vector<1x256xf32>
      %572 = vector.broadcast %570 : f32 to vector<1x256xf32>
      %573 = arith.mulf %572, %571 : vector<1x256xf32>
      %574 = arith.addf %569, %573 : vector<1x256xf32>
      %c121 = arith.constant 121 : index
      %575 = memref.load %arg3[%c121] : memref<144xf32, #tpu.memory_space<smem>>
      %576 = vector.extract_strided_slice %62 {offsets = [1, 0], sizes = [1, 256], strides = [1, 1]} : vector<4x256xf32> to vector<1x256xf32>
      %577 = vector.broadcast %575 : f32 to vector<1x256xf32>
      %578 = arith.mulf %577, %576 : vector<1x256xf32>
      %579 = arith.addf %574, %578 : vector<1x256xf32>
      %c122 = arith.constant 122 : index
      %580 = memref.load %arg3[%c122] : memref<144xf32, #tpu.memory_space<smem>>
      %581 = vector.extract_strided_slice %62 {offsets = [2, 0], sizes = [1, 256], strides = [1, 1]} : vector<4x256xf32> to vector<1x256xf32>
      %582 = vector.broadcast %580 : f32 to vector<1x256xf32>
      %583 = arith.mulf %582, %581 : vector<1x256xf32>
      %584 = arith.addf %579, %583 : vector<1x256xf32>
      %c123 = arith.constant 123 : index
      %585 = memref.load %arg3[%c123] : memref<144xf32, #tpu.memory_space<smem>>
      %586 = vector.extract_strided_slice %62 {offsets = [3, 0], sizes = [1, 256], strides = [1, 1]} : vector<4x256xf32> to vector<1x256xf32>
      %587 = vector.broadcast %585 : f32 to vector<1x256xf32>
      %588 = arith.mulf %587, %586 : vector<1x256xf32>
      %589 = arith.addf %584, %588 : vector<1x256xf32>
      %c136 = arith.constant 136 : index
      %590 = memref.load %arg3[%c136] : memref<144xf32, #tpu.memory_space<smem>>
      %591 = vector.extract_strided_slice %66 {offsets = [0, 0], sizes = [1, 256], strides = [1, 1]} : vector<4x256xf32> to vector<1x256xf32>
      %592 = vector.broadcast %590 : f32 to vector<1x256xf32>
      %593 = arith.mulf %592, %591 : vector<1x256xf32>
      %594 = arith.addf %589, %593 : vector<1x256xf32>
      %c137 = arith.constant 137 : index
      %595 = memref.load %arg3[%c137] : memref<144xf32, #tpu.memory_space<smem>>
      %596 = vector.extract_strided_slice %66 {offsets = [1, 0], sizes = [1, 256], strides = [1, 1]} : vector<4x256xf32> to vector<1x256xf32>
      %597 = vector.broadcast %595 : f32 to vector<1x256xf32>
      %598 = arith.mulf %597, %596 : vector<1x256xf32>
      %599 = arith.addf %594, %598 : vector<1x256xf32>
      %c138 = arith.constant 138 : index
      %600 = memref.load %arg3[%c138] : memref<144xf32, #tpu.memory_space<smem>>
      %601 = vector.extract_strided_slice %66 {offsets = [2, 0], sizes = [1, 256], strides = [1, 1]} : vector<4x256xf32> to vector<1x256xf32>
      %602 = vector.broadcast %600 : f32 to vector<1x256xf32>
      %603 = arith.mulf %602, %601 : vector<1x256xf32>
      %604 = arith.addf %599, %603 : vector<1x256xf32>
      %c139 = arith.constant 139 : index
      %605 = memref.load %arg3[%c139] : memref<144xf32, #tpu.memory_space<smem>>
      %606 = vector.extract_strided_slice %66 {offsets = [3, 0], sizes = [1, 256], strides = [1, 1]} : vector<4x256xf32> to vector<1x256xf32>
      %607 = vector.broadcast %605 : f32 to vector<1x256xf32>
      %608 = arith.mulf %607, %606 : vector<1x256xf32>
      %609 = arith.addf %604, %608 : vector<1x256xf32>
      %cst_60 = arith.constant 0.000000e+00 : f32
      %610 = vector.broadcast %cst_60 : f32 to vector<1x256xf32>
      %c12 = arith.constant 12 : index
      %611 = memref.load %arg3[%c12] : memref<144xf32, #tpu.memory_space<smem>>
      %612 = vector.extract_strided_slice %38 {offsets = [0, 0], sizes = [1, 256], strides = [1, 1]} : vector<4x256xf32> to vector<1x256xf32>
      %613 = vector.broadcast %611 : f32 to vector<1x256xf32>
      %614 = arith.mulf %613, %612 : vector<1x256xf32>
      %615 = arith.addf %610, %614 : vector<1x256xf32>
      %c13 = arith.constant 13 : index
      %616 = memref.load %arg3[%c13] : memref<144xf32, #tpu.memory_space<smem>>
      %617 = vector.extract_strided_slice %38 {offsets = [1, 0], sizes = [1, 256], strides = [1, 1]} : vector<4x256xf32> to vector<1x256xf32>
      %618 = vector.broadcast %616 : f32 to vector<1x256xf32>
      %619 = arith.mulf %618, %617 : vector<1x256xf32>
      %620 = arith.addf %615, %619 : vector<1x256xf32>
      %c14 = arith.constant 14 : index
      %621 = memref.load %arg3[%c14] : memref<144xf32, #tpu.memory_space<smem>>
      %622 = vector.extract_strided_slice %38 {offsets = [2, 0], sizes = [1, 256], strides = [1, 1]} : vector<4x256xf32> to vector<1x256xf32>
      %623 = vector.broadcast %621 : f32 to vector<1x256xf32>
      %624 = arith.mulf %623, %622 : vector<1x256xf32>
      %625 = arith.addf %620, %624 : vector<1x256xf32>
      %c15 = arith.constant 15 : index
      %626 = memref.load %arg3[%c15] : memref<144xf32, #tpu.memory_space<smem>>
      %627 = vector.extract_strided_slice %38 {offsets = [3, 0], sizes = [1, 256], strides = [1, 1]} : vector<4x256xf32> to vector<1x256xf32>
      %628 = vector.broadcast %626 : f32 to vector<1x256xf32>
      %629 = arith.mulf %628, %627 : vector<1x256xf32>
      %630 = arith.addf %625, %629 : vector<1x256xf32>
      %c28 = arith.constant 28 : index
      %631 = memref.load %arg3[%c28] : memref<144xf32, #tpu.memory_space<smem>>
      %632 = vector.extract_strided_slice %42 {offsets = [0, 0], sizes = [1, 256], strides = [1, 1]} : vector<4x256xf32> to vector<1x256xf32>
      %633 = vector.broadcast %631 : f32 to vector<1x256xf32>
      %634 = arith.mulf %633, %632 : vector<1x256xf32>
      %635 = arith.addf %630, %634 : vector<1x256xf32>
      %c29 = arith.constant 29 : index
      %636 = memref.load %arg3[%c29] : memref<144xf32, #tpu.memory_space<smem>>
      %637 = vector.extract_strided_slice %42 {offsets = [1, 0], sizes = [1, 256], strides = [1, 1]} : vector<4x256xf32> to vector<1x256xf32>
      %638 = vector.broadcast %636 : f32 to vector<1x256xf32>
      %639 = arith.mulf %638, %637 : vector<1x256xf32>
      %640 = arith.addf %635, %639 : vector<1x256xf32>
      %c30 = arith.constant 30 : index
      %641 = memref.load %arg3[%c30] : memref<144xf32, #tpu.memory_space<smem>>
      %642 = vector.extract_strided_slice %42 {offsets = [2, 0], sizes = [1, 256], strides = [1, 1]} : vector<4x256xf32> to vector<1x256xf32>
      %643 = vector.broadcast %641 : f32 to vector<1x256xf32>
      %644 = arith.mulf %643, %642 : vector<1x256xf32>
      %645 = arith.addf %640, %644 : vector<1x256xf32>
      %c31 = arith.constant 31 : index
      %646 = memref.load %arg3[%c31] : memref<144xf32, #tpu.memory_space<smem>>
      %647 = vector.extract_strided_slice %42 {offsets = [3, 0], sizes = [1, 256], strides = [1, 1]} : vector<4x256xf32> to vector<1x256xf32>
      %648 = vector.broadcast %646 : f32 to vector<1x256xf32>
      %649 = arith.mulf %648, %647 : vector<1x256xf32>
      %650 = arith.addf %645, %649 : vector<1x256xf32>
      %c44 = arith.constant 44 : index
      %651 = memref.load %arg3[%c44] : memref<144xf32, #tpu.memory_space<smem>>
      %652 = vector.extract_strided_slice %46 {offsets = [0, 0], sizes = [1, 256], strides = [1, 1]} : vector<4x256xf32> to vector<1x256xf32>
      %653 = vector.broadcast %651 : f32 to vector<1x256xf32>
      %654 = arith.mulf %653, %652 : vector<1x256xf32>
      %655 = arith.addf %650, %654 : vector<1x256xf32>
      %c45 = arith.constant 45 : index
      %656 = memref.load %arg3[%c45] : memref<144xf32, #tpu.memory_space<smem>>
      %657 = vector.extract_strided_slice %46 {offsets = [1, 0], sizes = [1, 256], strides = [1, 1]} : vector<4x256xf32> to vector<1x256xf32>
      %658 = vector.broadcast %656 : f32 to vector<1x256xf32>
      %659 = arith.mulf %658, %657 : vector<1x256xf32>
      %660 = arith.addf %655, %659 : vector<1x256xf32>
      %c46 = arith.constant 46 : index
      %661 = memref.load %arg3[%c46] : memref<144xf32, #tpu.memory_space<smem>>
      %662 = vector.extract_strided_slice %46 {offsets = [2, 0], sizes = [1, 256], strides = [1, 1]} : vector<4x256xf32> to vector<1x256xf32>
      %663 = vector.broadcast %661 : f32 to vector<1x256xf32>
      %664 = arith.mulf %663, %662 : vector<1x256xf32>
      %665 = arith.addf %660, %664 : vector<1x256xf32>
      %c47 = arith.constant 47 : index
      %666 = memref.load %arg3[%c47] : memref<144xf32, #tpu.memory_space<smem>>
      %667 = vector.extract_strided_slice %46 {offsets = [3, 0], sizes = [1, 256], strides = [1, 1]} : vector<4x256xf32> to vector<1x256xf32>
      %668 = vector.broadcast %666 : f32 to vector<1x256xf32>
      %669 = arith.mulf %668, %667 : vector<1x256xf32>
      %670 = arith.addf %665, %669 : vector<1x256xf32>
      %c60 = arith.constant 60 : index
      %671 = memref.load %arg3[%c60] : memref<144xf32, #tpu.memory_space<smem>>
      %672 = vector.extract_strided_slice %50 {offsets = [0, 0], sizes = [1, 256], strides = [1, 1]} : vector<4x256xf32> to vector<1x256xf32>
      %673 = vector.broadcast %671 : f32 to vector<1x256xf32>
      %674 = arith.mulf %673, %672 : vector<1x256xf32>
      %675 = arith.addf %670, %674 : vector<1x256xf32>
      %c61 = arith.constant 61 : index
      %676 = memref.load %arg3[%c61] : memref<144xf32, #tpu.memory_space<smem>>
      %677 = vector.extract_strided_slice %50 {offsets = [1, 0], sizes = [1, 256], strides = [1, 1]} : vector<4x256xf32> to vector<1x256xf32>
      %678 = vector.broadcast %676 : f32 to vector<1x256xf32>
      %679 = arith.mulf %678, %677 : vector<1x256xf32>
      %680 = arith.addf %675, %679 : vector<1x256xf32>
      %c62 = arith.constant 62 : index
      %681 = memref.load %arg3[%c62] : memref<144xf32, #tpu.memory_space<smem>>
      %682 = vector.extract_strided_slice %50 {offsets = [2, 0], sizes = [1, 256], strides = [1, 1]} : vector<4x256xf32> to vector<1x256xf32>
      %683 = vector.broadcast %681 : f32 to vector<1x256xf32>
      %684 = arith.mulf %683, %682 : vector<1x256xf32>
      %685 = arith.addf %680, %684 : vector<1x256xf32>
      %c63 = arith.constant 63 : index
      %686 = memref.load %arg3[%c63] : memref<144xf32, #tpu.memory_space<smem>>
      %687 = vector.extract_strided_slice %50 {offsets = [3, 0], sizes = [1, 256], strides = [1, 1]} : vector<4x256xf32> to vector<1x256xf32>
      %688 = vector.broadcast %686 : f32 to vector<1x256xf32>
      %689 = arith.mulf %688, %687 : vector<1x256xf32>
      %690 = arith.addf %685, %689 : vector<1x256xf32>
      %c76 = arith.constant 76 : index
      %691 = memref.load %arg3[%c76] : memref<144xf32, #tpu.memory_space<smem>>
      %692 = vector.extract_strided_slice %34 {offsets = [0, 0], sizes = [1, 256], strides = [1, 1]} : vector<4x256xf32> to vector<1x256xf32>
      %693 = vector.broadcast %691 : f32 to vector<1x256xf32>
      %694 = arith.mulf %693, %692 : vector<1x256xf32>
      %695 = arith.addf %690, %694 : vector<1x256xf32>
      %c77 = arith.constant 77 : index
      %696 = memref.load %arg3[%c77] : memref<144xf32, #tpu.memory_space<smem>>
      %697 = vector.extract_strided_slice %34 {offsets = [1, 0], sizes = [1, 256], strides = [1, 1]} : vector<4x256xf32> to vector<1x256xf32>
      %698 = vector.broadcast %696 : f32 to vector<1x256xf32>
      %699 = arith.mulf %698, %697 : vector<1x256xf32>
      %700 = arith.addf %695, %699 : vector<1x256xf32>
      %c78 = arith.constant 78 : index
      %701 = memref.load %arg3[%c78] : memref<144xf32, #tpu.memory_space<smem>>
      %702 = vector.extract_strided_slice %34 {offsets = [2, 0], sizes = [1, 256], strides = [1, 1]} : vector<4x256xf32> to vector<1x256xf32>
      %703 = vector.broadcast %701 : f32 to vector<1x256xf32>
      %704 = arith.mulf %703, %702 : vector<1x256xf32>
      %705 = arith.addf %700, %704 : vector<1x256xf32>
      %c79 = arith.constant 79 : index
      %706 = memref.load %arg3[%c79] : memref<144xf32, #tpu.memory_space<smem>>
      %707 = vector.extract_strided_slice %34 {offsets = [3, 0], sizes = [1, 256], strides = [1, 1]} : vector<4x256xf32> to vector<1x256xf32>
      %708 = vector.broadcast %706 : f32 to vector<1x256xf32>
      %709 = arith.mulf %708, %707 : vector<1x256xf32>
      %710 = arith.addf %705, %709 : vector<1x256xf32>
      %c92 = arith.constant 92 : index
      %711 = memref.load %arg3[%c92] : memref<144xf32, #tpu.memory_space<smem>>
      %712 = vector.extract_strided_slice %54 {offsets = [0, 0], sizes = [1, 256], strides = [1, 1]} : vector<4x256xf32> to vector<1x256xf32>
      %713 = vector.broadcast %711 : f32 to vector<1x256xf32>
      %714 = arith.mulf %713, %712 : vector<1x256xf32>
      %715 = arith.addf %710, %714 : vector<1x256xf32>
      %c93 = arith.constant 93 : index
      %716 = memref.load %arg3[%c93] : memref<144xf32, #tpu.memory_space<smem>>
      %717 = vector.extract_strided_slice %54 {offsets = [1, 0], sizes = [1, 256], strides = [1, 1]} : vector<4x256xf32> to vector<1x256xf32>
      %718 = vector.broadcast %716 : f32 to vector<1x256xf32>
      %719 = arith.mulf %718, %717 : vector<1x256xf32>
      %720 = arith.addf %715, %719 : vector<1x256xf32>
      %c94 = arith.constant 94 : index
      %721 = memref.load %arg3[%c94] : memref<144xf32, #tpu.memory_space<smem>>
      %722 = vector.extract_strided_slice %54 {offsets = [2, 0], sizes = [1, 256], strides = [1, 1]} : vector<4x256xf32> to vector<1x256xf32>
      %723 = vector.broadcast %721 : f32 to vector<1x256xf32>
      %724 = arith.mulf %723, %722 : vector<1x256xf32>
      %725 = arith.addf %720, %724 : vector<1x256xf32>
      %c95 = arith.constant 95 : index
      %726 = memref.load %arg3[%c95] : memref<144xf32, #tpu.memory_space<smem>>
      %727 = vector.extract_strided_slice %54 {offsets = [3, 0], sizes = [1, 256], strides = [1, 1]} : vector<4x256xf32> to vector<1x256xf32>
      %728 = vector.broadcast %726 : f32 to vector<1x256xf32>
      %729 = arith.mulf %728, %727 : vector<1x256xf32>
      %730 = arith.addf %725, %729 : vector<1x256xf32>
      %c108 = arith.constant 108 : index
      %731 = memref.load %arg3[%c108] : memref<144xf32, #tpu.memory_space<smem>>
      %732 = vector.extract_strided_slice %58 {offsets = [0, 0], sizes = [1, 256], strides = [1, 1]} : vector<4x256xf32> to vector<1x256xf32>
      %733 = vector.broadcast %731 : f32 to vector<1x256xf32>
      %734 = arith.mulf %733, %732 : vector<1x256xf32>
      %735 = arith.addf %730, %734 : vector<1x256xf32>
      %c109 = arith.constant 109 : index
      %736 = memref.load %arg3[%c109] : memref<144xf32, #tpu.memory_space<smem>>
      %737 = vector.extract_strided_slice %58 {offsets = [1, 0], sizes = [1, 256], strides = [1, 1]} : vector<4x256xf32> to vector<1x256xf32>
      %738 = vector.broadcast %736 : f32 to vector<1x256xf32>
      %739 = arith.mulf %738, %737 : vector<1x256xf32>
      %740 = arith.addf %735, %739 : vector<1x256xf32>
      %c110 = arith.constant 110 : index
      %741 = memref.load %arg3[%c110] : memref<144xf32, #tpu.memory_space<smem>>
      %742 = vector.extract_strided_slice %58 {offsets = [2, 0], sizes = [1, 256], strides = [1, 1]} : vector<4x256xf32> to vector<1x256xf32>
      %743 = vector.broadcast %741 : f32 to vector<1x256xf32>
      %744 = arith.mulf %743, %742 : vector<1x256xf32>
      %745 = arith.addf %740, %744 : vector<1x256xf32>
      %c111 = arith.constant 111 : index
      %746 = memref.load %arg3[%c111] : memref<144xf32, #tpu.memory_space<smem>>
      %747 = vector.extract_strided_slice %58 {offsets = [3, 0], sizes = [1, 256], strides = [1, 1]} : vector<4x256xf32> to vector<1x256xf32>
      %748 = vector.broadcast %746 : f32 to vector<1x256xf32>
      %749 = arith.mulf %748, %747 : vector<1x256xf32>
      %750 = arith.addf %745, %749 : vector<1x256xf32>
      %c124 = arith.constant 124 : index
      %751 = memref.load %arg3[%c124] : memref<144xf32, #tpu.memory_space<smem>>
      %752 = vector.extract_strided_slice %62 {offsets = [0, 0], sizes = [1, 256], strides = [1, 1]} : vector<4x256xf32> to vector<1x256xf32>
      %753 = vector.broadcast %751 : f32 to vector<1x256xf32>
      %754 = arith.mulf %753, %752 : vector<1x256xf32>
      %755 = arith.addf %750, %754 : vector<1x256xf32>
      %c125 = arith.constant 125 : index
      %756 = memref.load %arg3[%c125] : memref<144xf32, #tpu.memory_space<smem>>
      %757 = vector.extract_strided_slice %62 {offsets = [1, 0], sizes = [1, 256], strides = [1, 1]} : vector<4x256xf32> to vector<1x256xf32>
      %758 = vector.broadcast %756 : f32 to vector<1x256xf32>
      %759 = arith.mulf %758, %757 : vector<1x256xf32>
      %760 = arith.addf %755, %759 : vector<1x256xf32>
      %c126 = arith.constant 126 : index
      %761 = memref.load %arg3[%c126] : memref<144xf32, #tpu.memory_space<smem>>
      %762 = vector.extract_strided_slice %62 {offsets = [2, 0], sizes = [1, 256], strides = [1, 1]} : vector<4x256xf32> to vector<1x256xf32>
      %763 = vector.broadcast %761 : f32 to vector<1x256xf32>
      %764 = arith.mulf %763, %762 : vector<1x256xf32>
      %765 = arith.addf %760, %764 : vector<1x256xf32>
      %c127 = arith.constant 127 : index
      %766 = memref.load %arg3[%c127] : memref<144xf32, #tpu.memory_space<smem>>
      %767 = vector.extract_strided_slice %62 {offsets = [3, 0], sizes = [1, 256], strides = [1, 1]} : vector<4x256xf32> to vector<1x256xf32>
      %768 = vector.broadcast %766 : f32 to vector<1x256xf32>
      %769 = arith.mulf %768, %767 : vector<1x256xf32>
      %770 = arith.addf %765, %769 : vector<1x256xf32>
      %c140 = arith.constant 140 : index
      %771 = memref.load %arg3[%c140] : memref<144xf32, #tpu.memory_space<smem>>
      %772 = vector.extract_strided_slice %66 {offsets = [0, 0], sizes = [1, 256], strides = [1, 1]} : vector<4x256xf32> to vector<1x256xf32>
      %773 = vector.broadcast %771 : f32 to vector<1x256xf32>
      %774 = arith.mulf %773, %772 : vector<1x256xf32>
      %775 = arith.addf %770, %774 : vector<1x256xf32>
      %c141 = arith.constant 141 : index
      %776 = memref.load %arg3[%c141] : memref<144xf32, #tpu.memory_space<smem>>
      %777 = vector.extract_strided_slice %66 {offsets = [1, 0], sizes = [1, 256], strides = [1, 1]} : vector<4x256xf32> to vector<1x256xf32>
      %778 = vector.broadcast %776 : f32 to vector<1x256xf32>
      %779 = arith.mulf %778, %777 : vector<1x256xf32>
      %780 = arith.addf %775, %779 : vector<1x256xf32>
      %c142 = arith.constant 142 : index
      %781 = memref.load %arg3[%c142] : memref<144xf32, #tpu.memory_space<smem>>
      %782 = vector.extract_strided_slice %66 {offsets = [2, 0], sizes = [1, 256], strides = [1, 1]} : vector<4x256xf32> to vector<1x256xf32>
      %783 = vector.broadcast %781 : f32 to vector<1x256xf32>
      %784 = arith.mulf %783, %782 : vector<1x256xf32>
      %785 = arith.addf %780, %784 : vector<1x256xf32>
      %c143 = arith.constant 143 : index
      %786 = memref.load %arg3[%c143] : memref<144xf32, #tpu.memory_space<smem>>
      %787 = vector.extract_strided_slice %66 {offsets = [3, 0], sizes = [1, 256], strides = [1, 1]} : vector<4x256xf32> to vector<1x256xf32>
      %788 = vector.broadcast %786 : f32 to vector<1x256xf32>
      %789 = arith.mulf %788, %787 : vector<1x256xf32>
      %790 = arith.addf %785, %789 : vector<1x256xf32>
      %791 = tpu.concatenate %247, %428, %609, %790 in 0 : vector<1x256xf32>, vector<1x256xf32>, vector<1x256xf32>, vector<1x256xf32> -> vector<4x256xf32>
      %c0_61 = arith.constant 0 : index
      %c0_62 = arith.constant 0 : index
      %792 = vector.load %arg4[%c0_61, %c0_62] : memref<4x1xf32, #tpu.memory_space<vmem>>, vector<4x1xf32>
      %793 = vector.broadcast %792 : vector<4x1xf32> to vector<4x256xf32>
      %794 = arith.addf %791, %793 : vector<4x256xf32>
      %c0_63 = arith.constant 0 : index
      %c0_64 = arith.constant 0 : index
      %c0_65 = arith.constant 0 : index
      %795 = vector.load %arg6[%c0_63, %c0_64, %c0_65] : memref<1x4x256xf32, #tpu.memory_space<vmem>>, vector<1x4x256xf32>
      %796 = vector.shape_cast %795 : vector<1x4x256xf32> to vector<4x256xf32>
      %797 = vector.shape_cast %794 : vector<4x256xf32> to vector<1x4x256xf32>
      tpu.vector_store %arg6[%c0_63, %c0_64, %c0_65], %797 {strides = array<i32>} : memref<1x4x256xf32, #tpu.memory_space<vmem>>, vector<1x4x256xf32>,
    } else {
    }
    return
  }
  func.func @transform_0(%arg0: i32, %arg1: i32) -> (i32, i32, i32, i32) {
    %c0_i32 = arith.constant 0 : i32
    %c0_i32_0 = arith.constant 0 : i32
    %c0_i32_1 = arith.constant 0 : i32
    return %arg0, %c0_i32, %arg1, %c0_i32_0 : i32, i32, i32, i32
  }
  func.func @transform_1(%arg0: i32, %arg1: i32) -> i32 {
    %c0_i32 = arith.constant 0 : i32
    %c0_i32_0 = arith.constant 0 : i32
    return %c0_i32 : i32
  }
  func.func @transform_2(%arg0: i32, %arg1: i32) -> (i32, i32) {
    %c0_i32 = arith.constant 0 : i32
    %c0_i32_0 = arith.constant 0 : i32
    %c0_i32_1 = arith.constant 0 : i32
    return %c0_i32, %c0_i32_0 : i32, i32
  }
  func.func @transform_3(%arg0: i32, %arg1: i32) -> (i32, i32) {
    %c0_i32 = arith.constant 0 : i32
    %c0_i32_0 = arith.constant 0 : i32
    %c0_i32_1 = arith.constant 0 : i32
    return %c0_i32, %c0_i32_0 : i32, i32
  }
  func.func @transform_4(%arg0: i32, %arg1: i32) -> (i32, i32, i32) {
    %c0_i32 = arith.constant 0 : i32
    %c0_i32_0 = arith.constant 0 : i32
    %c0_i32_1 = arith.constant 0 : i32
    return %arg0, %c0_i32, %c0_i32_0 : i32, i32, i32
  }
}

</mosaic_0001>

<bundles_post_ra>
// kernel: tpu_custom_call.1
= control target key start
LH: loop header
LB: loop body
LE: loop exit
PB: predicated region body
PF: predicated region fallthrough
CT: control target
= control target key end

     0   :  { %s4263_s0 = inlined_call_operand.hbm [shape: f32[2,4,8,256], index: 0, kind: input, shape index: {}]   ;;  %s4264_s1 = inlined_call_operand.vmem [shape: f32[144], index: 1, kind: input, shape index: {}]   ;;  %s4265_s2 = inlined_call_operand.vmem [shape: f32[4,1], index: 2, kind: input, shape index: {}]   ;;  %s4266_s3 = inlined_call_operand.hbm [shape: f32[9,256], index: 3, kind: input, shape index: {}]   ;;  %s4267_s4 = inlined_call_operand.hbm [shape: f32[2,4,256], index: 4, kind: output, shape index: {}]  }
   0x1   :  { %4283 = sst [smem:[#allocation27_spill]] %s4263_s0 }
   0x2   :  { %4284 = sst [smem:[#allocation28_spill]] %s4264_s1 }
   0x3   :  { %4285 = sst [smem:[#allocation29_spill]] %s4265_s2 }
   0x4   :  { %4286 = sst [smem:[#allocation30_spill]] %s4266_s3 }
   0x5   :  { %4287 = sst [smem:[#allocation31_spill]] %s4267_s4 }
   0x6   :  { %9 = vsyncpa [#allocation4], 0 }
   0x7   :  { %11 = vsyncpa [#allocation4 + $0x1], 0 }
   0x8   :  { %12 = vsyncpa [#allocation6], 0 }
   0x9   :  { %13 = vsyncpa [#allocation9], 0 }
   0xa   :  { %14 = vsyncpa [#allocation5], 0 }
   0xb   :  { %16 = vsyncpa [#allocation5 + $0x1], 0  ;;  %s2784_s15 = smov 0   ;;  %s2786_s16 = smov 0  }
   0xc   :  { %s2788_s17 = smov 0   ;;  %s2790_s18 = smov 0  }
   0xd   :  { %s2792_s19 = smov 0   ;;  %s2794_s20 = smov 0  }
   0xe LB: > { %4288 = sst [smem:[#allocation15_spill]] %s2724_s15  ;;  %s2288_s21 = sadd.s32 4294967295, %s2744_s20   ;;  %s2744_s20 = sphi %s2794_s20, %s22_s20   ;;  %s2740_s19 = sphi %s2792_s19, %s4363_s19   ;;  %s2736_s18 = sphi %s2790_s18, %s4362_s18   ;;  %s2732_s17 = sphi %s2788_s17, %s4361_s17   ;;  %s2728_s16 = sphi %s2786_s16, %s4360_s16   ;;  %s2724_s15 = sphi %s2784_s15, %s4359_s15  }
   0xf   : > { %4289 = sst [smem:[#allocation16_spill]] %s2728_s16  ;;  %s2289_s22 = sadd.s32 4294967294, %s2744_s20  }
  0x10   : > { %4290 = sst [smem:[#allocation17_spill]] %s2732_s17  ;;  %p50_p0 = scmp.ne.s32.totalorder %s2732_s17, %s2728_s16 }
  0x11   : > { %4291 = sst [smem:[#allocation18_spill]] %s2736_s18  ;;  %p51_p1 = scmp.eq.s32.totalorder %s2744_s20, 0 }
  0x12   : > { %4292 = sst [smem:[#allocation19_spill]] %s2740_s19  ;;  %p56_p2 = scmp.ne.s32.totalorder %s2728_s16, %s2724_s15 }
  0x13   : > { %4293 = sst [smem:[#allocation20_spill]] %s2744_s20  ;;  %p2822_p3 = scmp.eq.s32.totalorder %s2288_s21, 0 }
  0x14   : > { %p143_p4 = scmp.eq.s32.totalorder %s2288_s21, 1  ;;  %p2826_p5 = por %p51_p1, %p50_p0 }
  0x15   : > { %p149_p6 = scmp.eq.s32.totalorder %s2289_s22, 1  ;;  %p2832_p7 = por %p2822_p3, %p56_p2 }
  0x16   : > { %p2836_p8 = por %p143_p4, %p50_p0  ;;  %p2290_p10 = scmp.ge.s32.totalorder %s2744_s20, 1 }
  0x17   : > { %p2840_p9 = por %p149_p6, %p56_p2  ;;  %p156_p11 = scmp.lt.s32.totalorder %s2744_s20, 3 }
  0x18   : > { %s4297_s27 = scalar_select %p2836_p8, 1, 0 }
  0x19   : > { %s4299_s28 = scalar_select %p2840_p9, 1, 0 }
  0x1a   : > { %4298 = sst [smem:[#allocation21_spill]] %s4297_s27  ;;  %p2849_p12 = pnand %p2290_p10, %p156_p11 }
  0x1b   : > { %4300 = sst [smem:[#allocation22_spill]] %s4299_s28  ;;  %p2293_p13 = scmp.ge.s32.totalorder %s2744_s20, 2 }
  0x1c   : > { %s4301_s1 = sld [smem:[#allocation28_spill]]  ;;  %p2512_p0 = scmp.lt.s32.totalorder %s2744_s20, 2 }
  0x1d   : > { %p2495_p1 = pneg %p2849_p12  ;;  %s4303_s3 = sld [smem:[#allocation30_spill]] }
  0x1e   : > { %p2862_p2 = pnand %p2512_p0, %p2826_p5  ;;  %s2746_s11 = smov [#allocation8]  }
  0x1f   : > { %p2496_p4 = pnand %p2495_p1, %p2822_p3  ;;  %s182_s12 = sshll.u32 %s2746_s11, 4  ;;  %s183_s12 = int_to_ptr.vmem [resolvable:$true] %s182_s12 }
  0x20   : > { %s2747_s13 = smov [#allocation7]   ;;  %s2748_s14 = smov 256  }
  0x21   : > { %s2749_s21 = smov 16   ;;  %s196_s22 = sand.u32 1, %s2732_s17  }
  0x22   : > { %s168_s5 = sshll.u32 %s4301_s1, 4  ;;  %s34_s25 = sadd.s32 1, %s2740_s19  ;;  %s169_s5 = int_to_ptr.vmem [resolvable:$true] %s168_s5 }
  0x23   : > { %s180_s9 = sshll.u32 %s4303_s3, 4  ;;  %s2294_s29 = sshll.u32 %s196_s22, 6  ;;  %s181_s9 = int_to_ptr.hbm [resolvable:$true] %s180_s9 }
  0x24   : > { %2498 = dma.vmem_to_smem (!%p2496_p4), %s169_s5, 32, %s2747_s13, [#allocation6]  }
  0x25   : > { %2501 = dma.hbm_to_vmem [thread:$0]  (!%p2496_p4), %s181_s9, 512, %s183_s12, [#allocation9], %s2748_s14, %s2748_s14, %s2749_s21  }
  0x26   : > { %p36_p5 = scmp.ge.s32.totalorder %s34_s25, 2  ;;  %s2481_s30 = sshll.u32 %s2740_s19, 6 }
  0x27   : > { %s200_s7 = scalar_lea.vmem [#allocation3], %s2294_s29  ;;  %s4306_s0 = sld [smem:[#allocation27_spill]] }
  0x28   : > { %s210_s8 = sshll.u32 %s200_s7, 4  ;;  %s4365_s25 = smov (%p36_p5, %s34_s25), 0  ;;  %s211_s8 = int_to_ptr.vmem [resolvable:$true] %s210_s8 }
  0x29   : > { %4305 = sst [smem:[#allocation23_spill]] %s4365_s25  ;;  %s38_s13 = ssub.s32 %s2740_s19, %s4365_s25 }
  0x2a   : > { %p41_p6 = scmp.eq.s32.totalorder %s38_s13, 0  ;;  %s197_s12 = scalar_lea.sflag [#allocation4], %s196_s22 }
  0x2b   : > { %s4307_s1 = sadd.s32 1, %s2732_s17  ;;  %222 = sbr.rel (%p2849_p12) target bundleno = 536 (0x218), region = 36 }
  0x2c   : > { %s2883_s3 = scalar_select %p41_p6, %s2732_s17, %s4307_s1  }
  0x2d   : > { %s207_s5 = scalar_lea.hbm %s4306_s0, %s2481_s30 }
  0x2e   : > { %s208_s9 = sshll.u32 %s207_s5, 4  ;;  %4308 = sst [smem:[#allocation24_spill]] %s2883_s3  ;;  %s209_s9 = int_to_ptr.hbm [resolvable:$true] %s208_s9 }
  0x2f   : > { %2505 = dma.hbm_to_vmem [thread:$0]  (!%p2862_p2), %s209_s9, 1024, %s211_s8, %s197_s12, %s2748_s14, %s2748_s14, %s2749_s21  }
  0x30   : > { %s2888_s29 = sand.u32 1, %s2728_s16  }
  0x31   : > { %4309 = sst [smem:[#allocation25_spill]] %s2888_s29  ;;  %s2298_s23 = sshll.u32 %s2888_s29, 6 }
  0x32   : > { %s225_s30 = scalar_lea.sflag [#allocation4], %s2888_s29  ;;  %s2892_s7 = scalar_lea.vmem [#allocation3], %s2298_s23 }
  0x33   : > { %2707 = dma.done.wait (%p2832_p7), %s225_s30, 1024  }
  0x34   : > { %2709 = vsyncadd (%p2832_p7), %s225_s30, 4294966272 }
  0x35   : > { %2711 = dma.done.wait (%p2822_p3), [#allocation6], 32  }
  0x36   : > { %2713 = vsyncadd (%p2822_p3), [#allocation6], 4294967264 }
  0x37   : > { %2715 = dma.done.wait (%p2822_p3), [#allocation9], 512  }
  0x38   : > { %2717 = vsyncadd (%p2822_p3), [#allocation9], 4294966784 }
  0x39   : > { %244 = sfence }
  0x3a   : > { %v271_v0 = vld [vmem:[%s2892_s7] ss:$8 sm:$0x3]  ;;  %v2302_v1 = vld [vmem:[%s2892_s7 + $0x10] ss:$8 sm:$0x3] }
  0x3b   : > { %v2303_v2 = vld [vmem:[%s2892_s7 + $0x20] ss:$8 sm:$0x3]  ;;  %v2304_v3 = vld [vmem:[%s2892_s7 + $0x30] ss:$8 sm:$0x3] }
  0x3c   : > { %282 = vst [vmem:[#allocation1] ss:$4 sm:$0xff] %v271_v0  ;;  %v2305_v4 = vld [vmem:[%s2892_s7 + $0x1] ss:$8 sm:$0x3]  ;;  %s2750_s1 = smov 17  }
  0x3d   : > { %284 = vst [vmem:[#allocation1 + $0x1] ss:$4 sm:$0xff] %v2302_v1  ;;  %v2306_v5 = vld [vmem:[%s2892_s7 + $0x11] ss:$8 sm:$0x3]  ;;  %s2751_s24 = smov 16  }
  0x3e   : > { %286 = vst [vmem:[#allocation1 + $0x2] ss:$4 sm:$0xff] %v2303_v2  ;;  %v2307_v7 = vld [vmem:[%s2892_s7 + $0x21] ss:$8 sm:$0x3]  ;;  %s2752_s26 = smov 15  }
  0x3f   : > { %288 = vst [vmem:[#allocation1 + $0x3] ss:$4 sm:$0xff] %v2304_v3  ;;  %v2308_v8 = vld [vmem:[%s2892_s7 + $0x31] ss:$8 sm:$0x3]  ;;  %s2753_s6 = smov 1   ;;  %v462_v3 = vlaneseq }
  0x40   : > { %v2309_v9 = vld [vmem:[%s2892_s7 + $0x2] ss:$8 sm:$0x3]  ;;  %v2310_v10 = vld [vmem:[%s2892_s7 + $0x12] ss:$8 sm:$0x3] }
  0x41   : > { %v2311_v12 = vld [vmem:[%s2892_s7 + $0x22] ss:$8 sm:$0x3]  ;;  %v2312_v13 = vld [vmem:[%s2892_s7 + $0x32] ss:$8 sm:$0x3] }
  0x42   : > { %v2313_v14 = vld [vmem:[%s2892_s7 + $0x3] ss:$8 sm:$0x3]  ;;  %v2314_v15 = vld [vmem:[%s2892_s7 + $0x13] ss:$8 sm:$0x3] }
  0x43   : > { %v2315_v17 = vld [vmem:[%s2892_s7 + $0x23] ss:$8 sm:$0x3]  ;;  %v2316_v18 = vld [vmem:[%s2892_s7 + $0x33] ss:$8 sm:$0x3] }
  0x44   : > { %v2317_v19 = vld [vmem:[%s2892_s7 + $0x4] ss:$8 sm:$0x3]  ;;  %v2318_v20 = vld [vmem:[%s2892_s7 + $0x14] ss:$8 sm:$0x3] }
  0x45   : > { %v2319_v22 = vld [vmem:[%s2892_s7 + $0x24] ss:$8 sm:$0x3]  ;;  %v2320_v23 = vld [vmem:[%s2892_s7 + $0x34] ss:$8 sm:$0x3] }
  0x46   : > { %v289_v6 = vld [vmem:[#allocation1] sm:$0xff]  ;;  %v2321_v24 = vld [vmem:[%s2892_s7 + $0x5] ss:$8 sm:$0x3]  ;;  %v2754_v56 = vmov 0   ;;  %s2755_s10 = smov 127  }
  0x47   : > { %304 = vst [vmem:[#allocation1] ss:$4 sm:$0xff] %v2305_v4  ;;  %v2322_v25 = vld [vmem:[%s2892_s7 + $0x15] ss:$8 sm:$0x3]  ;;  %2577 = vset.pattern.permute.xlu1 %v2754_v56  ;;  %2578 = vset.pattern.permute.xlu0 %v2754_v56  ;;  %s2756_s14 = smov 113  }
  0x48   : > { %306 = vst [vmem:[#allocation1 + $0x1] ss:$4 sm:$0xff] %v2306_v5  ;;  %v2323_v27 = vld [vmem:[%s2892_s7 + $0x25] ss:$8 sm:$0x3]  ;;  %s2757_s21 = smov 112  }
  0x49   : > { %308 = vst [vmem:[#allocation1 + $0x2] ss:$4 sm:$0xff] %v2307_v7  ;;  %v2324_v28 = vld [vmem:[%s2892_s7 + $0x35] ss:$8 sm:$0x3]  ;;  %s4310_s2 = sld [smem:[#allocation29_spill]] }
  0x4a   : > { %310 = vst [vmem:[#allocation1 + $0x3] ss:$4 sm:$0xff] %v2308_v8  ;;  %v2325_v29 = vld [vmem:[%s2892_s7 + $0x6] ss:$8 sm:$0x3]  ;;  %s2758_s11 = smov 111  }
  0x4b   : > { %v2326_v31 = vld [vmem:[%s2892_s7 + $0x16] ss:$8 sm:$0x3]  ;;  %v2327_v33 = vld [vmem:[%s2892_s7 + $0x26] ss:$8 sm:$0x3] }
  0x4c   : > { %v2328_v34 = vld [vmem:[%s2892_s7 + $0x36] ss:$8 sm:$0x3]  ;;  %v2329_v37 = vld [vmem:[%s2892_s7 + $0x7] ss:$8 sm:$0x3] }
  0x4d   : > { %v2330_v38 = vld [vmem:[%s2892_s7 + $0x17] ss:$8 sm:$0x3]  ;;  %v2331_v41 = vld [vmem:[%s2892_s7 + $0x27] ss:$8 sm:$0x3] }
  0x4e   : > { %v2332_v42 = vld [vmem:[%s2892_s7 + $0x37] ss:$8 sm:$0x3]  ;;  %s2951_s5 = sld [smem:[#allocation7]]  ;;  %v2971_v5 = vand.u32 127, %v462_v3  ;;  %vm2144_vm8 = vcmask 1040384  }
  0x4f   : > { %v2153_v63 = vld [vmem:[%s4310_s2] sm:$0xf]  ;;  %s2953_s13 = sld [smem:[#allocation7 + $0x1]]  ;;  %v509_v4 = vld [vmem:[#allocation8 + $0x2] ss:$8 sm:$0x3] }
  0x50   : > { %s2955_s9 = sld [smem:[#allocation7 + $0x2]]  ;;  %vm505_vm0 = vcmp.lt.s32.totalorder %v2971_v5, 15  ;;  %v511_v7 = vperm.slane %v509_v4, 0  ;;  %vm464_vm1 = vcmp.lt.s32.totalorder %v2971_v5, 17  ;;  %vm484_vm2 = vcmp.lt.s32.totalorder %v2971_v5, 16 }
  0x51   : > { %v311_v11 = vld [vmem:[#allocation1] sm:$0xff]  ;;  %s2957_s12 = sld [smem:[#allocation7 + $0x3]]  ;;  %vm526_vm3 = vcmp.lt.s32.totalorder %v2971_v5, 1  ;;  %vm547_vm4 = vcmp.lt.s32.totalorder %v2971_v5, 127  ;;  %vm568_vm5 = vcmp.lt.s32.totalorder %v2971_v5, 113  ;;  %vm589_vm6 = vcmp.lt.s32.totalorder %v2971_v5, 112 }
  0x52   : > { %326 = vst [vmem:[#allocation1] ss:$4 sm:$0xff] %v2309_v9  ;;  %v313_v30 = vadd.f32 %v311_v11, %v289_v6  ;;  %s2959_s23 = sld [smem:[#allocation7 + $0x4]]  ;;  %v467_v6 = vld [vmem:[#allocation8] ss:$8 sm:$0x3] }
  0x53   : > { %328 = vst [vmem:[#allocation1 + $0x1] ss:$4 sm:$0xff] %v2310_v10  ;;  %s2961_s30 = sld [smem:[#allocation7 + $0x10]]  ;;  %v2980_v9 = vld [vmem:[#allocation8 + $0x1] ss:$8 sm:$0x3] }
  0x54   : > { %330 = vst [vmem:[#allocation1 + $0x2] ss:$4 sm:$0xff] %v2311_v12  ;;  %s2963_s7 = sld [smem:[#allocation7 + $0x11]]  ;;  %v512_v10 = vperm.slane %v509_v4, 1  ;;  %v469_v11 = vperm.slane %v467_v6, 0  ;;  %vm610_vm7 = vcmp.lt.s32.totalorder %v2971_v5, 111 }
  0x55   : > { %332 = vst [vmem:[#allocation1 + $0x3] ss:$4 sm:$0xff] %v2312_v13  ;;  %v470_v13 = vperm.slane %v467_v6, 1  ;;  %s3010_s22 = sld [smem:[#allocation7 + $0x31]]  ;;  %vm2147_vm9 = vcmask 1041408   ;;  %vm2150_vm10 = vcmask 1042432  }
  0x56   : > { %s3018_s8 = sld [smem:[#allocation7 + $0x40]]  ;;  %vm2164_vm11 = vcmask 1043456  }
  0x57   : > { %s3536_s0 = sld [smem:[#allocation7 + $0x75]] }
  0x58   : > { %s3586_s2 = sld [smem:[#allocation7 + $0x1a]] }
  0x59   : > { %s3590_s25 = sld [smem:[#allocation7 + $0x84]] }
  0x5a   : > { %s3596_s19 = sld [smem:[#allocation7 + $0x85]] }
  0x5b   : > { %s3602_s3 = sld [smem:[#allocation7 + $0x1b]] }
  0x5c   : > { %v333_v16 = vld [vmem:[#allocation1] sm:$0xff]  ;;  %s3628_s17 = sld [smem:[#allocation7 + $0x38]] }
  0x5d   : > { %348 = vst [vmem:[#allocation1] ss:$4 sm:$0xff] %v2313_v14  ;;  %v335_v35 = vadd.f32 %v333_v16, %v313_v30  ;;  %v490_v16 = vperm.slane %v2980_v9, 0  ;;  %v999_v30 = vstv %s2959_s23  ;;  %s3401_s23 = sld [smem:[#allocation7 + $0x25]] }
  0x5e   : > { %350 = vst [vmem:[#allocation1 + $0x1] ss:$4 sm:$0xff] %v2314_v15  ;;  %s3664_s16 = sld [smem:[#allocation7 + $0x87]] }
  0x5f   : > { %352 = vst [vmem:[#allocation1 + $0x2] ss:$4 sm:$0xff] %v2315_v17  ;;  %v491_v17 = vperm.slane %v2980_v9, 1  ;;  %s3689_s20 = sld [smem:[#allocation7 + $0x5a]] }
  0x60   : > { %354 = vst [vmem:[#allocation1 + $0x3] ss:$4 sm:$0xff] %v2316_v18  ;;  %s3752_s28 = sld [smem:[#allocation7 + $0xf]] }
  0x61   : > { %s3756_s15 = sld [smem:[#allocation7 + $0x7a]] }
  0x62   : > { %s3802_s27 = sld [smem:[#allocation7 + $0x1e]] }
  0x63   : > { %s3806_s4 = sld [smem:[#allocation7 + $0x1f]] }
  0x64   : > { %s3808_s18 = sld [smem:[#allocation7 + $0x89]] }
  0x65   : > { %s3857_s29 = sld [smem:[#allocation7 + $0x3f]] }
  0x67   : > { %v355_v21 = vld [vmem:[#allocation1] sm:$0xff] }
  0x68   : > { %370 = vst [vmem:[#allocation1] ss:$4 sm:$0xff] %v2317_v19  ;;  %v357_v36 = vadd.f32 %v355_v21, %v335_v35  ;;  %v623_v19 = vstv %s2951_s5  ;;  %v2990_v21 = vld [vmem:[#allocation8 + $0x3] ss:$8 sm:$0x3]  ;;  %s3064_s5 = sld [smem:[#allocation7 + $0x32]] }
  0x69   : > { %372 = vst [vmem:[#allocation1 + $0x1] ss:$4 sm:$0xff] %v2318_v20  ;;  %v532_v35 = vperm.slane %v2990_v21, 0 }
  0x6a   : > { %374 = vst [vmem:[#allocation1 + $0x2] ss:$4 sm:$0xff] %v2319_v22  ;;  %v629_v22 = vstv %s2953_s13  ;;  %s3069_s13 = sld [smem:[#allocation7 + $0x33]] }
  0x6b   : > { %376 = vst [vmem:[#allocation1 + $0x3] ss:$4 sm:$0xff] %v2320_v23  ;;  %v641_v23 = vstv %s2955_s9  ;;  %s3075_s9 = sld [smem:[#allocation7 + $0x42]] }
  0x72   : > { %v377_v26 = vld [vmem:[#allocation1] sm:$0xff] }
  0x73   : > { %392 = vst [vmem:[#allocation1] ss:$4 sm:$0xff] %v2321_v24  ;;  %v379_v39 = vadd.f32 %v377_v26, %v357_v36  ;;  %v2999_v26 = vld [vmem:[#allocation8 + $0x6] ss:$8 sm:$0x3]  ;;  %v533_v36 = vperm.slane %v2990_v21, 1 }
  0x74   : > { %394 = vst [vmem:[#allocation1 + $0x1] ss:$4 sm:$0xff] %v2322_v25  ;;  %v2997_v25 = vld [vmem:[#allocation8 + $0x5] ss:$8 sm:$0x3] }
  0x75   : > { %396 = vst [vmem:[#allocation1 + $0x2] ss:$4 sm:$0xff] %v2323_v27  ;;  %v653_v27 = vstv %s2957_s12  ;;  %s3095_s12 = sld [smem:[#allocation7 + $0x43]] }
  0x76   : > { %398 = vst [vmem:[#allocation1 + $0x3] ss:$4 sm:$0xff] %v2324_v28  ;;  %v665_v28 = vstv %s2961_s30  ;;  %s3152_s30 = sld [smem:[#allocation7 + $0x50]] }
  0x7d   : > { %v399_v32 = vld [vmem:[#allocation1] sm:$0xff] }
  0x7e   : > { %414 = vst [vmem:[#allocation1] ss:$4 sm:$0xff] %v2325_v29  ;;  %v401_v43 = vadd.f32 %v399_v32, %v379_v39  ;;  %v671_v29 = vstv %s2963_s7  ;;  %s3154_s7 = sld [smem:[#allocation7 + $0x51]] }
  0x7f   : > { %416 = vst [vmem:[#allocation1 + $0x1] ss:$4 sm:$0xff] %v2326_v31 }
  0x80   : > { %418 = vst [vmem:[#allocation1 + $0x2] ss:$4 sm:$0xff] %v2327_v33 }
  0x81   : > { %420 = vst [vmem:[#allocation1 + $0x3] ss:$4 sm:$0xff] %v2328_v34 }
  0x88   : > { %v421_v40 = vld [vmem:[#allocation1] sm:$0xff] }
  0x89   : > { %436 = vst [vmem:[#allocation1] ss:$4 sm:$0xff] %v2329_v37  ;;  %v423_v44 = vadd.f32 %v421_v40, %v401_v43  ;;  %v574_v43 = vperm.slane %v2999_v26, 0 }
  0x8a   : > { %438 = vst [vmem:[#allocation1 + $0x1] ss:$4 sm:$0xff] %v2330_v38 }
  0x8b   : > { %440 = vst [vmem:[#allocation1 + $0x2] ss:$4 sm:$0xff] %v2331_v41  ;;  %v553_v41 = vperm.slane %v2997_v25, 0 }
  0x8c   : > { %442 = vst [vmem:[#allocation1 + $0x3] ss:$4 sm:$0xff] %v2332_v42  ;;  %v554_v42 = vperm.slane %v2997_v25, 1 }
  0x93   : > { %v443_v45 = vld [vmem:[#allocation1] sm:$0xff] }
  0x94   : > { %v445_v46 = vadd.f32 %v443_v45, %v423_v44 }
  0x96   : > { %v2938_v47 = vmul.f32 0.125, %v445_v46 }
  0x98   : > { %453 = vst [vmem:[#allocation1] ss:$2 sm:$0xff] %v2938_v47 }
  0x9f   : > { %v454_v48 = vld.sshfl [vmem:[#allocation1] sm:$0xff pattern:$0x75316420]  ;;  %v455_v49 = vld.sshfl [vmem:[#allocation1 + $0x8] sm:$0xff pattern:$0x75316420] }
  0xa0   : > { %458 = vrot.lane.b32.xlu0 %v454_v48, %s2750_s1  ;;  %475 = vst [vmem:[#allocation1] ss:$2 sm:$0xff] %v2938_v47  ;;  %v575_v48 = vperm.slane %v2999_v26, 1 }
  0xa7   : > { %v476_v50 = vld.sshfl [vmem:[#allocation1] sm:$0xff pattern:$0x75316420]  ;;  %v477_v51 = vld.sshfl [vmem:[#allocation1 + $0x8] sm:$0xff pattern:$0x75316420] }
  0xa8   : > { %460 = vrot.lane.b32.xlu0 %v455_v49, %s2750_s1  ;;  %480 = vrot.lane.b32.xlu1 %v476_v50, %s2751_s24  ;;  %496 = vst [vmem:[#allocation1] ss:$2 sm:$0xff] %v2938_v47  ;;  %s2965_s1 = sld [smem:[#allocation7 + $0x12]] }
  0xae   : > { %v683_v31 = vstv %s2965_s1  ;;  %s3160_s1 = sld [smem:[#allocation7 + $0x52]] }
  0xaf   : > { %v497_v52 = vld.sshfl [vmem:[#allocation1] sm:$0xff pattern:$0x75316420]  ;;  %v498_v53 = vld.sshfl [vmem:[#allocation1 + $0x8] sm:$0xff pattern:$0x75316420] }
  0xb0   : > { %482 = vrot.lane.b32.xlu1 %v477_v51, %s2751_s24  ;;  %501 = vrot.lane.b32.xlu2 %v497_v52, %s2752_s26  ;;  %517 = vst [vmem:[#allocation1] ss:$2 sm:$0xff] %v2938_v47  ;;  %s2967_s24 = sld [smem:[#allocation7 + $0x13]] }
  0xb6   : > { %v695_v32 = vstv %s2967_s24  ;;  %s3183_s24 = sld [smem:[#allocation7 + $0x53]] }
  0xb7   : > { %v519_v54 = vld.sshfl [vmem:[#allocation1 + $0x8] sm:$0xff pattern:$0x75316420]  ;;  %v518_v55 = vld.sshfl [vmem:[#allocation1] sm:$0xff pattern:$0x75316420] }
  0xb8   : > { %524 = vrot.lane.b32.xlu1 %v519_v54, %s2753_s6  ;;  %522 = vrot.lane.b32.xlu0 %v518_v55, %s2753_s6  ;;  %538 = vst [vmem:[#allocation1] ss:$2 sm:$0xff] %v2938_v47  ;;  %s2973_s6 = sld [smem:[#allocation7 + $0x20]] }
  0xb9   : > { %503 = vrot.lane.b32.xlu2 %v498_v53, %s2752_s26  ;;  %s2969_s26 = sld [smem:[#allocation7 + $0x21]] }
  0xbe   : > { %v707_v33 = vstv %s2973_s6  ;;  %s3204_s6 = sld [smem:[#allocation7 + $0x60]] }
  0xbf   : > { %v540_v57 = vld.sshfl [vmem:[#allocation1 + $0x8] sm:$0xff pattern:$0x75316420]  ;;  %v539_v58 = vld.sshfl [vmem:[#allocation1] sm:$0xff pattern:$0x75316420]  ;;  %v713_v24 = vstv %s2969_s26 }
  0xc0   : > { %545 = vrot.lane.b32.xlu0 %v540_v57, %s2755_s10  ;;  %559 = vst [vmem:[#allocation1] ss:$2 sm:$0xff] %v2938_v47  ;;  %s3195_s26 = sld [smem:[#allocation7 + $0x61]] }
  0xc1   : > { %543 = vrot.lane.b32.xlu2 %v539_v58, %s2755_s10  ;;  %s2975_s10 = sld [smem:[#allocation7 + $0x22]] }
  0xc7   : > { %v560_v59 = vld.sshfl [vmem:[#allocation1] sm:$0xff pattern:$0x75316420]  ;;  %v561_v60 = vld.sshfl [vmem:[#allocation1 + $0x8] sm:$0xff pattern:$0x75316420]  ;;  %v725_v34 = vstv %s2975_s10 }
  0xc8   : > { %564 = vrot.lane.b32.xlu1 %v560_v59, %s2756_s14  ;;  %580 = vst [vmem:[#allocation1] ss:$2 sm:$0xff] %v2938_v47  ;;  %s3215_s10 = sld [smem:[#allocation7 + $0x62]] }
  0xc9   : > { %566 = vrot.lane.b32.xlu2 %v561_v60, %s2756_s14  ;;  %s2978_s14 = sld [smem:[#allocation7 + $0x23]] }
  0xcf   : > { %v582_v61 = vld.sshfl [vmem:[#allocation1 + $0x8] sm:$0xff pattern:$0x75316420]  ;;  %v581_v62 = vld.sshfl [vmem:[#allocation1] sm:$0xff pattern:$0x75316420]  ;;  %v737_v38 = vstv %s2978_s14 }
  0xd0   : > { %587 = vrot.lane.b32.xlu1 %v582_v61, %s2757_s21  ;;  %585 = vrot.lane.b32.xlu0 %v581_v62, %s2757_s21  ;;  %601 = vst [vmem:[#allocation1] ss:$2 sm:$0xff] %v2938_v47  ;;  %s2995_s21 = sld [smem:[#allocation7 + $0x30]] }
  0xd1   : > { %s3223_s14 = sld [smem:[#allocation7 + $0x63]] }
  0xd6   : > { %v749_v61 = vstv %s2995_s21  ;;  %s3251_s21 = sld [smem:[#allocation7 + $0x70]] }
  0xd7   : > { %v603_v0 = vld.sshfl [vmem:[#allocation1 + $0x8] sm:$0xff pattern:$0x75316420]  ;;  %v602_v1 = vld.sshfl [vmem:[#allocation1] sm:$0xff pattern:$0x75316420]  ;;  %v903_v26 = vstv %s3223_s14 }
  0xd8   : > { %608 = vrot.lane.b32.xlu0 %v603_v0, %s2758_s11  ;;  %2156 = vperm.xlu1 %2577, %v2153_v63   ;;  %s3397_s14 = sld [smem:[#allocation7 + $0x24]] }
  0xd9   : > { %606 = vrot.lane.b32.xlu2 %v602_v1, %s2758_s11  ;;  %s3054_s11 = sld [smem:[#allocation7 + $0x41]] }
 0x10a   : > { %v502_v2 = vpop.permute.xlu2 %501 }
 0x112   : > { %v459_v8 = vpop.permute.xlu0 %458 }
 0x113   : > { %v504_v12 = vpop.permute.xlu2 %503 }
 0x114   : > { %v506_v14 = vsel %vm505_vm0, %v502_v2, %v504_v12  ;;  %v507_v15 = vsel %vm505_vm0, %v504_v12, %v502_v2 }
 0x115   : > { %v2985_v18 = vmul.f32 %v511_v7, %v507_v15  ;;  %v2988_v20 = vmul.f32 %v512_v10, %v506_v14  ;;  %v755_v10 = vstv %s3010_s22  ;;  %s3261_s22 = sld [smem:[#allocation7 + $0x5]] }
 0x117   : > { %v3015_v37 = vmul.f32 %v713_v24, %v2985_v18  ;;  %v3024_v44 = vmul.f32 %v713_v24, %v2988_v20  ;;  %v3032_v49 = vmul.f32 %v707_v33, %v2985_v18  ;;  %v3039_v52 = vmul.f32 %v707_v33, %v2988_v20 }
 0x118   : > { %v3042_v53 = vmul.f32 %v725_v34, %v2985_v18  ;;  %v3046_v55 = vmul.f32 %v725_v34, %v2988_v20  ;;  %v3049_v56 = vmul.f32 %v737_v38, %v2985_v18  ;;  %v3052_v57 = vmul.f32 %v737_v38, %v2988_v20 }
 0x119   : > { %v718_v54 = vrot.slane %v3015_v37, 1  ;;  %v719_v60 = vrot.slane %v3024_v44, 1 }
 0x11a   : > { %v461_v39 = vpop.permute.xlu0 %460  ;;  %v481_v40 = vpop.permute.xlu1 %480  ;;  %v730_v7 = vrot.slane %v3042_v53, 2 }
 0x11b   : > { %v465_v45 = vsel %vm464_vm1, %v459_v8, %v461_v39  ;;  %v466_v46 = vsel %vm464_vm1, %v461_v39, %v459_v8  ;;  %v731_v8 = vrot.slane %v3046_v55, 2 }
 0x11c   : > { %v3034_v50 = vmul.f32 %v469_v11, %v466_v46  ;;  %v3036_v51 = vmul.f32 %v470_v13, %v465_v45  ;;  %v791_v11 = vstv %s3018_s8  ;;  %v742_v45 = vrot.slane %v3049_v56, 3  ;;  %s3271_s8 = sld [smem:[#allocation7 + $0x6]] }
 0x11d   : > { %v3092_v46 = vmul.f32 %v791_v11, %v2938_v47 }
 0x11e   : > { %v630_v58 = vmul.f32 %v629_v22, %v3034_v50  ;;  %v631_v59 = vmul.f32 %v629_v22, %v3036_v51  ;;  %v642_v62 = vmul.f32 %v641_v23, %v3034_v50  ;;  %v643_v63 = vmul.f32 %v641_v23, %v3036_v51 }
 0x11f   : > { %v654_v0 = vmul.f32 %v653_v27, %v3034_v50  ;;  %v655_v1 = vmul.f32 %v653_v27, %v3036_v51  ;;  %v624_v2 = vmul.f32 %v623_v19, %v3034_v50  ;;  %v625_v3 = vmul.f32 %v623_v19, %v3036_v51 }
 0x120   : > { %v634_v4 = vrot.slane %v630_v58, 1  ;;  %v635_v6 = vrot.slane %v631_v59, 1  ;;  %v646_v15 = vrot.slane %v642_v62, 2  ;;  %v647_v22 = vrot.slane %v643_v63, 2 }
 0x121   : > { %v658_v24 = vrot.slane %v654_v0, 3  ;;  %v659_v27 = vrot.slane %v655_v1, 3  ;;  %v801_v58 = vstv %s3054_s11  ;;  %v3103_v62 = vld [vmem:[#allocation8 + $0x7] ss:$8 sm:$0x3]  ;;  %s3279_s11 = sld [smem:[#allocation7 + $0x71]] }
 0x122   : > { %v483_v12 = vpop.permute.xlu1 %482  ;;  %v638_v13 = vadd.f32 %v634_v4, %v624_v2  ;;  %v639_v14 = vadd.f32 %v635_v6, %v625_v3  ;;  %v767_v4 = vstv %s3064_s5  ;;  %v779_v6 = vstv %s3069_s13  ;;  %s3285_s5 = sld [smem:[#allocation7 + $0x72]] }
 0x123   : > { %v485_v19 = vsel %vm484_vm2, %v481_v40, %v483_v12  ;;  %v486_v23 = vsel %vm484_vm2, %v483_v12, %v481_v40  ;;  %v743_v40 = vrot.slane %v3052_v57, 3  ;;  %s3295_s13 = sld [smem:[#allocation7 + $0x7]] }
 0x124   : > { %v3083_v33 = vmul.f32 %v490_v16, %v486_v23  ;;  %v3087_v34 = vmul.f32 %v491_v17, %v485_v19  ;;  %v650_v38 = vadd.f32 %v646_v15, %v638_v13  ;;  %v651_v39 = vadd.f32 %v647_v22, %v639_v14 }
 0x125   : > { %v794_v13 = vperm.slane %v3092_v46, 0  ;;  %v811_v14 = vstv %s3075_s9  ;;  %v595_v22 = vperm.slane %v3103_v62, 0  ;;  %v3130_v23 = vmul.f32 %v801_v58, %v2938_v47  ;;  %s3311_s9 = sld [smem:[#allocation7 + $0x73]] }
 0x126   : > { %v662_v16 = vadd.f32 %v658_v24, %v650_v38  ;;  %v663_v9 = vadd.f32 %v659_v27, %v651_v39  ;;  %v666_v17 = vmul.f32 %v665_v28, %v3083_v33  ;;  %v667_v59 = vmul.f32 %v665_v28, %v3087_v34 }
 0x127   : > { %v672_v63 = vmul.f32 %v671_v29, %v3083_v33  ;;  %v673_v0 = vmul.f32 %v671_v29, %v3087_v34  ;;  %v684_v1 = vmul.f32 %v683_v31, %v3083_v33  ;;  %v685_v2 = vmul.f32 %v683_v31, %v3087_v34 }
 0x128   : > { %v668_v3 = vadd.f32 %v666_v17, %v662_v16  ;;  %v669_v28 = vadd.f32 %v667_v59, %v663_v9  ;;  %v696_v19 = vmul.f32 %v695_v32, %v3083_v33  ;;  %v697_v31 = vmul.f32 %v695_v32, %v3087_v34  ;;  %v3140_v9 = vld [vmem:[#allocation8 + $0x10] ss:$8 sm:$0x3] }
 0x129   : > { %v676_v11 = vrot.slane %v672_v63, 1  ;;  %v677_v12 = vrot.slane %v673_v0, 1  ;;  %v688_v38 = vrot.slane %v684_v1, 2  ;;  %v689_v39 = vrot.slane %v685_v2, 2 }
 0x12a   : > { %v525_v15 = vpop.permute.xlu1 %524  ;;  %v523_v29 = vpop.permute.xlu0 %522  ;;  %v3143_v32 = vmul.f32 %v811_v14, %v2938_v47  ;;  %v596_v63 = vperm.slane %v3103_v62, 1  ;;  %v795_v0 = vperm.slane %v3092_v46, 4  ;;  %v821_v1 = vstv %s3095_s12  ;;  %s3319_s12 = sld [smem:[#allocation7 + $0x80]] }
 0x12b   : > { %v527_v24 = vsel %vm526_vm3, %v523_v29, %v525_v15  ;;  %v528_v27 = vsel %vm526_vm3, %v525_v15, %v523_v29  ;;  %v680_v17 = vadd.f32 %v676_v11, %v668_v3  ;;  %v681_v59 = vadd.f32 %v677_v12, %v669_v28 }
 0x12c   : > { %v3138_v16 = vmul.f32 %v532_v35, %v528_v27  ;;  %v3147_v58 = vmul.f32 %v533_v36, %v527_v24  ;;  %v544_v35 = vpop.permute.xlu2 %543  ;;  %v700_v28 = vrot.slane %v696_v19, 3  ;;  %v701_v11 = vrot.slane %v697_v31, 3 }
 0x12d   : > { %v692_v2 = vadd.f32 %v688_v38, %v680_v17  ;;  %v693_v3 = vadd.f32 %v689_v39, %v681_v59  ;;  %v616_v21 = vperm.slane %v3140_v9, 0  ;;  %v804_v12 = vperm.slane %v3130_v23, 1 }
 0x12e   : > { %v805_v14 = vperm.slane %v3130_v23, 5  ;;  %v756_v19 = vmul.f32 %v755_v10, %v3138_v16  ;;  %v814_v31 = vperm.slane %v3143_v32, 2  ;;  %v750_v24 = vmul.f32 %v749_v61, %v3138_v16 }
 0x12f   : > { %v704_v15 = vadd.f32 %v700_v28, %v692_v2  ;;  %v705_v29 = vadd.f32 %v701_v11, %v693_v3  ;;  %v757_v27 = vmul.f32 %v755_v10, %v3147_v58  ;;  %v3174_v38 = vmul.f32 %v767_v4, %v3138_v16 }
 0x130   : > { %v815_v39 = vperm.slane %v3143_v32, 6  ;;  %v751_v3 = vmul.f32 %v749_v61, %v3147_v58  ;;  %v769_v28 = vmul.f32 %v767_v4, %v3147_v58  ;;  %v3190_v36 = vmul.f32 %v779_v6, %v3138_v16 }
 0x131   : > { %v710_v59 = vadd.f32 %v3032_v49, %v704_v15  ;;  %v711_v2 = vadd.f32 %v3039_v52, %v705_v29  ;;  %v3193_v49 = vmul.f32 %v779_v6, %v3147_v58  ;;  %v760_v4 = vrot.slane %v756_v19, 1 }
 0x132   : > { %v546_v17 = vpop.permute.xlu0 %545  ;;  %v761_v37 = vrot.slane %v757_v27, 1  ;;  %v837_v29 = vstv %s3154_s7  ;;  %v784_v25 = vrot.slane %v3190_v36, 3  ;;  %v849_v19 = vstv %s3160_s1  ;;  %s3338_s7 = sld [smem:[#allocation7 + $0x82]] }
 0x133   : > { %v548_v10 = vsel %vm547_vm4, %v544_v35, %v546_v17  ;;  %v549_v11 = vsel %vm547_vm4, %v546_v17, %v544_v35  ;;  %v722_v52 = vadd.f32 %v718_v54, %v710_v59  ;;  %v723_v61 = vadd.f32 %v719_v60, %v711_v2  ;;  %s3345_s1 = sld [smem:[#allocation7 + $0x14]] }
 0x134   : > { %v3202_v35 = vmul.f32 %v821_v1, %v2938_v47  ;;  %v3208_v15 = vmul.f32 %v553_v41, %v548_v10  ;;  %v3212_v6 = vmul.f32 %v554_v42, %v549_v11  ;;  %v772_v54 = vrot.slane %v3174_v38, 2  ;;  %v567_v27 = vpop.permute.xlu2 %566 }
 0x135   : > { %v734_v44 = vadd.f32 %v730_v7, %v722_v52  ;;  %v735_v60 = vadd.f32 %v731_v8, %v723_v61  ;;  %v831_v1 = vstv %s3152_s30  ;;  %v773_v41 = vrot.slane %v769_v28, 2  ;;  %s3329_s30 = sld [smem:[#allocation7 + $0x81]] }
 0x136   : > { %v785_v42 = vrot.slane %v3193_v49, 3  ;;  %v824_v55 = vperm.slane %v3202_v35, 3  ;;  %v825_v7 = vperm.slane %v3202_v35, 7  ;;  %v3236_v8 = vmul.f32 %v831_v1, %v3208_v15 }
 0x137   : > { %v746_v38 = vadd.f32 %v742_v45, %v734_v44  ;;  %v747_v53 = vadd.f32 %v743_v40, %v735_v60  ;;  %v3239_v36 = vmul.f32 %v831_v1, %v3212_v6  ;;  %v3242_v17 = vmul.f32 %v837_v29, %v3208_v15 }
 0x138   : > { %v3245_v56 = vmul.f32 %v837_v29, %v3212_v6  ;;  %v3248_v59 = vmul.f32 %v849_v19, %v3208_v15  ;;  %v861_v2 = vstv %s3183_s24  ;;  %v3258_v11 = vmul.f32 %v849_v19, %v3212_v6  ;;  %s3353_s24 = sld [smem:[#allocation7 + $0x15]] }
 0x139   : > { %v752_v45 = vadd.f32 %v750_v24, %v746_v38  ;;  %v753_v40 = vadd.f32 %v751_v3, %v747_v53  ;;  %v879_v24 = vstv %s3195_s26  ;;  %v842_v44 = vrot.slane %v3242_v17, 1  ;;  %s3369_s26 = sld [smem:[#allocation7 + $0x16]] }
 0x13a   : > { %v565_v57 = vpop.permute.xlu1 %564  ;;  %v3275_v60 = vmul.f32 %v861_v2, %v3208_v15  ;;  %v873_v1 = vstv %s3204_s6  ;;  %v891_v29 = vstv %s3215_s10  ;;  %v855_v53 = vrot.slane %v3258_v11, 2  ;;  %s3378_s6 = sld [smem:[#allocation7 + $0x17]] }
 0x13b   : > { %v569_v28 = vsel %vm568_vm5, %v565_v57, %v567_v27  ;;  %v570_v10 = vsel %vm568_vm5, %v567_v27, %v565_v57  ;;  %v764_v52 = vadd.f32 %v760_v4, %v752_v45  ;;  %v765_v61 = vadd.f32 %v761_v37, %v753_v40  ;;  %s3381_s10 = sld [smem:[#allocation7 + $0x83]] }
 0x13c   : > { %v3265_v3 = vmul.f32 %v574_v43, %v569_v28  ;;  %v3269_v49 = vmul.f32 %v575_v48, %v570_v10  ;;  %v3282_v27 = vmul.f32 %v861_v2, %v3212_v6  ;;  %v843_v48 = vrot.slane %v3245_v56, 1 }
 0x13d   : > { %v776_v19 = vadd.f32 %v772_v54, %v764_v52  ;;  %v777_v43 = vadd.f32 %v773_v41, %v765_v61  ;;  %v854_v4 = vrot.slane %v3248_v59, 2  ;;  %v866_v45 = vrot.slane %v3275_v60, 3 }
 0x13e   : > { %v3290_v37 = vmul.f32 %v879_v24, %v3265_v3  ;;  %v3293_v38 = vmul.f32 %v879_v24, %v3269_v49  ;;  %v3299_v57 = vmul.f32 %v891_v29, %v3265_v3  ;;  %v3303_v40 = vmul.f32 %v891_v29, %v3269_v49 }
 0x13f   : > { %v788_v54 = vadd.f32 %v784_v25, %v776_v19  ;;  %v789_v41 = vadd.f32 %v785_v42, %v777_v43  ;;  %v3306_v2 = vmul.f32 %v903_v26, %v3265_v3  ;;  %v3309_v28 = vmul.f32 %v903_v26, %v3269_v49 }
 0x140   : > { %v867_v52 = vrot.slane %v3282_v27, 3  ;;  %v3322_v29 = vmul.f32 %v873_v1, %v3265_v3  ;;  %v3325_v19 = vmul.f32 %v873_v1, %v3269_v49  ;;  %v884_v43 = vrot.slane %v3290_v37, 1 }
 0x141   : > { %v798_v10 = vadd.f32 %v794_v13, %v788_v54  ;;  %v799_v24 = vadd.f32 %v795_v0, %v789_v41  ;;  %v896_v1 = vrot.slane %v3299_v57, 2  ;;  %v1029_v13 = vstv %s3295_s13  ;;  %s3417_s13 = sld [smem:[#allocation7 + $0x34]] }
 0x142   : > { %v588_v25 = vpop.permute.xlu1 %587  ;;  %v586_v42 = vpop.permute.xlu0 %585  ;;  %v1031_v62 = vmul.f32 %v1029_v13, %v3036_v51  ;;  %v1041_v61 = vstv %s3345_s1  ;;  %v1047_v41 = vstv %s3353_s24  ;;  %v987_v56 = vstv %s3381_s10  ;;  %s3422_s1 = sld [smem:[#allocation7 + $0x35]] }
 0x143   : > { %v590_v46 = vsel %vm589_vm6, %v586_v42, %v588_v25  ;;  %v808_v0 = vadd.f32 %v804_v12, %v798_v10  ;;  %v809_v26 = vadd.f32 %v805_v14, %v799_v24  ;;  %v591_v54 = vsel %vm589_vm6, %v588_v25, %v586_v42  ;;  %s3440_s24 = sld [smem:[#allocation7 + $0x36]] }
 0x144   : > { %v3357_v25 = vmul.f32 %v595_v22, %v590_v46  ;;  %v1005_v42 = vstv %s3261_s22  ;;  %v1017_v24 = vstv %s3271_s8  ;;  %v3373_v46 = vmul.f32 %v596_v63, %v591_v54  ;;  %s3405_s22 = sld [smem:[#allocation7 + $0x26]] }
 0x145   : > { %v818_v23 = vadd.f32 %v814_v31, %v808_v0  ;;  %v819_v12 = vadd.f32 %v815_v39, %v809_v26  ;;  %v1006_v39 = vmul.f32 %v1005_v42, %v3034_v50  ;;  %v1007_v22 = vmul.f32 %v1005_v42, %v3036_v51  ;;  %s3413_s8 = sld [smem:[#allocation7 + $0x27]] }
 0x146   : > { %v1018_v0 = vmul.f32 %v1017_v24, %v3034_v50  ;;  %v1019_v35 = vmul.f32 %v1017_v24, %v3036_v51  ;;  %v1001_v42 = vmul.f32 %v999_v30, %v3036_v51  ;;  %v1035_v63 = vrot.slane %v1031_v62, 3 }
 0x147   : > { %v828_v31 = vadd.f32 %v824_v55, %v818_v23  ;;  %v829_v32 = vadd.f32 %v825_v7, %v819_v12  ;;  %v1030_v55 = vmul.f32 %v1029_v13, %v3034_v50  ;;  %v1010_v26 = vrot.slane %v1006_v39, 1 }
 0x148   : > { %v1011_v23 = vrot.slane %v1007_v22, 1  ;;  %v1000_v12 = vmul.f32 %v999_v30, %v3034_v50  ;;  %v975_v39 = vstv %s3338_s7  ;;  %v1022_v13 = vrot.slane %v1018_v0, 2 }
 0x149   : > { %v834_v7 = vadd.f32 %v3236_v8, %v828_v31  ;;  %v835_v24 = vadd.f32 %v3239_v36, %v829_v32  ;;  %v963_v31 = vstv %s3329_s30  ;;  %v1023_v14 = vrot.slane %v1019_v35, 2  ;;  %v607_v36 = vpop.permute.xlu2 %606 }
 0x14a   : > { %v1014_v22 = vadd.f32 %v1010_v26, %v1000_v12  ;;  %v1015_v10 = vadd.f32 %v1011_v23, %v1001_v42  ;;  %v1034_v54 = vrot.slane %v1030_v55, 3  ;;  %v609_v30 = vpop.permute.xlu0 %608  ;;  %v1042_v32 = vmul.f32 %v1041_v61, %v3083_v33 }
 0x14b   : > { %v846_v8 = vadd.f32 %v842_v44, %v834_v7  ;;  %v1043_v0 = vmul.f32 %v1041_v61, %v3087_v34  ;;  %v847_v35 = vadd.f32 %v843_v48, %v835_v24  ;;  %v1048_v7 = vmul.f32 %v1047_v41, %v3083_v33 }
 0x14c   : > { %v1026_v17 = vadd.f32 %v1022_v13, %v1014_v22  ;;  %v1027_v44 = vadd.f32 %v1023_v14, %v1015_v10  ;;  %v1049_v26 = vmul.f32 %v1047_v41, %v3087_v34  ;;  %v1059_v10 = vstv %s3369_s26  ;;  %s3447_s26 = sld [smem:[#allocation7 + $0x37]] }
 0x14d   : > { %v858_v55 = vadd.f32 %v854_v4, %v846_v8  ;;  %v1071_v62 = vstv %s3378_s6  ;;  %v611_v61 = vsel %vm610_vm7, %v607_v36, %v609_v30  ;;  %v1052_v48 = vrot.slane %v1048_v7, 1  ;;  %s3455_s6 = sld [smem:[#allocation7 + $0x44]] }
 0x14e   : > { %v1038_v23 = vadd.f32 %v1034_v54, %v1026_v17  ;;  %v1039_v14 = vadd.f32 %v1035_v63, %v1027_v44  ;;  %v1053_v12 = vrot.slane %v1049_v26, 1  ;;  %v1060_v41 = vmul.f32 %v1059_v10, %v3083_v33 }
 0x14f   : > { %v1061_v54 = vmul.f32 %v1059_v10, %v3087_v34  ;;  %v859_v63 = vadd.f32 %v855_v53, %v847_v35  ;;  %v870_v42 = vadd.f32 %v866_v45, %v858_v55  ;;  %v1072_v24 = vmul.f32 %v1071_v62, %v3083_v33 }
 0x150   : > { %v1044_v59 = vadd.f32 %v1042_v32, %v1038_v23  ;;  %v1045_v4 = vadd.f32 %v1043_v0, %v1039_v14  ;;  %v1073_v8 = vmul.f32 %v1071_v62, %v3087_v34  ;;  %v1064_v17 = vrot.slane %v1060_v41, 2 }
 0x151   : > { %v1065_v44 = vrot.slane %v1061_v54, 2  ;;  %v612_v32 = vsel %vm610_vm7, %v609_v30, %v607_v36  ;;  %v3436_v0 = vmul.f32 %v616_v21, %v611_v61  ;;  %v1076_v11 = vrot.slane %v1072_v24, 3 }
 0x152   : > { %v1056_v22 = vadd.f32 %v1052_v48, %v1044_v59  ;;  %v1057_v13 = vadd.f32 %v1053_v12, %v1045_v4  ;;  %v1077_v53 = vrot.slane %v1073_v8, 3  ;;  %v1083_v35 = vstv %s3397_s14  ;;  %s3457_s14 = sld [smem:[#allocation7 + $0x45]] }
 0x153   : > { %v1089_v55 = vstv %s3401_s23  ;;  %v871_v5 = vadd.f32 %v867_v52, %v859_v63  ;;  %v876_v30 = vadd.f32 %v3322_v29, %v870_v42  ;;  %v1084_v21 = vmul.f32 %v1083_v35, %v2985_v18  ;;  %s3466_s23 = sld [smem:[#allocation7 + $0x46]] }
 0x154   : > { %v1068_v60 = vadd.f32 %v1064_v17, %v1056_v22  ;;  %v1069_v45 = vadd.f32 %v1065_v44, %v1057_v13  ;;  %v1085_v36 = vmul.f32 %v1083_v35, %v2988_v20  ;;  %v1090_v23 = vmul.f32 %v1089_v55, %v2985_v18 }
 0x155   : > { %v1091_v14 = vmul.f32 %v1089_v55, %v2988_v20  ;;  %v1101_v10 = vstv %s3405_s22  ;;  %v1113_v62 = vstv %s3413_s8  ;;  %v1125_v61 = vstv %s3417_s13  ;;  %s3470_s22 = sld [smem:[#allocation7 + $0x47]] }
 0x156   : > { %v1080_v7 = vadd.f32 %v1076_v11, %v1068_v60  ;;  %v1081_v26 = vadd.f32 %v1077_v53, %v1069_v45  ;;  %v1131_v48 = vstv %s3422_s1  ;;  %v1094_v29 = vrot.slane %v1090_v23, 1  ;;  %s3475_s8 = sld [smem:[#allocation7 + $0x55]] }
 0x157   : > { %v1095_v12 = vrot.slane %v1091_v14, 1  ;;  %v1102_v59 = vmul.f32 %v1101_v10, %v2985_v18  ;;  %v1103_v4 = vmul.f32 %v1101_v10, %v2988_v20  ;;  %v1114_v41 = vmul.f32 %v1113_v62, %v2985_v18  ;;  %s3486_s13 = sld [smem:[#allocation7 + $0x54]] }
 0x158   : > { %v1086_v27 = vadd.f32 %v1084_v21, %v1080_v7  ;;  %v1087_v52 = vadd.f32 %v1085_v36, %v1081_v26  ;;  %v1115_v54 = vmul.f32 %v1113_v62, %v2988_v20  ;;  %v877_v63 = vadd.f32 %v3325_v19, %v871_v5  ;;  %s3492_s1 = sld [smem:[#allocation7 + $0x56]] }
 0x159   : > { %v888_v42 = vadd.f32 %v884_v43, %v876_v30  ;;  %v1106_v22 = vrot.slane %v1102_v59, 2  ;;  %v1107_v13 = vrot.slane %v1103_v4, 2  ;;  %v1126_v17 = vmul.f32 %v1125_v61, %v3138_v16 }
 0x15a   : > { %v1098_v24 = vadd.f32 %v1094_v29, %v1086_v27  ;;  %v1099_v8 = vadd.f32 %v1095_v12, %v1087_v52  ;;  %v1127_v44 = vmul.f32 %v1125_v61, %v3147_v58  ;;  %v1118_v11 = vrot.slane %v1114_v41, 3 }
 0x15b   : > { %v1132_v53 = vmul.f32 %v1131_v48, %v3138_v16  ;;  %v1133_v19 = vmul.f32 %v1131_v48, %v3147_v58  ;;  %v1143_v37 = vstv %s3440_s24  ;;  %v1119_v45 = vrot.slane %v1115_v54, 3  ;;  %s3497_s24 = sld [smem:[#allocation7 + $0x57]] }
 0x15c   : > { %v1110_v43 = vadd.f32 %v1106_v22, %v1098_v24  ;;  %v1111_v60 = vadd.f32 %v1107_v13, %v1099_v8  ;;  %v1155_v35 = vstv %s3447_s26  ;;  %v4311_v55 = vperm.slane %v3140_v9, 1  ;;  %s3502_s26 = sld [smem:[#allocation7 + $0x64]] }
 0x15d   : > { %v4312_v30 = vrot.slane %v3293_v38, 1  ;;  %v1144_v36 = vmul.f32 %v1143_v37, %v3138_v16  ;;  %v1145_v7 = vmul.f32 %v1143_v37, %v3147_v58  ;;  %v1136_v14 = vrot.slane %v1132_v53, 1 }
 0x15e   : > { %v3480_v5 = vmul.f32 %v4311_v55, %v612_v32  ;;  %v1122_v26 = vadd.f32 %v1118_v11, %v1110_v43  ;;  %v1123_v23 = vadd.f32 %v1119_v45, %v1111_v60  ;;  %v1137_v10 = vrot.slane %v1133_v19, 1 }
 0x15f   : > { %v889_v21 = vadd.f32 %v4312_v30, %v877_v63  ;;  %v1156_v62 = vmul.f32 %v1155_v35, %v3138_v16  ;;  %v1157_v9 = vmul.f32 %v1155_v35, %v3147_v58  ;;  %v1167_v32 = vstv %s3455_s6  ;;  %s3506_s6 = sld [smem:[#allocation7 + $0x65]] }
 0x160   : > { %v1177_v61 = vstv %s3457_s14  ;;  %v900_v38 = vadd.f32 %v896_v1, %v888_v42  ;;  %v1128_v48 = vadd.f32 %v1126_v17, %v1122_v26  ;;  %v1129_v27 = vadd.f32 %v1127_v44, %v1123_v23  ;;  %s3510_s14 = sld [smem:[#allocation7 + $0x8]] }
 0x161   : > { %v1168_v52 = vmul.f32 %v1167_v32, %v2938_v47  ;;  %v4313_v29 = vrot.slane %v3303_v40, 2  ;;  %v1148_v59 = vrot.slane %v1144_v36, 2  ;;  %v1149_v4 = vrot.slane %v1145_v7, 2 }
 0x162   : > { %v1187_v41 = vstv %s3466_s23  ;;  %v1140_v54 = vadd.f32 %v1136_v14, %v1128_v48  ;;  %v1141_v63 = vadd.f32 %v1137_v10, %v1129_v27  ;;  %v1178_v57 = vmul.f32 %v1177_v61, %v2938_v47  ;;  %s3522_s23 = sld [smem:[#allocation7 + $0x66]] }
 0x163   : > { %v901_v12 = vadd.f32 %v4313_v29, %v889_v21  ;;  %v1197_v1 = vstv %s3470_s22  ;;  %v1160_v42 = vrot.slane %v1156_v62, 3  ;;  %v1161_v24 = vrot.slane %v1157_v9, 3  ;;  %s3524_s22 = sld [smem:[#allocation7 + $0x9]] }
 0x164   : > { %v1188_v8 = vmul.f32 %v1187_v41, %v2938_v47  ;;  %v1213_v22 = vstv %s3475_s8  ;;  %v1152_v40 = vadd.f32 %v1148_v59, %v1140_v54  ;;  %v1153_v13 = vadd.f32 %v1149_v4, %v1141_v63  ;;  %s3528_s8 = sld [smem:[#allocation7 + $0x67]] }
 0x165   : > { %v1170_v17 = vperm.slane %v1168_v52, 0  ;;  %v1171_v44 = vperm.slane %v1168_v52, 4  ;;  %v4314_v11 = vrot.slane %v3306_v2, 3  ;;  %v4315_v19 = vrot.slane %v3309_v28, 3 }
 0x166   : > { %v1198_v43 = vmul.f32 %v1197_v1, %v2938_v47  ;;  %v1207_v60 = vstv %s3486_s13  ;;  %v1164_v45 = vadd.f32 %v1160_v42, %v1152_v40  ;;  %v1165_v35 = vadd.f32 %v1161_v24, %v1153_v13  ;;  %s3532_s13 = sld [smem:[#allocation7 + $0x74]] }
 0x167   : > { %v3514_v53 = vadd.f32 %v4314_v11, %v900_v38  ;;  %v3518_v37 = vadd.f32 %v4315_v19, %v901_v12  ;;  %v1180_v55 = vperm.slane %v1178_v57, 1  ;;  %v1181_v30 = vperm.slane %v1178_v57, 5 }
 0x168   : > { %v1190_v2 = vperm.slane %v1188_v8, 2  ;;  %v1191_v21 = vperm.slane %v1188_v8, 6  ;;  %v1214_v36 = vmul.f32 %v1213_v22, %v3208_v15  ;;  %v1225_v28 = vstv %s3492_s1  ;;  %s3540_s1 = sld [smem:[#allocation7 + $0x76]] }
 0x169   : > { %v1174_v7 = vadd.f32 %v1170_v17, %v1164_v45  ;;  %v1175_v26 = vadd.f32 %v1171_v44, %v1165_v35  ;;  %v1215_v23 = vmul.f32 %v1213_v22, %v3212_v6  ;;  %v1237_v14 = vstv %s3497_s24  ;;  %s3546_s24 = sld [smem:[#allocation7 + $0x77]] }
 0x16a   : > { %v1200_v10 = vperm.slane %v1198_v43, 3  ;;  %v1201_v62 = vperm.slane %v1198_v43, 7  ;;  %v1208_v9 = vmul.f32 %v1207_v60, %v3208_v15  ;;  %v1249_v32 = vstv %s3502_s26  ;;  %s3548_s26 = sld [smem:[#allocation7 + $0xa]] }
 0x16b   : > { %v1184_v61 = vadd.f32 %v1180_v55, %v1174_v7  ;;  %v1185_v38 = vadd.f32 %v1181_v30, %v1175_v26  ;;  %v1226_v48 = vmul.f32 %v1225_v28, %v3208_v15  ;;  %v1255_v27 = vstv %s3506_s6  ;;  %s3560_s6 = sld [smem:[#allocation7 + $0xb]] }
 0x16c   : > { %v1209_v52 = vmul.f32 %v1207_v60, %v3212_v6  ;;  %v1227_v29 = vmul.f32 %v1225_v28, %v3212_v6  ;;  %v1238_v12 = vmul.f32 %v1237_v14, %v3208_v15  ;;  %v1239_v59 = vmul.f32 %v1237_v14, %v3212_v6 }
 0x16d   : > { %v1194_v4 = vadd.f32 %v1190_v2, %v1184_v61  ;;  %v1195_v41 = vadd.f32 %v1191_v21, %v1185_v38  ;;  %v1218_v54 = vrot.slane %v1214_v36, 1  ;;  %v1219_v63 = vrot.slane %v1215_v23, 1 }
 0x16e   : > { %v3551_v57 = vmul.f32 %v1249_v32, %v3265_v3  ;;  %v3554_v1 = vmul.f32 %v1255_v27, %v3265_v3  ;;  %v3557_v42 = vmul.f32 %v1255_v27, %v3269_v49  ;;  %v1267_v24 = vstv %s3522_s23  ;;  %s3572_s23 = sld [smem:[#allocation7 + $0x18]] }
 0x16f   : > { %v1204_v8 = vadd.f32 %v1200_v10, %v1194_v4  ;;  %v1205_v22 = vadd.f32 %v1201_v62, %v1195_v41  ;;  %v1230_v40 = vrot.slane %v1226_v48, 2  ;;  %v3563_v13 = vmul.f32 %v1249_v32, %v3269_v49 }
 0x170   : > { %v1231_v17 = vrot.slane %v1227_v29, 2  ;;  %v1242_v44 = vrot.slane %v1238_v12, 3  ;;  %v1243_v11 = vrot.slane %v1239_v59, 3  ;;  %v1279_v19 = vstv %s3528_s8  ;;  %s3578_s8 = sld [smem:[#allocation7 + $0x19]] }
 0x171   : > { %v1210_v43 = vadd.f32 %v1208_v9, %v1204_v8  ;;  %v1211_v60 = vadd.f32 %v1209_v52, %v1205_v22  ;;  %v3567_v45 = vmul.f32 %v1267_v24, %v3265_v3  ;;  %v3570_v35 = vmul.f32 %v1267_v24, %v3269_v49 }
 0x172   : > { %v1260_v55 = vrot.slane %v3554_v1, 1  ;;  %v1261_v30 = vrot.slane %v3557_v42, 1  ;;  %v1291_v2 = vstv %s3532_s13  ;;  %v3581_v7 = vmul.f32 %v1279_v19, %v3265_v3 }
 0x173   : > { %v1222_v36 = vadd.f32 %v1218_v54, %v1210_v43  ;;  %v1223_v28 = vadd.f32 %v1219_v63, %v1211_v60  ;;  %v3584_v26 = vmul.f32 %v1279_v19, %v3269_v49  ;;  %v1375_v10 = vstv %s3510_s14  ;;  %s3610_s14 = sld [smem:[#allocation7 + $0x28]] }
 0x174   : > { %v1381_v62 = vstv %s3524_s22  ;;  %v1272_v61 = vrot.slane %v3567_v45, 2  ;;  %v1273_v38 = vrot.slane %v3570_v35, 2  ;;  %v1393_v52 = vstv %s3548_s26  ;;  %s3614_s22 = sld [smem:[#allocation7 + $0x29]] }
 0x175   : > { %v1234_v9 = vadd.f32 %v1230_v40, %v1222_v36  ;;  %v1235_v32 = vadd.f32 %v1231_v17, %v1223_v28  ;;  %v1382_v48 = vmul.f32 %v1381_v62, %v3034_v50  ;;  %v1383_v27 = vmul.f32 %v1381_v62, %v3036_v51  ;;  %s3618_s26 = sld [smem:[#allocation7 + $0x2a]] }
 0x176   : > { %v1405_v29 = vstv %s3560_s6  ;;  %v1376_v12 = vmul.f32 %v1375_v10, %v3034_v50  ;;  %v1377_v59 = vmul.f32 %v1375_v10, %v3036_v51  ;;  %v1394_v4 = vmul.f32 %v1393_v52, %v3034_v50  ;;  %s3622_s6 = sld [smem:[#allocation7 + $0x2b]] }
 0x177   : > { %v1395_v41 = vmul.f32 %v1393_v52, %v3036_v51  ;;  %v1386_v54 = vrot.slane %v1382_v48, 1  ;;  %v1387_v63 = vrot.slane %v1383_v27, 1  ;;  %v1406_v24 = vmul.f32 %v1405_v29, %v3034_v50 }
 0x178   : > { %v1407_v8 = vmul.f32 %v1405_v29, %v3036_v51  ;;  %v1246_v22 = vadd.f32 %v1242_v44, %v1234_v9  ;;  %v1247_v40 = vadd.f32 %v1243_v11, %v1235_v32  ;;  %v1284_v17 = vrot.slane %v3581_v7, 3 }
 0x179   : > { %v1285_v19 = vrot.slane %v3584_v26, 3  ;;  %v1390_v43 = vadd.f32 %v1386_v54, %v1376_v12  ;;  %v1391_v60 = vadd.f32 %v1387_v63, %v1377_v59  ;;  %v1398_v36 = vrot.slane %v1394_v4, 2 }
 0x17a   : > { %v1399_v28 = vrot.slane %v1395_v41, 2  ;;  %v1410_v10 = vrot.slane %v1406_v24, 3  ;;  %v1411_v62 = vrot.slane %v1407_v8, 3  ;;  %v1417_v48 = vstv %s3572_s23  ;;  %s3632_s23 = sld [smem:[#allocation7 + $0x39]] }
 0x17b   : > { %v1423_v27 = vstv %s3578_s8  ;;  %v1402_v44 = vadd.f32 %v1398_v36, %v1390_v43  ;;  %v1418_v9 = vmul.f32 %v1417_v48, %v3083_v33  ;;  %v1419_v32 = vmul.f32 %v1417_v48, %v3087_v34  ;;  %s3652_s8 = sld [smem:[#allocation7 + $0x48]] }
 0x17c   : > { %v1403_v11 = vadd.f32 %v1399_v28, %v1391_v60  ;;  %v1424_v12 = vmul.f32 %v1423_v27, %v3083_v33  ;;  %v1425_v59 = vmul.f32 %v1423_v27, %v3087_v34  ;;  %v1435_v54 = vstv %s3586_s2  ;;  %s3642_s2 = sld [smem:[#allocation7 + $0x3a]] }
 0x17d   : > { %v1414_v4 = vadd.f32 %v1410_v10, %v1402_v44  ;;  %v1447_v63 = vstv %s3602_s3  ;;  %v1252_v24 = vadd.f32 %v3551_v57, %v1246_v22  ;;  %v1253_v8 = vadd.f32 %v3563_v13, %v1247_v40  ;;  %s3648_s3 = sld [smem:[#allocation7 + $0x3b]] }
 0x17e   : > { %v1415_v41 = vadd.f32 %v1411_v62, %v1403_v11  ;;  %v1428_v43 = vrot.slane %v1424_v12, 1  ;;  %v1429_v60 = vrot.slane %v1425_v59, 1  ;;  %v1436_v48 = vmul.f32 %v1435_v54, %v3083_v33 }
 0x17f   : > { %v1420_v36 = vadd.f32 %v1418_v9, %v1414_v4  ;;  %v1437_v27 = vmul.f32 %v1435_v54, %v3087_v34  ;;  %v1448_v10 = vmul.f32 %v1447_v63, %v3083_v33  ;;  %v1449_v62 = vmul.f32 %v1447_v63, %v3087_v34 }
 0x180   : > { %v1421_v28 = vadd.f32 %v1419_v32, %v1415_v41  ;;  %v1459_v44 = vstv %s3610_s14  ;;  %v1465_v11 = vstv %s3614_s22  ;;  %v1440_v57 = vrot.slane %v1436_v48, 2  ;;  %s3658_s14 = sld [smem:[#allocation7 + $0x49]] }
 0x181   : > { %v1432_v29 = vadd.f32 %v1428_v43, %v1420_v36  ;;  %v1441_v13 = vrot.slane %v1437_v27, 2  ;;  %v1264_v22 = vadd.f32 %v1260_v55, %v1252_v24  ;;  %v1265_v40 = vadd.f32 %v1261_v30, %v1253_v8  ;;  %s3660_s22 = sld [smem:[#allocation7 + $0x86]] }
 0x182   : > { %v1433_v52 = vadd.f32 %v1429_v60, %v1421_v28  ;;  %v1452_v9 = vrot.slane %v1448_v10, 3  ;;  %v1453_v32 = vrot.slane %v1449_v62, 3  ;;  %v1466_v4 = vmul.f32 %v1465_v11, %v2985_v18 }
 0x183   : > { %v1444_v12 = vadd.f32 %v1440_v57, %v1432_v29  ;;  %v1467_v41 = vmul.f32 %v1465_v11, %v2988_v20  ;;  %v1460_v1 = vmul.f32 %v1459_v44, %v2985_v18  ;;  %v1461_v55 = vmul.f32 %v1459_v44, %v2988_v20 }
 0x184   : > { %v1445_v59 = vadd.f32 %v1441_v13, %v1433_v52  ;;  %v1477_v42 = vstv %s3618_s26  ;;  %v1489_v30 = vstv %s3622_s6  ;;  %v1501_v29 = vstv %s3628_s17  ;;  %s3670_s26 = sld [smem:[#allocation7 + $0x4a]] }
 0x185   : > { %v1456_v54 = vadd.f32 %v1452_v9, %v1444_v12  ;;  %v1507_v52 = vstv %s3632_s23  ;;  %v1470_v24 = vrot.slane %v1466_v4, 1  ;;  %v1478_v8 = vmul.f32 %v1477_v42, %v2985_v18  ;;  %s3675_s17 = sld [smem:[#allocation7 + $0x4b]] }
 0x186   : > { %v1457_v63 = vadd.f32 %v1453_v32, %v1445_v59  ;;  %v1479_v43 = vmul.f32 %v1477_v42, %v2988_v20  ;;  %v1490_v60 = vmul.f32 %v1489_v30, %v2985_v18  ;;  %v1471_v48 = vrot.slane %v1467_v41, 1  ;;  %s3682_s6 = sld [smem:[#allocation7 + $0x58]] }
 0x187   : > { %v1462_v36 = vadd.f32 %v1460_v1, %v1456_v54  ;;  %v1491_v27 = vmul.f32 %v1489_v30, %v2988_v20  ;;  %v1276_v10 = vadd.f32 %v1272_v61, %v1264_v22  ;;  %v1482_v62 = vrot.slane %v1478_v8, 2  ;;  %s3685_s23 = sld [smem:[#allocation7 + $0x59]] }
 0x188   : > { %v1463_v28 = vadd.f32 %v1461_v55, %v1457_v63  ;;  %v1483_v44 = vrot.slane %v1479_v43, 2  ;;  %v1502_v11 = vmul.f32 %v1501_v29, %v3138_v16  ;;  %v1508_v9 = vmul.f32 %v1507_v52, %v3138_v16 }
 0x189   : > { %v1474_v57 = vadd.f32 %v1470_v24, %v1462_v36  ;;  %v1509_v32 = vmul.f32 %v1507_v52, %v3147_v58  ;;  %v1494_v12 = vrot.slane %v1490_v60, 3  ;;  %v1503_v59 = vmul.f32 %v1501_v29, %v3147_v58 }
 0x18a   : > { %v1475_v13 = vadd.f32 %v1471_v48, %v1463_v28  ;;  %v1519_v4 = vstv %s3642_s2  ;;  %v1531_v45 = vstv %s3648_s3  ;;  %v1495_v41 = vrot.slane %v1491_v27, 3  ;;  %s3693_s2 = sld [smem:[#allocation7 + $0x5b]] }
 0x18b   : > { %v1486_v61 = vadd.f32 %v1482_v62, %v1474_v57  ;;  %v1543_v1 = vstv %s3652_s8  ;;  %v1512_v55 = vrot.slane %v1508_v9, 1  ;;  %v1513_v42 = vrot.slane %v1509_v32, 1  ;;  %s3708_s3 = sld [smem:[#allocation7 + $0x68]] }
 0x18c   : > { %v1487_v22 = vadd.f32 %v1483_v44, %v1475_v13  ;;  %v1520_v30 = vmul.f32 %v1519_v4, %v3138_v16  ;;  %v1553_v54 = vstv %s3658_s14  ;;  %v1521_v52 = vmul.f32 %v1519_v4, %v3147_v58  ;;  %s3710_s8 = sld [smem:[#allocation7 + $0x69]] }
 0x18d   : > { %v1498_v63 = vadd.f32 %v1494_v12, %v1486_v61  ;;  %v1532_v24 = vmul.f32 %v1531_v45, %v3138_v16  ;;  %v1533_v60 = vmul.f32 %v1531_v45, %v3147_v58  ;;  %v1544_v36 = vmul.f32 %v1543_v1, %v2938_v47  ;;  %s3713_s14 = sld [smem:[#allocation7 + $0x6a]] }
 0x18e   : > { %v1499_v29 = vadd.f32 %v1495_v41, %v1487_v22  ;;  %v1277_v28 = vadd.f32 %v1273_v38, %v1265_v40  ;;  %v3703_v48 = vadd.f32 %v1284_v17, %v1276_v10  ;;  %v1524_v44 = vrot.slane %v1520_v30, 2 }
 0x18f   : > { %v1504_v27 = vadd.f32 %v1502_v11, %v1498_v63  ;;  %v1554_v57 = vmul.f32 %v1553_v54, %v2938_v47  ;;  %v1563_v13 = vstv %s3670_s26  ;;  %v1573_v9 = vstv %s3675_s17  ;;  %s3717_s26 = sld [smem:[#allocation7 + $0x6b]] }
 0x190   : > { %v1505_v62 = vadd.f32 %v1503_v59, %v1499_v29  ;;  %v1525_v4 = vrot.slane %v1521_v52, 2  ;;  %v1536_v35 = vrot.slane %v1532_v24, 3  ;;  %v1537_v7 = vrot.slane %v1533_v60, 3  ;;  %s3726_s17 = sld [smem:[#allocation7 + $0xc]] }
 0x191   : > { %v1516_v32 = vadd.f32 %v1512_v55, %v1504_v27  ;;  %v1546_v38 = vperm.slane %v1544_v36, 0  ;;  %v1547_v17 = vperm.slane %v1544_v36, 4  ;;  %v1564_v40 = vmul.f32 %v1563_v13, %v2938_v47 }
 0x192   : > { %v1517_v12 = vadd.f32 %v1513_v42, %v1505_v62  ;;  %v1574_v59 = vmul.f32 %v1573_v9, %v2938_v47  ;;  %v1589_v45 = vstv %s3685_s23  ;;  %v3721_v61 = vadd.f32 %v1285_v19, %v1277_v28  ;;  %s3730_s23 = sld [smem:[#allocation7 + $0xd]] }
 0x193   : > { %v1528_v10 = vadd.f32 %v1524_v44, %v1516_v32  ;;  %v1556_v22 = vperm.slane %v1554_v57, 1  ;;  %v1557_v41 = vperm.slane %v1554_v57, 5  ;;  %v1583_v1 = vstv %s3682_s6  ;;  %s3732_s6 = sld [smem:[#allocation7 + $0xe]] }
 0x194   : > { %v1529_v11 = vadd.f32 %v1525_v4, %v1517_v12  ;;  %v1601_v30 = vstv %s3689_s20  ;;  %v1613_v54 = vstv %s3693_s2  ;;  %v1566_v63 = vperm.slane %v1564_v40, 2  ;;  %s3740_s20 = sld [smem:[#allocation7 + $0x78]] }
 0x195   : > { %v1540_v55 = vadd.f32 %v1536_v35, %v1528_v10  ;;  %v1567_v29 = vperm.slane %v1564_v40, 6  ;;  %v1590_v52 = vmul.f32 %v1589_v45, %v3208_v15  ;;  %v1591_v24 = vmul.f32 %v1589_v45, %v3212_v6  ;;  %s3746_s2 = sld [smem:[#allocation7 + $0x79]] }
 0x196   : > { %v1541_v42 = vadd.f32 %v1537_v7, %v1529_v11  ;;  %v1576_v60 = vperm.slane %v1574_v59, 3  ;;  %v1577_v36 = vperm.slane %v1574_v59, 7  ;;  %v1584_v28 = vmul.f32 %v1583_v1, %v3208_v15 }
 0x197   : > { %v1550_v26 = vadd.f32 %v1546_v38, %v1540_v55  ;;  %v1585_v27 = vmul.f32 %v1583_v1, %v3212_v6  ;;  %v1602_v62 = vmul.f32 %v1601_v30, %v3208_v15  ;;  %v3738_v44 = vmul.f32 %v1601_v30, %v3212_v6 }
 0x198   : > { %v1551_v19 = vadd.f32 %v1547_v17, %v1541_v42  ;;  %v3743_v9 = vmul.f32 %v1613_v54, %v3208_v15  ;;  %v1631_v32 = vstv %s3710_s8  ;;  %v1594_v12 = vrot.slane %v1590_v52, 1  ;;  %s3775_s8 = sld [smem:[#allocation7 + $0x88]] }
 0x199   : > { %v1560_v57 = vadd.f32 %v1556_v22, %v1550_v26  ;;  %v1595_v4 = vrot.slane %v1591_v24, 1  ;;  %v3749_v35 = vmul.f32 %v1613_v54, %v3212_v6  ;;  %v1625_v7 = vstv %s3708_s3  ;;  %s3770_s3 = sld [smem:[#allocation7 + $0x7b]] }
 0x19a   : > { %v1561_v13 = vadd.f32 %v1557_v41, %v1551_v19  ;;  %v1643_v40 = vstv %s3713_s14  ;;  %v1655_v10 = vstv %s3717_s26  ;;  %v3759_v11 = vmul.f32 %v1631_v32, %v3265_v3  ;;  %s3787_s14 = sld [smem:[#allocation7 + $0x1c]] }
 0x19b   : > { %v1570_v38 = vadd.f32 %v1566_v63, %v1560_v57  ;;  %v3762_v59 = vmul.f32 %v1631_v32, %v3269_v49  ;;  %v3765_v45 = vmul.f32 %v1643_v40, %v3265_v3  ;;  %v3768_v22 = vmul.f32 %v1643_v40, %v3269_v49  ;;  %s3793_s26 = sld [smem:[#allocation7 + $0x1d]] }
 0x19c   : > { %v1571_v17 = vadd.f32 %v1567_v29, %v1561_v13  ;;  %v1606_v55 = vrot.slane %v1602_v62, 2  ;;  %v3773_v42 = vmul.f32 %v1655_v10, %v3265_v3  ;;  %v1607_v30 = vrot.slane %v3738_v44, 2 }
 0x19d   : > { %v1580_v41 = vadd.f32 %v1576_v60, %v1570_v38  ;;  %v1618_v54 = vrot.slane %v3743_v9, 3  ;;  %v1619_v63 = vrot.slane %v3749_v35, 3  ;;  %v3781_v29 = vmul.f32 %v1655_v10, %v3269_v49 }
 0x19e   : > { %v1581_v1 = vadd.f32 %v1577_v36, %v1571_v17  ;;  %v1626_v26 = vmul.f32 %v1625_v7, %v3265_v3  ;;  %v3785_v19 = vmul.f32 %v1625_v7, %v3269_v49  ;;  %v1636_v60 = vrot.slane %v3759_v11, 1 }
 0x19f   : > { %v1586_v52 = vadd.f32 %v1584_v28, %v1580_v41  ;;  %v1637_v36 = vrot.slane %v3762_v59, 1  ;;  %v1648_v62 = vrot.slane %v3765_v45, 2  ;;  %v1649_v28 = vrot.slane %v3768_v22, 2 }
 0x1a0   : > { %v1587_v24 = vadd.f32 %v1585_v27, %v1581_v1  ;;  %v1660_v44 = vrot.slane %v3773_v42, 3  ;;  %v1661_v9 = vrot.slane %v3781_v29, 3  ;;  %v1757_v32 = vstv %s3730_s23  ;;  %s3826_s23 = sld [smem:[#allocation7 + $0x2c]] }
 0x1a1   : > { %v1598_v27 = vadd.f32 %v1594_v12, %v1586_v52  ;;  %v1769_v35 = vstv %s3732_s6  ;;  %v1781_v7 = vstv %s3752_s28  ;;  %v1751_v10 = vstv %s3726_s17  ;;  %s3816_s28 = sld [smem:[#allocation7 + $0x8a]] }
 0x1a2   : > { %v1599_v38 = vadd.f32 %v1595_v4, %v1587_v24  ;;  %v1758_v12 = vmul.f32 %v1757_v32, %v3034_v50  ;;  %v1759_v41 = vmul.f32 %v1757_v32, %v3036_v51  ;;  %v1770_v1 = vmul.f32 %v1769_v35, %v3034_v50  ;;  %s3822_s17 = sld [smem:[#allocation7 + $0x2d]] }
 0x1a3   : > { %v1610_v17 = vadd.f32 %v1606_v55, %v1598_v27  ;;  %v1771_v52 = vmul.f32 %v1769_v35, %v3036_v51  ;;  %v1782_v4 = vmul.f32 %v1781_v7, %v3034_v50  ;;  %v1783_v55 = vmul.f32 %v1781_v7, %v3036_v51  ;;  %s3830_s6 = sld [smem:[#allocation7 + $0x2e]] }
 0x1a4   : > { %v1752_v24 = vmul.f32 %v1751_v10, %v3034_v50  ;;  %v1753_v27 = vmul.f32 %v1751_v10, %v3036_v51  ;;  %v1762_v40 = vrot.slane %v1758_v12, 1  ;;  %v1763_v32 = vrot.slane %v1759_v41, 1 }
 0x1a5   : > { %v1611_v43 = vadd.f32 %v1607_v30, %v1599_v38  ;;  %v1622_v8 = vadd.f32 %v1618_v54, %v1610_v17  ;;  %v1774_v14 = vrot.slane %v1770_v1, 2  ;;  %v1775_v35 = vrot.slane %v1771_v52, 2 }
 0x1a6   : > { %v1766_v57 = vadd.f32 %v1762_v40, %v1752_v24  ;;  %v1767_v13 = vadd.f32 %v1763_v32, %v1753_v27  ;;  %v1793_v23 = vstv %s3787_s14  ;;  %v1799_v21 = vstv %s3793_s26  ;;  %s3834_s14 = sld [smem:[#allocation7 + $0x2f]] }
 0x1a7   : > { %4316 = sst [smem:[#allocation26_spill]] %s3816_s28  ;;  %v1786_v7 = vrot.slane %v1782_v4, 3  ;;  %v1787_v50 = vrot.slane %v1783_v55, 3  ;;  %v1794_v51 = vmul.f32 %v1793_v23, %v3083_v33  ;;  %v1795_v30 = vmul.f32 %v1793_v23, %v3087_v34 }
 0x1a8   : > { %v1778_v54 = vadd.f32 %v1774_v14, %v1766_v57  ;;  %v1779_v38 = vadd.f32 %v1775_v35, %v1767_v13  ;;  %v1800_v17 = vmul.f32 %v1799_v21, %v3083_v33  ;;  %v1801_v40 = vmul.f32 %v1799_v21, %v3087_v34  ;;  %s3842_s26 = sld [smem:[#allocation7 + $0x3d]] }
 0x1a9   : > { %v1623_v10 = vadd.f32 %v1619_v63, %v1611_v43  ;;  %v1628_v12 = vadd.f32 %v1626_v26, %v1622_v8  ;;  %v1811_v41 = vstv %s3802_s27  ;;  %v1823_v1 = vstv %s3806_s4  ;;  %s3846_s4 = sld [smem:[#allocation7 + $0x3c]] }
 0x1aa   : > { %v1790_v52 = vadd.f32 %v1786_v7, %v1778_v54  ;;  %v1791_v4 = vadd.f32 %v1787_v50, %v1779_v38  ;;  %v1804_v55 = vrot.slane %v1800_v17, 1  ;;  %v1805_v23 = vrot.slane %v1801_v40, 1  ;;  %s3853_s27 = sld [smem:[#allocation7 + $0x3e]] }
 0x1ab   : > { %v1715_v24 = vstv %s3808_s18  ;;  %v1727_v27 = vstv %s3816_s28  ;;  %v1812_v14 = vmul.f32 %v1811_v41, %v3083_v33  ;;  %v1813_v57 = vmul.f32 %v1811_v41, %v3087_v34  ;;  %s3871_s28 = sld [smem:[#allocation7 + $0x8b]] }
 0x1ac   : > { %v1796_v21 = vadd.f32 %v1794_v51, %v1790_v52  ;;  %v1797_v13 = vadd.f32 %v1795_v30, %v1791_v4  ;;  %v1824_v8 = vmul.f32 %v1823_v1, %v3083_v33  ;;  %v1825_v43 = vmul.f32 %v1823_v1, %v3087_v34 }
 0x1ad   : > { %v1629_v63 = vadd.f32 %v3785_v19, %v1623_v10  ;;  %v1640_v26 = vadd.f32 %v1636_v60, %v1628_v12  ;;  %v1816_v32 = vrot.slane %v1812_v14, 2  ;;  %v1841_v35 = vstv %s3822_s17  ;;  %s3861_s17 = sld [smem:[#allocation7 + $0x4c]] }
 0x1ae   : > { %v1808_v7 = vadd.f32 %v1804_v55, %v1796_v21  ;;  %v1809_v50 = vadd.f32 %v1805_v23, %v1797_v13  ;;  %v1817_v54 = vrot.slane %v1813_v57, 2  ;;  %v1835_v51 = vstv %s3826_s23  ;;  %s3869_s23 = sld [smem:[#allocation7 + $0x4d]] }
 0x1af   : > { %v1828_v33 = vrot.slane %v1824_v8, 3  ;;  %v1829_v30 = vrot.slane %v1825_v43, 3  ;;  %v1842_v34 = vmul.f32 %v1841_v35, %v2985_v18  ;;  %v1843_v38 = vmul.f32 %v1841_v35, %v2988_v20 }
 0x1b0   : > { %v1820_v11 = vadd.f32 %v1816_v32, %v1808_v7  ;;  %v1821_v19 = vadd.f32 %v1817_v54, %v1809_v50  ;;  %v1853_v60 = vstv %s3830_s6  ;;  %v1865_v17 = vstv %s3834_s14  ;;  %s3878_s6 = sld [smem:[#allocation7 + $0x4e]] }
 0x1b1   : > { %v1641_v40 = vadd.f32 %v1637_v36, %v1629_v63  ;;  %v1652_v10 = vadd.f32 %v1648_v62, %v1640_v26  ;;  %v1836_v12 = vmul.f32 %v1835_v51, %v2985_v18  ;;  %v1854_v41 = vmul.f32 %v1853_v60, %v2985_v18  ;;  %s3881_s14 = sld [smem:[#allocation7 + $0x4f]] }
 0x1b2   : > { %v1832_v1 = vadd.f32 %v1828_v33, %v1820_v11  ;;  %v1833_v52 = vadd.f32 %v1829_v30, %v1821_v19  ;;  %v1837_v4 = vmul.f32 %v1835_v51, %v2988_v20  ;;  %v1855_v55 = vmul.f32 %v1853_v60, %v2988_v20 }
 0x1b3   : > { %v1846_v59 = vrot.slane %v1842_v34, 1  ;;  %v1866_v36 = vmul.f32 %v1865_v17, %v2985_v18  ;;  %v1867_v45 = vmul.f32 %v1865_v17, %v2988_v20  ;;  %v1883_v62 = vstv %s3842_s26  ;;  %s3890_s26 = sld [smem:[#allocation7 + $0x5d]] }
 0x1b4   : > { %v1838_v23 = vadd.f32 %v1836_v12, %v1832_v1  ;;  %v1839_v14 = vadd.f32 %v1837_v4, %v1833_v52  ;;  %v1847_v57 = vrot.slane %v1843_v38, 1  ;;  %v1877_v21 = vstv %s3846_s4  ;;  %s3896_s4 = sld [smem:[#allocation7 + $0x5c]] }
 0x1b5   : > { %v1653_v13 = vadd.f32 %v1649_v28, %v1641_v40  ;;  %v1858_v8 = vrot.slane %v1854_v41, 2  ;;  %v1884_v43 = vmul.f32 %v1883_v62, %v3138_v16  ;;  %v1885_v18 = vmul.f32 %v1883_v62, %v3147_v58 }
 0x1b6   : > { %v1850_v20 = vadd.f32 %v1846_v59, %v1838_v23  ;;  %v1851_v63 = vadd.f32 %v1847_v57, %v1839_v14  ;;  %v1859_v26 = vrot.slane %v1855_v55, 2  ;;  %v1895_v32 = vstv %s3853_s27  ;;  %s3906_s27 = sld [smem:[#allocation7 + $0x5f]] }
 0x1b7   : > { %v1870_v35 = vrot.slane %v1866_v36, 3  ;;  %v1871_v7 = vrot.slane %v1867_v45, 3  ;;  %v1878_v50 = vmul.f32 %v1877_v21, %v3138_v16  ;;  %v1907_v54 = vstv %s3857_s29  ;;  %s3900_s29 = sld [smem:[#allocation7 + $0x5e]] }
 0x1b8   : > { %v1862_v22 = vadd.f32 %v1858_v8, %v1850_v20  ;;  %v1863_v28 = vadd.f32 %v1859_v26, %v1851_v63  ;;  %v1879_v51 = vmul.f32 %v1877_v21, %v3147_v58  ;;  %v1888_v33 = vrot.slane %v1884_v43, 1 }
 0x1b9   : > { %v1889_v30 = vrot.slane %v1885_v18, 1  ;;  %v1896_v34 = vmul.f32 %v1895_v32, %v3138_v16  ;;  %v1919_v38 = vstv %s3861_s17  ;;  %v1929_v11 = vstv %s3869_s23  ;;  %s3910_s17 = sld [smem:[#allocation7 + $0x6c]] }
 0x1ba   : > { %v1874_v19 = vadd.f32 %v1870_v35, %v1862_v22  ;;  %v1875_v60 = vadd.f32 %v1871_v7, %v1863_v28  ;;  %v1897_v17 = vmul.f32 %v1895_v32, %v3147_v58  ;;  %v1908_v40 = vmul.f32 %v1907_v54, %v3138_v16  ;;  %s3921_s23 = sld [smem:[#allocation7 + $0x6d]] }
 0x1bb   : > { %v1739_v12 = vstv %s3871_s28  ;;  %v1909_v41 = vmul.f32 %v1907_v54, %v3147_v58  ;;  %v1920_v1 = vmul.f32 %v1919_v38, %v2938_v47  ;;  %v1939_v52 = vstv %s3878_s6  ;;  %s3923_s6 = sld [smem:[#allocation7 + $0x6e]] }
 0x1bc   : > { %v1880_v4 = vadd.f32 %v1878_v50, %v1874_v19  ;;  %v1881_v55 = vadd.f32 %v1879_v51, %v1875_v60  ;;  %v1930_v59 = vmul.f32 %v1929_v11, %v2938_v47  ;;  %v1949_v36 = vstv %s3881_s14  ;;  %s3927_s14 = sld [smem:[#allocation7 + $0x6f]] }
 0x1bd   : > { %v3914_v16 = vadd.f32 %v1660_v44, %v1652_v10  ;;  %v3918_v58 = vadd.f32 %v1661_v9, %v1653_v13  ;;  %v1900_v45 = vrot.slane %v1896_v34, 2  ;;  %v1940_v62 = vmul.f32 %v1939_v52, %v2938_v47 }
 0x1be   : > { %v1892_v23 = vadd.f32 %v1888_v33, %v1880_v4  ;;  %v1893_v14 = vadd.f32 %v1889_v30, %v1881_v55  ;;  %v1901_v57 = vrot.slane %v1897_v17, 2  ;;  %v1912_v21 = vrot.slane %v1908_v40, 3 }
 0x1bf   : > { %v1913_v8 = vrot.slane %v1909_v41, 3  ;;  %v1922_v42 = vperm.slane %v1920_v1, 0  ;;  %v1950_v44 = vmul.f32 %v1949_v36, %v2938_v47  ;;  %v1965_v29 = vstv %s3890_s26  ;;  %s3939_s26 = sld [smem:[#allocation7 + $0x7c]] }
 0x1c0   : > { %v1904_v9 = vadd.f32 %v1900_v45, %v1892_v23  ;;  %v1905_v10 = vadd.f32 %v1901_v57, %v1893_v14  ;;  %v1923_v13 = vperm.slane %v1920_v1, 4  ;;  %v1932_v43 = vperm.slane %v1930_v59, 1 }
 0x1c1   : > { %v1933_v18 = vperm.slane %v1930_v59, 5  ;;  %v1942_v20 = vperm.slane %v1940_v62, 2  ;;  %v1959_v63 = vstv %s3896_s4  ;;  %v1966_v26 = vmul.f32 %v1965_v29, %v3208_v15  ;;  %s3942_s4 = sld [smem:[#allocation7 + $0x7d]] }
 0x1c2   : > { %v1916_v32 = vadd.f32 %v1912_v21, %v1904_v9  ;;  %v1917_v35 = vadd.f32 %v1913_v8, %v1905_v10  ;;  %v1967_v7 = vmul.f32 %v1965_v29, %v3212_v6  ;;  %v1977_v50 = vstv %s3900_s29  ;;  %s3948_s29 = sld [smem:[#allocation7 + $0x7e]] }
 0x1c3   : > { %v1943_v47 = vperm.slane %v1940_v62, 6  ;;  %v1952_v54 = vperm.slane %v1950_v44, 3  ;;  %v1953_v22 = vperm.slane %v1950_v44, 7  ;;  %v1989_v28 = vstv %s3906_s27  ;;  %s3972_s27 = sld [smem:[#allocation7 + $0x7f]] }
 0x1c4   : > { %v1926_v51 = vadd.f32 %v1922_v42, %v1916_v32  ;;  %v1927_v33 = vadd.f32 %v1923_v13, %v1917_v35  ;;  %v1960_v30 = vmul.f32 %v1959_v63, %v3208_v15  ;;  %v1961_v34 = vmul.f32 %v1959_v63, %v3212_v6 }
 0x1c5   : > { %v1970_v38 = vrot.slane %v1966_v26, 1  ;;  %v1978_v11 = vmul.f32 %v1977_v50, %v3208_v15  ;;  %v1979_v19 = vmul.f32 %v1977_v50, %v3212_v6  ;;  %v2007_v60 = vstv %s3921_s23  ;;  %s3986_s23 = sld [smem:[#allocation7 + $0x8d]] }
 0x1c6   : > { %v1936_v17 = vadd.f32 %v1932_v43, %v1926_v51  ;;  %v1937_v40 = vadd.f32 %v1933_v18, %v1927_v33  ;;  %v1971_v41 = vrot.slane %v1967_v7, 1  ;;  %v1990_v1 = vmul.f32 %v1989_v28, %v3208_v15 }
 0x1c7   : > { %v1991_v52 = vmul.f32 %v1989_v28, %v3212_v6  ;;  %v2001_v4 = vstv %s3910_s17  ;;  %v2019_v55 = vstv %s3923_s6  ;;  %v2031_v59 = vstv %s3927_s14  ;;  %s3975_s17 = sld [smem:[#allocation7 + $0x8c]] }
 0x1c8   : > { %v1946_v36 = vadd.f32 %v1942_v20, %v1936_v17  ;;  %v1947_v45 = vadd.f32 %v1943_v47, %v1937_v40  ;;  %v2008_v62 = vmul.f32 %v2007_v60, %v3265_v3  ;;  %v2009_v23 = vmul.f32 %v2007_v60, %v3269_v49  ;;  %s3994_s6 = sld [smem:[#allocation7 + $0x8e]] }
 0x1c9   : > { %v3953_v14 = vmul.f32 %v2019_v55, %v3265_v3  ;;  %v3956_v15 = vmul.f32 %v2019_v55, %v3269_v49  ;;  %v3959_v57 = vmul.f32 %v2031_v59, %v3265_v3  ;;  %v3962_v6 = vmul.f32 %v2031_v59, %v3269_v49 }
 0x1ca   : > { %v1956_v21 = vadd.f32 %v1952_v54, %v1946_v36  ;;  %v1957_v8 = vadd.f32 %v1953_v22, %v1947_v45  ;;  %v1982_v42 = vrot.slane %v1978_v11, 2  ;;  %v1983_v44 = vrot.slane %v1979_v19, 2 }
 0x1cb   : > { %v1994_v29 = vrot.slane %v1990_v1, 3  ;;  %v1995_v9 = vrot.slane %v1991_v52, 3  ;;  %v2002_v10 = vmul.f32 %v2001_v4, %v3265_v3  ;;  %v2003_v13 = vmul.f32 %v2001_v4, %v3269_v49 }
 0x1cc   : > { %v1962_v43 = vadd.f32 %v1960_v30, %v1956_v21  ;;  %v1963_v18 = vadd.f32 %v1961_v34, %v1957_v8  ;;  %v2012_v20 = vrot.slane %v2008_v62, 1  ;;  %v2013_v63 = vrot.slane %v2009_v23, 1 }
 0x1cd   : > { %v2024_v26 = vrot.slane %v3953_v14, 2  ;;  %v2025_v32 = vrot.slane %v3956_v15, 2  ;;  %v2036_v35 = vrot.slane %v3959_v57, 3  ;;  %v2037_v7 = vrot.slane %v3962_v6, 3 }
 0x1ce   : > { %v1974_v3 = vadd.f32 %v1970_v38, %v1962_v43  ;;  %v1975_v50 = vadd.f32 %v1971_v41, %v1963_v18  ;;  %v2043_v49 = vstv %s3939_s26  ;;  %v2049_v47 = vstv %s3942_s4 }
 0x1cf   : > { %v2061_v54 = vstv %s3948_s29  ;;  %v4317_v22 = vstv %s3251_s21  ;;  %v4319_v30 = vstv %s3279_s11  ;;  %v4321_v17 = vstv %s3285_s5  ;;  %s4001_s21 = sld [smem:[#allocation7 + $0x8f]] }
 0x1d0   : > { %v916_v28 = vmul.f32 %v4317_v22, %v3357_v25  ;;  %v4318_v51 = vmov %v4317_v22  ;;  %v922_v34 = vmul.f32 %v4319_v30, %v3357_v25  ;;  %v1986_v11 = vadd.f32 %v1982_v42, %v1974_v3  ;;  %s4354_s5 = sld [smem:[#allocation31_spill]] }
 0x1d1   : > { %v917_v33 = vmul.f32 %v4318_v51, %v3373_v46  ;;  %v1987_v38 = vadd.f32 %v1983_v44, %v1975_v50  ;;  %v4320_v19 = vmov %v4319_v30  ;;  %v934_v40 = vmul.f32 %v4321_v17, %v3357_v25 }
 0x1d2   : > { %v923_v60 = vmul.f32 %v4320_v19, %v3373_v46  ;;  %v918_v41 = vadd.f32 %v916_v28, %v3514_v53  ;;  %v926_v52 = vrot.slane %v922_v34, 1  ;;  %v4322_v4 = vmov %v4321_v17 }
 0x1d3   : > { %v919_v1 = vadd.f32 %v917_v33, %v3518_v37  ;;  %v935_v55 = vmul.f32 %v4322_v4, %v3373_v46  ;;  %v1998_v59 = vadd.f32 %v1994_v29, %v1986_v11  ;;  %v1999_v36 = vadd.f32 %v1995_v9, %v1987_v38 }
 0x1d4   : > { %v927_v45 = vrot.slane %v923_v60, 1  ;;  %v938_v62 = vrot.slane %v934_v40, 2  ;;  %v930_v23 = vadd.f32 %v926_v52, %v918_v41  ;;  %v4323_v15 = vstv %s3311_s9 }
 0x1d5   : > { %v939_v14 = vrot.slane %v935_v55, 2  ;;  %v946_v53 = vmul.f32 %v4323_v15, %v3357_v25  ;;  %v4324_v37 = vmov %v4323_v15  ;;  %v2004_v8 = vadd.f32 %v2002_v10, %v1998_v59 }
 0x1d6   : > { %v947_v21 = vmul.f32 %v4324_v37, %v3373_v46  ;;  %v2005_v42 = vadd.f32 %v2003_v13, %v1999_v36  ;;  %v931_v44 = vadd.f32 %v927_v45, %v919_v1  ;;  %v4325_v29 = vstv %s3319_s12 }
 0x1d7   : > { %v958_v9 = vmul.f32 %v4325_v29, %v3436_v0  ;;  %v942_v43 = vadd.f32 %v938_v62, %v930_v23  ;;  %v950_v18 = vrot.slane %v946_v53, 3  ;;  %v4326_v50 = vmov %v4325_v29 }
 0x1d8   : > { %v951_v3 = vrot.slane %v947_v21, 3  ;;  %v959_v22 = vmul.f32 %v4326_v50, %v3480_v5  ;;  %v2016_v28 = vadd.f32 %v2012_v20, %v2004_v8  ;;  %v2017_v51 = vadd.f32 %v2013_v63, %v2005_v42 }
 0x1d9   : > { %v943_v33 = vadd.f32 %v939_v14, %v931_v44  ;;  %v964_v10 = vmul.f32 %v963_v31, %v3436_v0  ;;  %v954_v13 = vadd.f32 %v950_v18, %v942_v43  ;;  %v965_v30 = vmul.f32 %v963_v31, %v3480_v5 }
 0x1da   : > { %v976_v34 = vmul.f32 %v975_v39, %v3436_v0  ;;  %v4027_v11 = vmul.f32 %v975_v39, %v3480_v5  ;;  %v2028_v20 = vadd.f32 %v2024_v26, %v2016_v28  ;;  %v2073_v63 = vstv %s3972_s27 }
 0x1db   : > { %v2085_v38 = vstv %s3975_s17  ;;  %v955_v19 = vadd.f32 %v951_v3, %v943_v33  ;;  %v2029_v60 = vadd.f32 %v2025_v32, %v2017_v51  ;;  %v2091_v17 = vstv %s3986_s23 }
 0x1dc   : > { %v960_v40 = vadd.f32 %v958_v9, %v954_v13  ;;  %v968_v31 = vrot.slane %v964_v10, 1  ;;  %v2103_v41 = vstv %s3994_s6  ;;  %v2115_v1 = vstv %s4001_s21 }
 0x1dd   : > { %v969_v52 = vrot.slane %v965_v30, 1  ;;  %v980_v4 = vrot.slane %v976_v34, 2  ;;  %v961_v39 = vadd.f32 %v959_v22, %v955_v19  ;;  %v981_v55 = vrot.slane %v4027_v11, 2 }
 0x1de   : > { %v1292_v26 = vmul.f32 %v1291_v2, %v3357_v25  ;;  %v1293_v32 = vmul.f32 %v1291_v2, %v3373_v46  ;;  %v4043_v59 = vadd.f32 %v2036_v35, %v2028_v20  ;;  %v4048_v36 = vmul.f32 %v987_v56, %v3436_v0 }
 0x1df   : > { %v4327_v45 = vstv %s3536_s0  ;;  %v4058_v15 = vadd.f32 %v2037_v7, %v2029_v60  ;;  %v972_v2 = vadd.f32 %v968_v31, %v960_v40  ;;  %v4065_v53 = vmul.f32 %v987_v56, %v3480_v5 }
 0x1e0   : > { %v1298_v62 = vmul.f32 %v4327_v45, %v3357_v25  ;;  %v4328_v23 = vmov %v4327_v45  ;;  %v1294_v57 = vadd.f32 %v1292_v26, %v3703_v48  ;;  %v1295_v35 = vadd.f32 %v1293_v32, %v3721_v61 }
 0x1e1   : > { %v1299_v14 = vmul.f32 %v4328_v23, %v3373_v46  ;;  %v4329_v8 = vstv %s3540_s1  ;;  %v973_v6 = vadd.f32 %v969_v52, %v961_v39  ;;  %v4331_v48 = vstv %s3546_s24 }
 0x1e2   : > { %v1302_v37 = vrot.slane %v1298_v62, 1  ;;  %v1310_v42 = vmul.f32 %v4329_v8, %v3357_v25  ;;  %v4330_v7 = vmov %v4329_v8  ;;  %v1322_v61 = vmul.f32 %v4331_v48, %v3357_v25 }
 0x1e3   : > { %v1303_v21 = vrot.slane %v1299_v14, 1  ;;  %v1311_v44 = vmul.f32 %v4330_v7, %v3373_v46  ;;  %v4332_v29 = vmov %v4331_v48  ;;  %v992_v9 = vrot.slane %v4048_v36, 3 }
 0x1e4   : > { %v1323_v56 = vmul.f32 %v4332_v29, %v3373_v46  ;;  %v1306_v43 = vadd.f32 %v1302_v37, %v1294_v57  ;;  %v1314_v3 = vrot.slane %v1310_v42, 2  ;;  %v4080_v50 = vadd.f32 %v980_v4, %v972_v2 }
 0x1e5   : > { %v1307_v18 = vadd.f32 %v1303_v21, %v1295_v35  ;;  %v1315_v22 = vrot.slane %v1311_v44, 2  ;;  %v1326_v28 = vrot.slane %v1322_v61, 3  ;;  %v4333_v10 = vstv %s3590_s25 }
 0x1e6   : > { %v1327_v51 = vrot.slane %v1323_v56, 3  ;;  %v1318_v33 = vadd.f32 %v1314_v3, %v1306_v43  ;;  %v1334_v13 = vmul.f32 %v4333_v10, %v3436_v0  ;;  %v4334_v30 = vstv %s3596_s19 }
 0x1e7   : > { %v1340_v34 = vmul.f32 %v4334_v30, %v3436_v0  ;;  %v4335_v20 = vmov %v4334_v30  ;;  %v1319_v60 = vadd.f32 %v1315_v22, %v1307_v18  ;;  %v4336_v40 = vmov %v4333_v10 }
 0x1e8   : > { %v1341_v19 = vmul.f32 %v4335_v20, %v3480_v5  ;;  %v1335_v31 = vmul.f32 %v4336_v40, %v3480_v5  ;;  %v4337_v52 = vstv %s3660_s22  ;;  %v993_v32 = vrot.slane %v4065_v53, 3 }
 0x1e9   : > { %v1352_v4 = vmul.f32 %v4337_v52, %v3436_v0  ;;  %v4338_v39 = vmov %v4337_v52  ;;  %v1330_v45 = vadd.f32 %v1326_v28, %v1318_v33  ;;  %v1344_v62 = vrot.slane %v1340_v34, 1 }
 0x1ea   : > { %v1353_v26 = vmul.f32 %v4338_v39, %v3480_v5  ;;  %v4339_v23 = vstv %s3664_s16  ;;  %v1331_v2 = vadd.f32 %v1327_v51, %v1319_v60  ;;  %v1345_v57 = vrot.slane %v1341_v19, 1  ;;  %s4353_s16 = sld [smem:[#allocation18_spill]] }
 0x1eb   : > { %v1364_v14 = vmul.f32 %v4339_v23, %v3436_v0  ;;  %v1356_v35 = vrot.slane %v1352_v4, 2  ;;  %v4340_v37 = vmov %v4339_v23  ;;  %v1336_v8 = vadd.f32 %v1334_v13, %v1330_v45 }
 0x1ec   : > { %v1365_v21 = vmul.f32 %v4340_v37, %v3480_v5  ;;  %v1357_v42 = vrot.slane %v1353_v26, 2  ;;  %v4341_v7 = vstv %s3740_s20  ;;  %v1337_v29 = vadd.f32 %v1335_v31, %v1331_v2 }
 0x1ed   : > { %v1668_v44 = vmul.f32 %v4341_v7, %v3357_v25  ;;  %v4342_v48 = vmov %v4341_v7  ;;  %v4343_v56 = vstv %s3746_s2  ;;  %v4345_v22 = vstv %s3756_s15  ;;  %s4352_s15 = sld [smem:[#allocation25_spill]]  ;;  %s2674_s2 = scalar_lea.hbm %s4354_s5, 16 }
 0x1ee   : > { %v1669_v61 = vmul.f32 %v4342_v48, %v3373_v46  ;;  %v1674_v43 = vmul.f32 %v4343_v56, %v3357_v25  ;;  %v4344_v18 = vmov %v4343_v56  ;;  %v1686_v28 = vmul.f32 %v4345_v22, %v3357_v25 }
 0x1ef   : > { %v1675_v3 = vmul.f32 %v4344_v18, %v3373_v46  ;;  %v1348_v51 = vadd.f32 %v1344_v62, %v1336_v8  ;;  %v1670_v33 = vadd.f32 %v1668_v44, %v3914_v16  ;;  %v4346_v13 = vmov %v4345_v22 }
 0x1f0   : > { %v1671_v10 = vadd.f32 %v1669_v61, %v3918_v58  ;;  %v1687_v30 = vmul.f32 %v4346_v13, %v3373_v46  ;;  %v1349_v34 = vadd.f32 %v1345_v57, %v1337_v29  ;;  %v1368_v20 = vrot.slane %v1364_v14, 3  ;;  %s2482_s19 = sshll.u32 %s4353_s16, 3 }
 0x1f1   : > { %v1678_v19 = vrot.slane %v1674_v43, 1  ;;  %v1679_v60 = vrot.slane %v1675_v3, 1  ;;  %v1360_v40 = vadd.f32 %v1356_v35, %v1348_v51  ;;  %v1690_v31 = vrot.slane %v1686_v28, 2  ;;  %s2180_s9 = scalar_lea.hbm %s4354_s5, %s2482_s19 }
 0x1f2   : > { %v4347_v52 = vstv %s3770_s3  ;;  %v1361_v58 = vadd.f32 %v1357_v42, %v1349_v34  ;;  %v1691_v62 = vrot.slane %v1687_v30, 2  ;;  %v1369_v23 = vrot.slane %v1365_v21, 3  ;;  %s2184_s10 = sshll.u32 %s2180_s9, 4  ;;  %s2185_s10 = int_to_ptr.hbm [resolvable:$true] %s2184_s10 }
 0x1f3   : > { %v1698_v4 = vmul.f32 %v4347_v52, %v3357_v25  ;;  %v4348_v39 = vmov %v4347_v52  ;;  %v1682_v26 = vadd.f32 %v1678_v19, %v1670_v33  ;;  %v1683_v45 = vadd.f32 %v1679_v60, %v1671_v10  ;;  %s2301_s18 = sshll.u32 %s4352_s15, 3  ;;  %s2169_s13 = scalar_lea.sflag [#allocation5], %s4352_s15 }
 0x1f4   : > { %v1699_v16 = vmul.f32 %v4348_v39, %v3373_v46  ;;  %v4350_v57 = vstv %s3775_s8  ;;  %v1716_v42 = vmul.f32 %v1715_v24, %v3436_v0  ;;  %v985_v21 = vadd.f32 %v981_v55, %v973_v6  ;;  %s264_s30 = scalar_lea.vmem [#allocation10], %s2301_s18  ;;  %s2668_s1 = sshra.s32 %s2185_s10, 4  ;;  %s2669_s1 = int_to_ptr.hbm [resolvable:$true] %s2668_s1 }
 0x1f5   : > { %v1702_v14 = vrot.slane %v1698_v4, 3  ;;  %v1710_v35 = vmul.f32 %v4350_v57, %v3436_v0  ;;  %v1694_v37 = vadd.f32 %v1690_v31, %v1682_v26  ;;  %v1695_v8 = vadd.f32 %v1691_v62, %v1683_v45  ;;  %s2182_s7 = sshll.u32 %s264_s30, 4  ;;  %s2670_s24 = scalar_lea.hbm %s2669_s1, 8  ;;  %s2183_s7 = int_to_ptr.vmem [resolvable:$true] %s2182_s7 }
 0x1f6   : > { %v1703_v2 = vrot.slane %v1699_v16, 3  ;;  %v4351_v7 = vmov %v4350_v57  ;;  %v4144_v48 = vadd.f32 %v1368_v20, %v1360_v40  ;;  %v1717_v61 = vmul.f32 %v1715_v24, %v3480_v5  ;;  %p2671_p3 = scmp.ne.s32.totalorder %s2669_s1, %s2670_s24  ;;  %p2675_p11 = scmp.lt.s32.totalorder %s2669_s1, %s4354_s5 }
 0x1f7   : > { %v1711_v44 = vmul.f32 %v4351_v7, %v3480_v5  ;;  %v1728_v29 = vmul.f32 %v1727_v27, %v3436_v0  ;;  %v4152_v56 = vadd.f32 %v1369_v23, %v1361_v58  ;;  %v1706_v43 = vadd.f32 %v1702_v14, %v1694_v37  ;;  %p2676_p12 = scmp.lt.s32.totalorder %s2674_s2, %s2670_s24 }
 0x1f8   : > { %v1707_v18 = vadd.f32 %v1703_v2, %v1695_v8  ;;  %v1720_v3 = vrot.slane %v1716_v42, 1  ;;  %v1721_v11 = vrot.slane %v1717_v61, 1  ;;  %v1729_v55 = vmul.f32 %v1727_v27, %v3480_v5  ;;  %p2672_p7 = pnand %p2671_p3, %p2836_p8 }
 0x1f9   : > { %v1740_v6 = vmul.f32 %v1739_v12, %v3436_v0  ;;  %v1741_v24 = vmul.f32 %v1739_v12, %v3480_v5  ;;  %v1712_v22 = vadd.f32 %v1710_v35, %v1706_v43  ;;  %v1732_v51 = vrot.slane %v1728_v29, 2  ;;  %p2677_p0 = por %p2676_p12, %p2675_p11 }
 0x1fa   : > { %v1713_v28 = vadd.f32 %v1711_v44, %v1707_v18  ;;  %v2044_v33 = vmul.f32 %v2043_v49, %v3357_v25  ;;  %v2045_v10 = vmul.f32 %v2043_v49, %v3373_v46  ;;  %v2050_v13 = vmul.f32 %v2049_v47, %v3357_v25  ;;  %p2673_p10 = pneg %p2672_p7 }
 0x1fb   : > { %v2051_v27 = vmul.f32 %v2049_v47, %v3373_v46  ;;  %v2062_v30 = vmul.f32 %v2061_v54, %v3357_v25  ;;  %v1724_v12 = vadd.f32 %v1720_v3, %v1712_v22  ;;  %v2063_v19 = vmul.f32 %v2061_v54, %v3373_v46 }
 0x1fc   : > { %v1725_v34 = vadd.f32 %v1721_v11, %v1713_v28  ;;  %v2046_v20 = vadd.f32 %v2044_v33, %v4043_v59  ;;  %v1733_v49 = vrot.slane %v1729_v55, 2  ;;  %v2047_v60 = vadd.f32 %v2045_v10, %v4058_v15  ;;  %p2678_p1 = pnand %p2677_p0, %p2673_p10 }
 0x1fd   : > { %v2054_v40 = vrot.slane %v2050_v13, 1  ;;  %v2055_v31 = vrot.slane %v2051_v27, 1  ;;  %v1736_v47 = vadd.f32 %v1732_v51, %v1724_v12  ;;  %v1744_v52 = vrot.slane %v1740_v6, 3 }
 0x1fe   : > { %v2066_v4 = vrot.slane %v2062_v30, 2  ;;  %v2074_v39 = vmul.f32 %v2073_v63, %v3357_v25  ;;  %v2067_v58 = vrot.slane %v2063_v19, 2  ;;  %v2075_v54 = vmul.f32 %v2073_v63, %v3373_v46 }
 0x1ff   : > { %v2058_v59 = vadd.f32 %v2054_v40, %v2046_v20  ;;  %v2059_v16 = vadd.f32 %v2055_v31, %v2047_v60  ;;  %v1737_v26 = vadd.f32 %v1733_v49, %v1725_v34  ;;  %v2086_v45 = vmul.f32 %v2085_v38, %v3436_v0 }
 0x200   : > { %v2078_v15 = vrot.slane %v2074_v39, 3  ;;  %v2087_v62 = vmul.f32 %v2085_v38, %v3480_v5  ;;  %v2079_v14 = vrot.slane %v2075_v54, 3  ;;  %v2092_v2 = vmul.f32 %v2091_v17, %v3436_v0 }
 0x201   : > { %v2070_v23 = vadd.f32 %v2066_v4, %v2058_v59  ;;  %v2071_v25 = vadd.f32 %v2067_v58, %v2059_v16  ;;  %v1745_v57 = vrot.slane %v1741_v24, 3  ;;  %v1748_v35 = vadd.f32 %v1744_v52, %v1736_v47 }
 0x202   : > { %v2093_v46 = vmul.f32 %v2091_v17, %v3480_v5  ;;  %v2104_v63 = vmul.f32 %v2103_v41, %v3436_v0  ;;  %v2096_v7 = vrot.slane %v2092_v2, 1  ;;  %v2105_v38 = vmul.f32 %v2103_v41, %v3480_v5 }
 0x203   : > { %v2082_v37 = vadd.f32 %v2078_v15, %v2070_v23  ;;  %v2083_v8 = vadd.f32 %v2079_v14, %v2071_v25  ;;  %v1749_v44 = vadd.f32 %v1745_v57, %v1737_v26  ;;  %v2116_v61 = vmul.f32 %v2115_v1, %v3436_v0 }
 0x204   : > { %v2097_v42 = vrot.slane %v2093_v46, 1  ;;  %v2117_v29 = vmul.f32 %v2115_v1, %v3480_v5  ;;  %v2128_v18 = vrot.slane %v4144_v48, 7  ;;  %v996_v3 = vadd.f32 %v992_v9, %v4080_v50 }
 0x205   : > { %v2088_v43 = vadd.f32 %v2086_v45, %v2082_v37  ;;  %v2089_v17 = vadd.f32 %v2087_v62, %v2083_v8  ;;  %v997_v41 = vadd.f32 %v993_v32, %v985_v21  ;;  %v2129_v0 = vrot.slane %v4152_v56, 7  ;;  %v2157_v56 = vpop.permute.xlu1 %2156 }
 0x206   : > { %v2108_v5 = vrot.slane %v2104_v63, 2  ;;  %v2109_v1 = vrot.slane %v2105_v38, 2  ;;  %v2120_v6 = vrot.slane %v2116_v61, 3  ;;  %v2121_v24 = vrot.slane %v2117_v29, 3 }
 0x207   : > { %v2100_v11 = vadd.f32 %v2096_v7, %v2088_v43  ;;  %v2101_v55 = vadd.f32 %v2097_v42, %v2089_v17  ;;  %v2134_v22 = vrot.slane %v1748_v35, 6  ;;  %v2135_v48 = vrot.slane %v1749_v44, 6 }
 0x208   : > { %v2145_v36 = vsel %vm2144_vm8, %v996_v3, %v2128_v18  ;;  %v2146_v9 = vsel %vm2144_vm8, %v997_v41, %v2129_v0 }
 0x209   : > { %v2112_v28 = vadd.f32 %v2108_v5, %v2100_v11  ;;  %v2113_v51 = vadd.f32 %v2109_v1, %v2101_v55  ;;  %v2148_v32 = vsel %vm2147_vm9, %v2145_v36, %v2134_v22  ;;  %v2149_v21 = vsel %vm2147_vm9, %v2146_v9, %v2135_v48 }
 0x20b   : > { %v2124_v53 = vadd.f32 %v2120_v6, %v2112_v28  ;;  %v2125_v50 = vadd.f32 %v2121_v24, %v2113_v51 }
 0x20d   : > { %v2140_v33 = vrot.slane %v2124_v53, 5  ;;  %v2141_v10 = vrot.slane %v2125_v50, 5 }
 0x20f   : > { %v2151_v13 = vsel %vm2150_vm10, %v2148_v32, %v2140_v33  ;;  %v2152_v27 = vsel %vm2150_vm10, %v2149_v21, %v2141_v10 }
 0x210   : > { %v2160_v30 = vadd.f32 %v2157_v56, %v2152_v27  ;;  %v2159_v12 = vadd.f32 %v2157_v56, %v2151_v13 }
 0x212   : > { %v2163_v34 = vrot.slane %v2160_v30, 4 }
 0x214   : > { %v2165_v20 = vsel %vm2164_vm11, %v2159_v12, %v2163_v34 }
 0x215   : > { %2167 = vst [vmem:[%s264_s30] sm:$0xff] %v2165_v20 }
 0x216   : > { %2681 = shalt.err (!%p2678_p1)
}
 0x217   : > { %2493 = dma.vmem_to_hbm [thread:$0]  (%p2836_p8), %s2183_s7, 128, %s2185_s10, %s2169_s13  }
 0x218 PF: > { %s4356_s28 = sld [smem:[#allocation15_spill]]  ;;  %p2507_p2 = pnand %p2293_p13, %p2840_p9 }
 0x219   : > { %s4358_s26 = sld [smem:[#allocation20_spill]] }
 0x21a   : > { %p2508_p4 = pneg %p2507_p2 }
 0x21e   : > { %s2196_s4 = sand.u32 1, %s4356_s28  }
 0x21f   : > { %s2197_s29 = scalar_lea.sflag [#allocation5], %s2196_s4 }
 0x220   : > { %2719 = dma.done.wait (%p2508_p4), %s2197_s29, 128  }
 0x221   : > { %2721 = vsyncadd (%p2508_p4), %s2197_s29, 4294967168  ;;  %s22_s20 = sadd.s32 1, %s4358_s26   ;;  %s4359_s15 = sld [smem:[#allocation16_spill]] }
 0x222   : > { %p19_p5 = scmp.ge.s32.totalorder %s22_s20, 4   ;;  %s4360_s16 = sld [smem:[#allocation17_spill]] }
 0x223   : > { %s4361_s17 = sld [smem:[#allocation24_spill]] }
 0x224   : > { %s4362_s18 = sld [smem:[#allocation19_spill]]  ;;  %21 = sbr.rel (!%p19_p5) target bundleno = 14 (0xe), region = 160 }
 0x225   : > { %s4363_s19 = sld [smem:[#allocation23_spill]] }
 0x229   :  { %2203 = vsyncpa [#allocation4], 1 }
 0x22a   :  { %2205 = vsyncpa [#allocation4 + $0x1], 1 }
 0x22b   :  { %2206 = vsyncpa [#allocation9], 1 }
 0x22c   :  { %2207 = vsyncpa [#allocation5], 1 }
 0x22d   :  { %2209 = vsyncpa [#allocation5 + $0x1], 1 }
 0x22e   :  { %2210 = vsyncpa [#allocation6], 1 }
 0x22f   :  { %2212 = vsyncpa [#allocation6 + $0x1], 1 }

</bundles_post_ra>
